<compile_context>
chip_gen: v5e
topology: v5e:2x2
jax: 0.10.0
libtpu: 0.0.40
codegen_flags: <defaults>
</compile_context>

<pallas_src>
from math import sqrt
import numpy as np
import jax
import jax.numpy as jnp
from jax.experimental import pallas as pl
from jax.experimental.pallas import tpu as pltpu


# ---------------- problem sizes (small, consistent with the module) ----------
B = 2          # batch
SEQ_LEN = 8    # seq_len
D_MODEL = 32   # d_model
N_HEADS = 4
D_HEAD = D_MODEL // N_HEADS
D_FF = 4 * D_MODEL          # 128
R = 2                       # tensor-ring rank
EPS = 1e-5                  # nn.LayerNorm default eps
SCALE = 1.0 / sqrt(D_HEAD)  # FullAttention scale

LD = SEQ_LEN * D_MODEL      # flattened ffn input size  (prod(input_size))  = 256
LF = SEQ_LEN * D_FF         # flattened ffn hidden size (prod(output_size)) = 1024


# ---------------- helpers (plain python / JAX glue) ---------------------------
def factorint(n, multiple=True):
    """Prime factorization with multiplicity (matches factorint(seq_len, multiple=True))."""
    fs, d = [], 2
    while d * d <= n:
        while n % d == 0:
            fs.append(d)
            n //= d
        d += 1
    if n > 1:
        fs.append(n)
    return fs


def tr_dense_weight(key, input_size, output_size, r):
    """Contract tensor-ring cores into the equivalent dense matrix
    of shape (prod(input_size), prod(output_size))."""
    dims = list(input_size) + list(output_size)
    keys = jax.random.split(key, len(dims))
    cores = [jax.random.normal(keys[i], (r, n, r), dtype=jnp.float32) / r
             for i, n in enumerate(dims)]
    w = cores[0]                                   # (r, n1, r)
    for g in cores[1:]:
        w = jnp.einsum('a...c,cnd->a...nd', w, g)  # grow the chain
    w = jnp.trace(w, axis1=0, axis2=-1)            # close the ring -> shape dims
    return w.reshape(int(np.prod(input_size)), int(np.prod(output_size)))


# ---------------- fused Pallas kernel ------------------------------------------
def encoder_layer_kernel(x_ref, wqkv_ref, bqkv_ref, wo_ref, bo_ref,
                         g1_ref, be1_ref, g2_ref, be2_ref,
                         w1_ref, b1_ref, w2_ref, b2_ref,
                         o_ref, attn_ref,
                         xnf_sc, y_sc):
    """Attention + residual + LN1 + TR-FFN + residual + LN2, one batch element."""
    x = x_ref[0]                                                     # (L, D) f32

    # ---- fused Q|K|V projection: one (L, D) x (D, 3D) MXU dot ----
    qkv = jnp.dot(x, wqkv_ref[...],
                  preferred_element_type=jnp.float32) + bqkv_ref[...]  # (L, 3D)

    # ---- per-head attention; output projection folded into the head loop ----
    acc = jnp.zeros((SEQ_LEN, D_MODEL), jnp.float32)
    for h in range(N_HEADS):
        qh = qkv[:, h * D_HEAD:(h + 1) * D_HEAD]                          # (L, dh)
        kh = qkv[:, D_MODEL + h * D_HEAD:D_MODEL + (h + 1) * D_HEAD]      # (L, dh)
        vh = qkv[:, 2 * D_MODEL + h * D_HEAD:2 * D_MODEL + (h + 1) * D_HEAD]
        s = jnp.dot(qh, kh.T, preferred_element_type=jnp.float32) * SCALE
        s = s - jnp.max(s, axis=-1, keepdims=True)
        e = jnp.exp(s)
        p = e * pl.reciprocal(jnp.sum(e, axis=-1, keepdims=True), approx=True)
        attn_ref[0, h] = p                                                # (L, L)
        ctx = jnp.dot(p, vh, preferred_element_type=jnp.float32)          # (L, dh)
        acc = acc + jnp.dot(ctx, wo_ref[h],                               # (dh, D)
                            preferred_element_type=jnp.float32)
    new_x = acc + bo_ref[...]

    # ---- residual + LayerNorm1 (f32) ----
    x1 = x + new_x
    mu = jnp.mean(x1, axis=-1, keepdims=True)
    var = jnp.mean((x1 - mu) ** 2, axis=-1, keepdims=True)
    xn = (x1 - mu) * jax.lax.rsqrt(var + EPS) * g1_ref[...] + be1_ref[...]

    # ---- flatten xn -> (1, L*D) via static lane-offset stores (no relayout) --
    for l in range(SEQ_LEN):
        xnf_sc[:, l * D_MODEL:(l + 1) * D_MODEL] = xn[l:l + 1, :]

    # ---- TR-FFN (dense-equivalent): exactly two MXU dots -----------------
    h_vec = jnp.dot(xnf_sc[...].astype(jnp.bfloat16), w1_ref[...],
                    preferred_element_type=jnp.float32) + b1_ref[...]     # (1, LF)
    h_vec = jnp.maximum(h_vec, 0.0)                                       # ReLU (dropout = id)
    y_flat = jnp.dot(h_vec.astype(jnp.bfloat16), w2_ref[...],
                     preferred_element_type=jnp.float32) + b2_ref[...]    # (1, LD)

    # ---- unflatten y back to (L, D) rows (static lane slices) -------------
    for l in range(SEQ_LEN):
        y_sc[l:l + 1, :] = y_flat[:, l * D_MODEL:(l + 1) * D_MODEL]

    # ---- residual + LayerNorm2 (f32) ----
    z = xn + y_sc[...]
    mu2 = jnp.mean(z, axis=-1, keepdims=True)
    var2 = jnp.mean((z - mu2) ** 2, axis=-1, keepdims=True)
    o_ref[0] = (z - mu2) * jax.lax.rsqrt(var2 + EPS) * g2_ref[...] + be2_ref[...]


# ---------------- wrapper ------------------------------------------------------
def encoder_layer_forward(x, p):
    Bx, L, D = x.shape
    H, Dh = N_HEADS, D_HEAD

    # Pre-pack weights into kernel-friendly layouts (cheap; done by XLA outside
    # the kernel).  TR-FFN weights in bf16 halve HBM traffic and use the native
    # bf16 MXU path; attention weights stay f32 (only ~16 KiB).
    wqkv = jnp.concatenate([p['wq'], p['wk'], p['wv']], axis=1)    # (D, 3D)
    bqkv = jnp.concatenate([p['bq'], p['bk'], p['bv']], axis=1)    # (1, 3D)
    wo_r = p['wo'].reshape(H, Dh, D)                               # (H, dh, D)
    w1_bf = p['w1'].astype(jnp.bfloat16)                           # (LD, LF)
    w2_bf = p['w2'].astype(jnp.bfloat16)                           # (LF, LD)

    def cspec(shape):
        return pl.BlockSpec(shape, lambda b, n=len(shape): (0,) * n)

    out, attn = pl.pallas_call(
        encoder_layer_kernel,
        grid=(Bx,),
        in_specs=[
            pl.BlockSpec((1, L, D), lambda b: (b, 0, 0)),   # x
            cspec((D, 3 * D)),                              # packed wq|wk|wv
            cspec((1, 3 * D)),                              # packed bq|bk|bv
            cspec((H, Dh, D)),                              # wo (reshaped)
            cspec((1, D)),                                  # bo
            cspec((1, D)), cspec((1, D)),                   # g1, be1
            cspec((1, D)), cspec((1, D)),                   # g2, be2
            cspec((LD, LF)),                                # w1 (bf16)
            cspec((1, LF)),                                 # b1
            cspec((LF, LD)),                                # w2 (bf16)
            cspec((1, LD)),                                 # b2
        ],
        out_specs=(pl.BlockSpec((1, L, D), lambda b: (b, 0, 0)),
                   pl.BlockSpec((1, H, L, L), lambda b: (b, 0, 0, 0))),
        out_shape=(jax.ShapeDtypeStruct((Bx, L, D), jnp.float32),
                   jax.ShapeDtypeStruct((Bx, H, L, L), jnp.float32)),
        scratch_shapes=[pltpu.VMEM((1, LD), jnp.float32),   # flattened LN1 output
                        pltpu.VMEM((L, D), jnp.float32)],   # conv2 output rows
        compiler_params=pltpu.CompilerParams(dimension_semantics=("parallel",)),
    )(x, wqkv, bqkv, wo_r, p['bo'],
      p['g1'], p['be1'], p['g2'], p['be2'],
      w1_bf, p['b1'], w2_bf, p['b2'])

    return out, attn


encoder_layer_forward_jit = jax.jit(encoder_layer_forward)


# ---------------- pure-JAX reference (for correctness check) -------------------
def reference_forward(x, p):
    Bx, L, D = x.shape
    q = (x @ p['wq'] + p['bq']).reshape(Bx, L, N_HEADS, D_HEAD)
    k = (x @ p['wk'] + p['bk']).reshape(Bx, L, N_HEADS, D_HEAD)
    v = (x @ p['wv'] + p['bv']).reshape(Bx, L, N_HEADS, D_HEAD)
    scores = jnp.einsum('blhe,bshe->bhls', q, k) * SCALE
    A = jax.nn.softmax(scores, axis=-1)
    ctx = jnp.einsum('bhls,bshd->blhd', A, v).reshape(Bx, L, D)
    new_x = ctx @ p['wo'] + p['bo']
    x1 = x + new_x

    def ln(z, g, b):
        mu = jnp.mean(z, axis=-1, keepdims=True)
        var = jnp.mean((z - mu) ** 2, axis=-1, keepdims=True)
        return (z - mu) * jax.lax.rsqrt(var + EPS) * g + b

    xn = ln(x1, p['g1'], p['be1'])
    # Mirror the kernel's bf16-at-the-MXU policy for the TR-FFN matmuls so the
    # comparison measures kernel correctness, not bf16 quantization.
    xnb = xn.reshape(Bx, LD).astype(jnp.bfloat16)
    w1b = p['w1'].astype(jnp.bfloat16)
    w2b = p['w2'].astype(jnp.bfloat16)
    h = jnp.maximum(jnp.dot(xnb, w1b, preferred_element_type=jnp.float32) + p['b1'], 0.0)
    y = (jnp.dot(h.astype(jnp.bfloat16), w2b, preferred_element_type=jnp.float32)
         + p['b2']).reshape(Bx, L, D)
    return ln(xn + y, p['g2'], p['be2']), A


# ---------------- main ----------------------------------------------------------
if __name__ == "__main__":
    key = jax.random.PRNGKey(0)
    ks = jax.random.split(key, 12)

    x = jax.random.normal(ks[0], (B, SEQ_LEN, D_MODEL), dtype=jnp.float32)

    si = 0.05
    params = {
        # attention projections (AttentionLayer: q/k/v/out nn.Linear d_model->d_model)
        'wq': jax.random.normal(ks[1], (D_MODEL, D_MODEL), jnp.float32) * si,
        'wk': jax.random.normal(ks[2], (D_MODEL, D_MODEL), jnp.float32) * si,
        'wv': jax.random.normal(ks[3], (D_MODEL, D_MODEL), jnp.float32) * si,
        'wo': jax.random.normal(ks[4], (D_MODEL, D_MODEL), jnp.float32) * si,
        'bq': jax.random.normal(ks[5], (1, D_MODEL), jnp.float32) * 0.01,
        'bk': jax.random.normal(ks[6], (1, D_MODEL), jnp.float32) * 0.01,
        'bv': jax.random.normal(ks[7], (1, D_MODEL), jnp.float32) * 0.01,
        'bo': jax.random.normal(ks[8], (1, D_MODEL), jnp.float32) * 0.01,
        # LayerNorm params (PyTorch init: ones / zeros)
        'g1': jnp.ones((1, D_MODEL), jnp.float32),
        'be1': jnp.zeros((1, D_MODEL), jnp.float32),
        'g2': jnp.ones((1, D_MODEL), jnp.float32),
        'be2': jnp.zeros((1, D_MODEL), jnp.float32),
    }

    # TR-Linear FFN: input_size = factorint(seq_len) + [d_model], output_size = [seq_len, d_ff]
    # (tensor-ring cores contracted to their dense-equivalent matrices outside the kernel)
    input_size = factorint(SEQ_LEN, multiple=True) + [D_MODEL]
    output_size = [SEQ_LEN, D_FF]
    params['w1'] = tr_dense_weight(ks[9], input_size, output_size, R)       # (LD, LF)
    params['w2'] = tr_dense_weight(ks[10], output_size, input_size, R)      # (LF, LD)
    params['b1'] = jnp.zeros((1, LF), jnp.float32)
    params['b2'] = jnp.zeros((1, LD), jnp.float32)

    # TODO(synk): dropout layers are treated as identity (eval mode).

    out, attn = encoder_layer_forward_jit(x, params)
    out = jax.block_until_ready(out)
    attn = jax.block_until_ready(attn)

    ref_out, ref_attn = reference_forward(x, params)
    assert out.shape == (B, SEQ_LEN, D_MODEL)
    assert attn.shape == (B, N_HEADS, SEQ_LEN, SEQ_LEN)
    assert float(jnp.max(jnp.abs(out - ref_out))) < 2e-2
    assert float(jnp.max(jnp.abs(attn - ref_attn))) < 2e-2

    print("KERNEL_OK")
</pallas_src>

<mosaic_0001>
module attributes {stable_mosaic.version = 11 : i64} {
  func.func @encoder_layer_kernel(%arg0: i32, %arg1: memref<1x8x32xf32, #tpu.memory_space<vmem>>, %arg2: memref<32x96xf32, #tpu.memory_space<vmem>>, %arg3: memref<1x96xf32, #tpu.memory_space<vmem>>, %arg4: memref<4x8x32xf32, #tpu.memory_space<vmem>>, %arg5: memref<1x32xf32, #tpu.memory_space<vmem>>, %arg6: memref<1x32xf32, #tpu.memory_space<vmem>>, %arg7: memref<1x32xf32, #tpu.memory_space<vmem>>, %arg8: memref<1x32xf32, #tpu.memory_space<vmem>>, %arg9: memref<1x32xf32, #tpu.memory_space<vmem>>, %arg10: memref<256x1024xbf16, #tpu.memory_space<vmem>>, %arg11: memref<1x1024xf32, #tpu.memory_space<vmem>>, %arg12: memref<1024x256xbf16, #tpu.memory_space<vmem>>, %arg13: memref<1x256xf32, #tpu.memory_space<vmem>>, %arg14: memref<1x8x32xf32, #tpu.memory_space<vmem>>, %arg15: memref<1x4x8x8xf32, #tpu.memory_space<vmem>>, %arg16: memref<1x256xf32, #tpu.memory_space<vmem>>, %arg17: memref<8x32xf32, #tpu.memory_space<vmem>>) attributes {dimension_semantics = [#tpu.dimension_semantics<parallel>], iteration_bounds = array<i64: 2>, scalar_prefetch = 0 : i64, scratch_operands = 2 : i64, tpu.core_type = #tpu.core_type<tc>, window_params = [{transform_indices = @transform_0, window_bounds = array<i64: 1, 8, 32>}, {pipeline_mode = #tpu.pipeline_mode<synchronous>, transform_indices = @transform_1, window_bounds = array<i64: 32, 96>}, {pipeline_mode = #tpu.pipeline_mode<synchronous>, transform_indices = @transform_2, window_bounds = array<i64: 1, 96>}, {pipeline_mode = #tpu.pipeline_mode<synchronous>, transform_indices = @transform_3, window_bounds = array<i64: 4, 8, 32>}, {pipeline_mode = #tpu.pipeline_mode<synchronous>, transform_indices = @transform_4, window_bounds = array<i64: 1, 32>}, {pipeline_mode = #tpu.pipeline_mode<synchronous>, transform_indices = @transform_5, window_bounds = array<i64: 1, 32>}, {pipeline_mode = #tpu.pipeline_mode<synchronous>, transform_indices = @transform_6, window_bounds = array<i64: 1, 32>}, {pipeline_mode = #tpu.pipeline_mode<synchronous>, transform_indices = @transform_7, window_bounds = array<i64: 1, 32>}, {pipeline_mode = #tpu.pipeline_mode<synchronous>, transform_indices = @transform_8, window_bounds = array<i64: 1, 32>}, {pipeline_mode = #tpu.pipeline_mode<synchronous>, transform_indices = @transform_9, window_bounds = array<i64: 256, 1024>}, {pipeline_mode = #tpu.pipeline_mode<synchronous>, transform_indices = @transform_10, window_bounds = array<i64: 1, 1024>}, {pipeline_mode = #tpu.pipeline_mode<synchronous>, transform_indices = @transform_11, window_bounds = array<i64: 1024, 256>}, {pipeline_mode = #tpu.pipeline_mode<synchronous>, transform_indices = @transform_12, window_bounds = array<i64: 1, 256>}, {transform_indices = @transform_13, window_bounds = array<i64: 1, 8, 32>}, {transform_indices = @transform_14, window_bounds = array<i64: 1, 4, 8, 8>}]} {
    %c0 = arith.constant 0 : index
    %c0_0 = arith.constant 0 : index
    %c0_1 = arith.constant 0 : index
    %0 = vector.load %arg1[%c0, %c0_0, %c0_1] : memref<1x8x32xf32, #tpu.memory_space<vmem>>, vector<1x8x32xf32>
    %1 = vector.shape_cast %0 : vector<1x8x32xf32> to vector<8x32xf32>
    %c0_2 = arith.constant 0 : index
    %c0_3 = arith.constant 0 : index
    %2 = vector.load %arg2[%c0_2, %c0_3] : memref<32x96xf32, #tpu.memory_space<vmem>>, vector<32x96xf32>
    %cst = arith.constant dense<0.000000e+00> : vector<8x96xf32>
    %3 = tpu.matmul %1, %2, %cst {dimension_numbers = #tpu.dot_dimension_numbers<[1], [0], [0], [1], [0, 0, 1, 1], [], []>} : vector<8x32xf32>, vector<32x96xf32>, vector<8x96xf32> -> vector<8x96xf32>
    %c0_4 = arith.constant 0 : index
    %c0_5 = arith.constant 0 : index
    %4 = vector.load %arg3[%c0_4, %c0_5] : memref<1x96xf32, #tpu.memory_space<vmem>>, vector<1x96xf32>
    %5 = vector.broadcast %4 : vector<1x96xf32> to vector<8x96xf32>
    %6 = arith.addf %3, %5 : vector<8x96xf32>
    %cst_6 = arith.constant 0.000000e+00 : f32
    %7 = vector.broadcast %cst_6 : f32 to vector<8x32xf32>
    %8 = vector.extract_strided_slice %6 {offsets = [0, 0], sizes = [8, 8], strides = [1, 1]} : vector<8x96xf32> to vector<8x8xf32>
    %9 = vector.extract_strided_slice %6 {offsets = [0, 32], sizes = [8, 8], strides = [1, 1]} : vector<8x96xf32> to vector<8x8xf32>
    %10 = vector.extract_strided_slice %6 {offsets = [0, 64], sizes = [8, 8], strides = [1, 1]} : vector<8x96xf32> to vector<8x8xf32>
    %11 = tpu.transpose %9, [1, 0] : vector<8x8xf32> -> vector<8x8xf32>
    %cst_7 = arith.constant dense<0.000000e+00> : vector<8x8xf32>
    %12 = tpu.matmul %8, %11, %cst_7 {dimension_numbers = #tpu.dot_dimension_numbers<[1], [0], [0], [1], [0, 0, 1, 1], [], []>} : vector<8x8xf32>, vector<8x8xf32>, vector<8x8xf32> -> vector<8x8xf32>
    %cst_8 = arith.constant 0.353553385 : f32
    %13 = vector.broadcast %cst_8 : f32 to vector<8x8xf32>
    %14 = arith.mulf %12, %13 : vector<8x8xf32>
    %cst_9 = arith.constant dense<0xFF800000> : vector<8xf32>
    %15 = vector.multi_reduction <maximumf>, %14, %cst_9 [1] : vector<8x8xf32> to vector<8xf32>
    %16 = vector.shape_cast %15 : vector<8xf32> to vector<8x1xf32>
    %17 = vector.broadcast %16 : vector<8x1xf32> to vector<8x8xf32>
    %18 = arith.subf %14, %17 : vector<8x8xf32>
    %19 = math.exp %18 : vector<8x8xf32>
    %cst_10 = arith.constant dense<0.000000e+00> : vector<8xf32>
    %20 = vector.multi_reduction <add>, %19, %cst_10 [1] : vector<8x8xf32> to vector<8xf32>
    %21 = vector.shape_cast %20 : vector<8xf32> to vector<8x1xf32>
    %22 = tpu.reciprocal %21 {approx = true} : vector<8x1xf32> -> vector<8x1xf32>
    %23 = vector.broadcast %22 : vector<8x1xf32> to vector<8x8xf32>
    %24 = arith.mulf %19, %23 : vector<8x8xf32>
    %c0_11 = arith.constant 0 : index
    %c0_12 = arith.constant 0 : index
    %c0_13 = arith.constant 0 : index
    %c0_14 = arith.constant 0 : index
    %25 = vector.load %arg15[%c0_11, %c0_12, %c0_13, %c0_14] : memref<1x4x8x8xf32, #tpu.memory_space<vmem>>, vector<1x1x8x8xf32>
    %26 = vector.shape_cast %25 : vector<1x1x8x8xf32> to vector<8x8xf32>
    %27 = vector.shape_cast %24 : vector<8x8xf32> to vector<1x1x8x8xf32>
    tpu.vector_store %arg15[%c0_11, %c0_12, %c0_13, %c0_14], %27 {strides = array<i32>} : memref<1x4x8x8xf32, #tpu.memory_space<vmem>>, vector<1x1x8x8xf32>,
    %cst_15 = arith.constant dense<0.000000e+00> : vector<8x8xf32>
    %28 = tpu.matmul %24, %10, %cst_15 {dimension_numbers = #tpu.dot_dimension_numbers<[1], [0], [0], [1], [0, 0, 1, 1], [], []>} : vector<8x8xf32>, vector<8x8xf32>, vector<8x8xf32> -> vector<8x8xf32>
    %c0_16 = arith.constant 0 : index
    %c0_17 = arith.constant 0 : index
    %c0_18 = arith.constant 0 : index
    %29 = vector.load %arg4[%c0_16, %c0_17, %c0_18] : memref<4x8x32xf32, #tpu.memory_space<vmem>>, vector<1x8x32xf32>
    %30 = vector.shape_cast %29 : vector<1x8x32xf32> to vector<8x32xf32>
    %cst_19 = arith.constant dense<0.000000e+00> : vector<8x32xf32>
    %31 = tpu.matmul %28, %30, %cst_19 {dimension_numbers = #tpu.dot_dimension_numbers<[1], [0], [0], [1], [0, 0, 1, 1], [], []>} : vector<8x8xf32>, vector<8x32xf32>, vector<8x32xf32> -> vector<8x32xf32>
    %32 = arith.addf %7, %31 : vector<8x32xf32>
    %33 = vector.extract_strided_slice %6 {offsets = [0, 8], sizes = [8, 8], strides = [1, 1]} : vector<8x96xf32> to vector<8x8xf32>
    %34 = vector.extract_strided_slice %6 {offsets = [0, 40], sizes = [8, 8], strides = [1, 1]} : vector<8x96xf32> to vector<8x8xf32>
    %35 = vector.extract_strided_slice %6 {offsets = [0, 72], sizes = [8, 8], strides = [1, 1]} : vector<8x96xf32> to vector<8x8xf32>
    %36 = tpu.transpose %34, [1, 0] : vector<8x8xf32> -> vector<8x8xf32>
    %cst_20 = arith.constant dense<0.000000e+00> : vector<8x8xf32>
    %37 = tpu.matmul %33, %36, %cst_20 {dimension_numbers = #tpu.dot_dimension_numbers<[1], [0], [0], [1], [0, 0, 1, 1], [], []>} : vector<8x8xf32>, vector<8x8xf32>, vector<8x8xf32> -> vector<8x8xf32>
    %cst_21 = arith.constant 0.353553385 : f32
    %38 = vector.broadcast %cst_21 : f32 to vector<8x8xf32>
    %39 = arith.mulf %37, %38 : vector<8x8xf32>
    %cst_22 = arith.constant dense<0xFF800000> : vector<8xf32>
    %40 = vector.multi_reduction <maximumf>, %39, %cst_22 [1] : vector<8x8xf32> to vector<8xf32>
    %41 = vector.shape_cast %40 : vector<8xf32> to vector<8x1xf32>
    %42 = vector.broadcast %41 : vector<8x1xf32> to vector<8x8xf32>
    %43 = arith.subf %39, %42 : vector<8x8xf32>
    %44 = math.exp %43 : vector<8x8xf32>
    %cst_23 = arith.constant dense<0.000000e+00> : vector<8xf32>
    %45 = vector.multi_reduction <add>, %44, %cst_23 [1] : vector<8x8xf32> to vector<8xf32>
    %46 = vector.shape_cast %45 : vector<8xf32> to vector<8x1xf32>
    %47 = tpu.reciprocal %46 {approx = true} : vector<8x1xf32> -> vector<8x1xf32>
    %48 = vector.broadcast %47 : vector<8x1xf32> to vector<8x8xf32>
    %49 = arith.mulf %44, %48 : vector<8x8xf32>
    %c0_24 = arith.constant 0 : index
    %c1 = arith.constant 1 : index
    %c0_25 = arith.constant 0 : index
    %c0_26 = arith.constant 0 : index
    %50 = vector.load %arg15[%c0_24, %c1, %c0_25, %c0_26] : memref<1x4x8x8xf32, #tpu.memory_space<vmem>>, vector<1x1x8x8xf32>
    %51 = vector.shape_cast %50 : vector<1x1x8x8xf32> to vector<8x8xf32>
    %52 = vector.shape_cast %49 : vector<8x8xf32> to vector<1x1x8x8xf32>
    tpu.vector_store %arg15[%c0_24, %c1, %c0_25, %c0_26], %52 {strides = array<i32>} : memref<1x4x8x8xf32, #tpu.memory_space<vmem>>, vector<1x1x8x8xf32>,
    %cst_27 = arith.constant dense<0.000000e+00> : vector<8x8xf32>
    %53 = tpu.matmul %49, %35, %cst_27 {dimension_numbers = #tpu.dot_dimension_numbers<[1], [0], [0], [1], [0, 0, 1, 1], [], []>} : vector<8x8xf32>, vector<8x8xf32>, vector<8x8xf32> -> vector<8x8xf32>
    %c1_28 = arith.constant 1 : index
    %c0_29 = arith.constant 0 : index
    %c0_30 = arith.constant 0 : index
    %54 = vector.load %arg4[%c1_28, %c0_29, %c0_30] : memref<4x8x32xf32, #tpu.memory_space<vmem>>, vector<1x8x32xf32>
    %55 = vector.shape_cast %54 : vector<1x8x32xf32> to vector<8x32xf32>
    %cst_31 = arith.constant dense<0.000000e+00> : vector<8x32xf32>
    %56 = tpu.matmul %53, %55, %cst_31 {dimension_numbers = #tpu.dot_dimension_numbers<[1], [0], [0], [1], [0, 0, 1, 1], [], []>} : vector<8x8xf32>, vector<8x32xf32>, vector<8x32xf32> -> vector<8x32xf32>
    %57 = arith.addf %32, %56 : vector<8x32xf32>
    %58 = vector.extract_strided_slice %6 {offsets = [0, 16], sizes = [8, 8], strides = [1, 1]} : vector<8x96xf32> to vector<8x8xf32>
    %59 = vector.extract_strided_slice %6 {offsets = [0, 48], sizes = [8, 8], strides = [1, 1]} : vector<8x96xf32> to vector<8x8xf32>
    %60 = vector.extract_strided_slice %6 {offsets = [0, 80], sizes = [8, 8], strides = [1, 1]} : vector<8x96xf32> to vector<8x8xf32>
    %61 = tpu.transpose %59, [1, 0] : vector<8x8xf32> -> vector<8x8xf32>
    %cst_32 = arith.constant dense<0.000000e+00> : vector<8x8xf32>
    %62 = tpu.matmul %58, %61, %cst_32 {dimension_numbers = #tpu.dot_dimension_numbers<[1], [0], [0], [1], [0, 0, 1, 1], [], []>} : vector<8x8xf32>, vector<8x8xf32>, vector<8x8xf32> -> vector<8x8xf32>
    %cst_33 = arith.constant 0.353553385 : f32
    %63 = vector.broadcast %cst_33 : f32 to vector<8x8xf32>
    %64 = arith.mulf %62, %63 : vector<8x8xf32>
    %cst_34 = arith.constant dense<0xFF800000> : vector<8xf32>
    %65 = vector.multi_reduction <maximumf>, %64, %cst_34 [1] : vector<8x8xf32> to vector<8xf32>
    %66 = vector.shape_cast %65 : vector<8xf32> to vector<8x1xf32>
    %67 = vector.broadcast %66 : vector<8x1xf32> to vector<8x8xf32>
    %68 = arith.subf %64, %67 : vector<8x8xf32>
    %69 = math.exp %68 : vector<8x8xf32>
    %cst_35 = arith.constant dense<0.000000e+00> : vector<8xf32>
    %70 = vector.multi_reduction <add>, %69, %cst_35 [1] : vector<8x8xf32> to vector<8xf32>
    %71 = vector.shape_cast %70 : vector<8xf32> to vector<8x1xf32>
    %72 = tpu.reciprocal %71 {approx = true} : vector<8x1xf32> -> vector<8x1xf32>
    %73 = vector.broadcast %72 : vector<8x1xf32> to vector<8x8xf32>
    %74 = arith.mulf %69, %73 : vector<8x8xf32>
    %c0_36 = arith.constant 0 : index
    %c2 = arith.constant 2 : index
    %c0_37 = arith.constant 0 : index
    %c0_38 = arith.constant 0 : index
    %75 = vector.load %arg15[%c0_36, %c2, %c0_37, %c0_38] : memref<1x4x8x8xf32, #tpu.memory_space<vmem>>, vector<1x1x8x8xf32>
    %76 = vector.shape_cast %75 : vector<1x1x8x8xf32> to vector<8x8xf32>
    %77 = vector.shape_cast %74 : vector<8x8xf32> to vector<1x1x8x8xf32>
    tpu.vector_store %arg15[%c0_36, %c2, %c0_37, %c0_38], %77 {strides = array<i32>} : memref<1x4x8x8xf32, #tpu.memory_space<vmem>>, vector<1x1x8x8xf32>,
    %cst_39 = arith.constant dense<0.000000e+00> : vector<8x8xf32>
    %78 = tpu.matmul %74, %60, %cst_39 {dimension_numbers = #tpu.dot_dimension_numbers<[1], [0], [0], [1], [0, 0, 1, 1], [], []>} : vector<8x8xf32>, vector<8x8xf32>, vector<8x8xf32> -> vector<8x8xf32>
    %c2_40 = arith.constant 2 : index
    %c0_41 = arith.constant 0 : index
    %c0_42 = arith.constant 0 : index
    %79 = vector.load %arg4[%c2_40, %c0_41, %c0_42] : memref<4x8x32xf32, #tpu.memory_space<vmem>>, vector<1x8x32xf32>
    %80 = vector.shape_cast %79 : vector<1x8x32xf32> to vector<8x32xf32>
    %cst_43 = arith.constant dense<0.000000e+00> : vector<8x32xf32>
    %81 = tpu.matmul %78, %80, %cst_43 {dimension_numbers = #tpu.dot_dimension_numbers<[1], [0], [0], [1], [0, 0, 1, 1], [], []>} : vector<8x8xf32>, vector<8x32xf32>, vector<8x32xf32> -> vector<8x32xf32>
    %82 = arith.addf %57, %81 : vector<8x32xf32>
    %83 = vector.extract_strided_slice %6 {offsets = [0, 24], sizes = [8, 8], strides = [1, 1]} : vector<8x96xf32> to vector<8x8xf32>
    %84 = vector.extract_strided_slice %6 {offsets = [0, 56], sizes = [8, 8], strides = [1, 1]} : vector<8x96xf32> to vector<8x8xf32>
    %85 = vector.extract_strided_slice %6 {offsets = [0, 88], sizes = [8, 8], strides = [1, 1]} : vector<8x96xf32> to vector<8x8xf32>
    %86 = tpu.transpose %84, [1, 0] : vector<8x8xf32> -> vector<8x8xf32>
    %cst_44 = arith.constant dense<0.000000e+00> : vector<8x8xf32>
    %87 = tpu.matmul %83, %86, %cst_44 {dimension_numbers = #tpu.dot_dimension_numbers<[1], [0], [0], [1], [0, 0, 1, 1], [], []>} : vector<8x8xf32>, vector<8x8xf32>, vector<8x8xf32> -> vector<8x8xf32>
    %cst_45 = arith.constant 0.353553385 : f32
    %88 = vector.broadcast %cst_45 : f32 to vector<8x8xf32>
    %89 = arith.mulf %87, %88 : vector<8x8xf32>
    %cst_46 = arith.constant dense<0xFF800000> : vector<8xf32>
    %90 = vector.multi_reduction <maximumf>, %89, %cst_46 [1] : vector<8x8xf32> to vector<8xf32>
    %91 = vector.shape_cast %90 : vector<8xf32> to vector<8x1xf32>
    %92 = vector.broadcast %91 : vector<8x1xf32> to vector<8x8xf32>
    %93 = arith.subf %89, %92 : vector<8x8xf32>
    %94 = math.exp %93 : vector<8x8xf32>
    %cst_47 = arith.constant dense<0.000000e+00> : vector<8xf32>
    %95 = vector.multi_reduction <add>, %94, %cst_47 [1] : vector<8x8xf32> to vector<8xf32>
    %96 = vector.shape_cast %95 : vector<8xf32> to vector<8x1xf32>
    %97 = tpu.reciprocal %96 {approx = true} : vector<8x1xf32> -> vector<8x1xf32>
    %98 = vector.broadcast %97 : vector<8x1xf32> to vector<8x8xf32>
    %99 = arith.mulf %94, %98 : vector<8x8xf32>
    %c0_48 = arith.constant 0 : index
    %c3 = arith.constant 3 : index
    %c0_49 = arith.constant 0 : index
    %c0_50 = arith.constant 0 : index
    %100 = vector.load %arg15[%c0_48, %c3, %c0_49, %c0_50] : memref<1x4x8x8xf32, #tpu.memory_space<vmem>>, vector<1x1x8x8xf32>
    %101 = vector.shape_cast %100 : vector<1x1x8x8xf32> to vector<8x8xf32>
    %102 = vector.shape_cast %99 : vector<8x8xf32> to vector<1x1x8x8xf32>
    tpu.vector_store %arg15[%c0_48, %c3, %c0_49, %c0_50], %102 {strides = array<i32>} : memref<1x4x8x8xf32, #tpu.memory_space<vmem>>, vector<1x1x8x8xf32>,
    %cst_51 = arith.constant dense<0.000000e+00> : vector<8x8xf32>
    %103 = tpu.matmul %99, %85, %cst_51 {dimension_numbers = #tpu.dot_dimension_numbers<[1], [0], [0], [1], [0, 0, 1, 1], [], []>} : vector<8x8xf32>, vector<8x8xf32>, vector<8x8xf32> -> vector<8x8xf32>
    %c3_52 = arith.constant 3 : index
    %c0_53 = arith.constant 0 : index
    %c0_54 = arith.constant 0 : index
    %104 = vector.load %arg4[%c3_52, %c0_53, %c0_54] : memref<4x8x32xf32, #tpu.memory_space<vmem>>, vector<1x8x32xf32>
    %105 = vector.shape_cast %104 : vector<1x8x32xf32> to vector<8x32xf32>
    %cst_55 = arith.constant dense<0.000000e+00> : vector<8x32xf32>
    %106 = tpu.matmul %103, %105, %cst_55 {dimension_numbers = #tpu.dot_dimension_numbers<[1], [0], [0], [1], [0, 0, 1, 1], [], []>} : vector<8x8xf32>, vector<8x32xf32>, vector<8x32xf32> -> vector<8x32xf32>
    %107 = arith.addf %82, %106 : vector<8x32xf32>
    %c0_56 = arith.constant 0 : index
    %c0_57 = arith.constant 0 : index
    %108 = vector.load %arg5[%c0_56, %c0_57] : memref<1x32xf32, #tpu.memory_space<vmem>>, vector<1x32xf32>
    %109 = vector.broadcast %108 : vector<1x32xf32> to vector<8x32xf32>
    %110 = arith.addf %107, %109 : vector<8x32xf32>
    %111 = arith.addf %1, %110 : vector<8x32xf32>
    %cst_58 = arith.constant dense<0.000000e+00> : vector<8xf32>
    %112 = vector.multi_reduction <add>, %111, %cst_58 [1] : vector<8x32xf32> to vector<8xf32>
    %113 = vector.shape_cast %112 : vector<8xf32> to vector<8x1xf32>
    %cst_59 = arith.constant 3.200000e+01 : f32
    %114 = vector.broadcast %cst_59 : f32 to vector<8x1xf32>
    %115 = arith.divf %113, %114 : vector<8x1xf32>
    %116 = vector.broadcast %115 : vector<8x1xf32> to vector<8x32xf32>
    %117 = arith.subf %111, %116 : vector<8x32xf32>
    %118 = arith.mulf %117, %117 : vector<8x32xf32>
    %cst_60 = arith.constant dense<0.000000e+00> : vector<8xf32>
    %119 = vector.multi_reduction <add>, %118, %cst_60 [1] : vector<8x32xf32> to vector<8xf32>
    %120 = vector.shape_cast %119 : vector<8xf32> to vector<8x1xf32>
    %cst_61 = arith.constant 3.200000e+01 : f32
    %121 = vector.broadcast %cst_61 : f32 to vector<8x1xf32>
    %122 = arith.divf %120, %121 : vector<8x1xf32>
    %123 = vector.broadcast %115 : vector<8x1xf32> to vector<8x32xf32>
    %124 = arith.subf %111, %123 : vector<8x32xf32>
    %cst_62 = arith.constant 9.99999974E-6 : f32
    %125 = vector.broadcast %cst_62 : f32 to vector<8x1xf32>
    %126 = arith.addf %122, %125 : vector<8x1xf32>
    %127 = math.rsqrt %126 : vector<8x1xf32>
    %128 = vector.broadcast %127 : vector<8x1xf32> to vector<8x32xf32>
    %129 = arith.mulf %124, %128 : vector<8x32xf32>
    %c0_63 = arith.constant 0 : index
    %c0_64 = arith.constant 0 : index
    %130 = vector.load %arg6[%c0_63, %c0_64] : memref<1x32xf32, #tpu.memory_space<vmem>>, vector<1x32xf32>
    %131 = vector.broadcast %130 : vector<1x32xf32> to vector<8x32xf32>
    %132 = arith.mulf %129, %131 : vector<8x32xf32>
    %c0_65 = arith.constant 0 : index
    %c0_66 = arith.constant 0 : index
    %133 = vector.load %arg7[%c0_65, %c0_66] : memref<1x32xf32, #tpu.memory_space<vmem>>, vector<1x32xf32>
    %134 = vector.broadcast %133 : vector<1x32xf32> to vector<8x32xf32>
    %135 = arith.addf %132, %134 : vector<8x32xf32>
    %136 = vector.extract_strided_slice %135 {offsets = [0, 0], sizes = [1, 32], strides = [1, 1]} : vector<8x32xf32> to vector<1x32xf32>
    %c0_67 = arith.constant 0 : index
    %c0_68 = arith.constant 0 : index
    %137 = vector.load %arg16[%c0_67, %c0_68] : memref<1x256xf32, #tpu.memory_space<vmem>>, vector<1x32xf32>
    tpu.vector_store %arg16[%c0_67, %c0_68], %136 {strides = array<i32>} : memref<1x256xf32, #tpu.memory_space<vmem>>, vector<1x32xf32>,
    %138 = vector.extract_strided_slice %135 {offsets = [1, 0], sizes = [1, 32], strides = [1, 1]} : vector<8x32xf32> to vector<1x32xf32>
    %c0_69 = arith.constant 0 : index
    %c32 = arith.constant 32 : index
    %139 = vector.load %arg16[%c0_69, %c32] : memref<1x256xf32, #tpu.memory_space<vmem>>, vector<1x32xf32>
    tpu.vector_store %arg16[%c0_69, %c32], %138 {strides = array<i32>} : memref<1x256xf32, #tpu.memory_space<vmem>>, vector<1x32xf32>,
    %140 = vector.extract_strided_slice %135 {offsets = [2, 0], sizes = [1, 32], strides = [1, 1]} : vector<8x32xf32> to vector<1x32xf32>
    %c0_70 = arith.constant 0 : index
    %c64 = arith.constant 64 : index
    %141 = vector.load %arg16[%c0_70, %c64] : memref<1x256xf32, #tpu.memory_space<vmem>>, vector<1x32xf32>
    tpu.vector_store %arg16[%c0_70, %c64], %140 {strides = array<i32>} : memref<1x256xf32, #tpu.memory_space<vmem>>, vector<1x32xf32>,
    %142 = vector.extract_strided_slice %135 {offsets = [3, 0], sizes = [1, 32], strides = [1, 1]} : vector<8x32xf32> to vector<1x32xf32>
    %c0_71 = arith.constant 0 : index
    %c96 = arith.constant 96 : index
    %143 = vector.load %arg16[%c0_71, %c96] : memref<1x256xf32, #tpu.memory_space<vmem>>, vector<1x32xf32>
    tpu.vector_store %arg16[%c0_71, %c96], %142 {strides = array<i32>} : memref<1x256xf32, #tpu.memory_space<vmem>>, vector<1x32xf32>,
    %144 = vector.extract_strided_slice %135 {offsets = [4, 0], sizes = [1, 32], strides = [1, 1]} : vector<8x32xf32> to vector<1x32xf32>
    %c0_72 = arith.constant 0 : index
    %c128 = arith.constant 128 : index
    %145 = vector.load %arg16[%c0_72, %c128] : memref<1x256xf32, #tpu.memory_space<vmem>>, vector<1x32xf32>
    tpu.vector_store %arg16[%c0_72, %c128], %144 {strides = array<i32>} : memref<1x256xf32, #tpu.memory_space<vmem>>, vector<1x32xf32>,
    %146 = vector.extract_strided_slice %135 {offsets = [5, 0], sizes = [1, 32], strides = [1, 1]} : vector<8x32xf32> to vector<1x32xf32>
    %c0_73 = arith.constant 0 : index
    %c160 = arith.constant 160 : index
    %147 = vector.load %arg16[%c0_73, %c160] : memref<1x256xf32, #tpu.memory_space<vmem>>, vector<1x32xf32>
    tpu.vector_store %arg16[%c0_73, %c160], %146 {strides = array<i32>} : memref<1x256xf32, #tpu.memory_space<vmem>>, vector<1x32xf32>,
    %148 = vector.extract_strided_slice %135 {offsets = [6, 0], sizes = [1, 32], strides = [1, 1]} : vector<8x32xf32> to vector<1x32xf32>
    %c0_74 = arith.constant 0 : index
    %c192 = arith.constant 192 : index
    %149 = vector.load %arg16[%c0_74, %c192] : memref<1x256xf32, #tpu.memory_space<vmem>>, vector<1x32xf32>
    tpu.vector_store %arg16[%c0_74, %c192], %148 {strides = array<i32>} : memref<1x256xf32, #tpu.memory_space<vmem>>, vector<1x32xf32>,
    %150 = vector.extract_strided_slice %135 {offsets = [7, 0], sizes = [1, 32], strides = [1, 1]} : vector<8x32xf32> to vector<1x32xf32>
    %c0_75 = arith.constant 0 : index
    %c224 = arith.constant 224 : index
    %151 = vector.load %arg16[%c0_75, %c224] : memref<1x256xf32, #tpu.memory_space<vmem>>, vector<1x32xf32>
    tpu.vector_store %arg16[%c0_75, %c224], %150 {strides = array<i32>} : memref<1x256xf32, #tpu.memory_space<vmem>>, vector<1x32xf32>,
    %c0_76 = arith.constant 0 : index
    %c0_77 = arith.constant 0 : index
    %152 = vector.load %arg16[%c0_76, %c0_77] : memref<1x256xf32, #tpu.memory_space<vmem>>, vector<1x256xf32>
    %153 = arith.truncf %152 : vector<1x256xf32> to vector<1x256xbf16>
    %c0_78 = arith.constant 0 : index
    %c0_79 = arith.constant 0 : index
    %154 = vector.load %arg10[%c0_78, %c0_79] : memref<256x1024xbf16, #tpu.memory_space<vmem>>, vector<256x1024xbf16>
    %cst_80 = arith.constant dense<0.000000e+00> : vector<1x1024xf32>
    %155 = tpu.matmul %153, %154, %cst_80 {dimension_numbers = #tpu.dot_dimension_numbers<[1], [0], [0], [1], [0, 0, 1, 1], [], []>} : vector<1x256xbf16>, vector<256x1024xbf16>, vector<1x1024xf32> -> vector<1x1024xf32>
    %c0_81 = arith.constant 0 : index
    %c0_82 = arith.constant 0 : index
    %156 = vector.load %arg11[%c0_81, %c0_82] : memref<1x1024xf32, #tpu.memory_space<vmem>>, vector<1x1024xf32>
    %157 = arith.addf %155, %156 : vector<1x1024xf32>
    %cst_83 = arith.constant 0.000000e+00 : f32
    %158 = vector.broadcast %cst_83 : f32 to vector<1x1024xf32>
    %159 = arith.maximumf %157, %158 : vector<1x1024xf32>
    %160 = arith.truncf %159 : vector<1x1024xf32> to vector<1x1024xbf16>
    %c0_84 = arith.constant 0 : index
    %c0_85 = arith.constant 0 : index
    %161 = vector.load %arg12[%c0_84, %c0_85] : memref<1024x256xbf16, #tpu.memory_space<vmem>>, vector<1024x256xbf16>
    %cst_86 = arith.constant dense<0.000000e+00> : vector<1x256xf32>
    %162 = tpu.matmul %160, %161, %cst_86 {dimension_numbers = #tpu.dot_dimension_numbers<[1], [0], [0], [1], [0, 0, 1, 1], [], []>} : vector<1x1024xbf16>, vector<1024x256xbf16>, vector<1x256xf32> -> vector<1x256xf32>
    %c0_87 = arith.constant 0 : index
    %c0_88 = arith.constant 0 : index
    %163 = vector.load %arg13[%c0_87, %c0_88] : memref<1x256xf32, #tpu.memory_space<vmem>>, vector<1x256xf32>
    %164 = arith.addf %162, %163 : vector<1x256xf32>
    %165 = vector.extract_strided_slice %164 {offsets = [0, 0], sizes = [1, 32], strides = [1, 1]} : vector<1x256xf32> to vector<1x32xf32>
    %c0_89 = arith.constant 0 : index
    %c0_90 = arith.constant 0 : index
    %166 = vector.load %arg17[%c0_89, %c0_90] : memref<8x32xf32, #tpu.memory_space<vmem>>, vector<1x32xf32>
    tpu.vector_store %arg17[%c0_89, %c0_90], %165 {strides = array<i32>} : memref<8x32xf32, #tpu.memory_space<vmem>>, vector<1x32xf32>,
    %167 = vector.extract_strided_slice %164 {offsets = [0, 32], sizes = [1, 32], strides = [1, 1]} : vector<1x256xf32> to vector<1x32xf32>
    %c1_91 = arith.constant 1 : index
    %c0_92 = arith.constant 0 : index
    %168 = vector.load %arg17[%c1_91, %c0_92] : memref<8x32xf32, #tpu.memory_space<vmem>>, vector<1x32xf32>
    tpu.vector_store %arg17[%c1_91, %c0_92], %167 {strides = array<i32>} : memref<8x32xf32, #tpu.memory_space<vmem>>, vector<1x32xf32>,
    %169 = vector.extract_strided_slice %164 {offsets = [0, 64], sizes = [1, 32], strides = [1, 1]} : vector<1x256xf32> to vector<1x32xf32>
    %c2_93 = arith.constant 2 : index
    %c0_94 = arith.constant 0 : index
    %170 = vector.load %arg17[%c2_93, %c0_94] : memref<8x32xf32, #tpu.memory_space<vmem>>, vector<1x32xf32>
    tpu.vector_store %arg17[%c2_93, %c0_94], %169 {strides = array<i32>} : memref<8x32xf32, #tpu.memory_space<vmem>>, vector<1x32xf32>,
    %171 = vector.extract_strided_slice %164 {offsets = [0, 96], sizes = [1, 32], strides = [1, 1]} : vector<1x256xf32> to vector<1x32xf32>
    %c3_95 = arith.constant 3 : index
    %c0_96 = arith.constant 0 : index
    %172 = vector.load %arg17[%c3_95, %c0_96] : memref<8x32xf32, #tpu.memory_space<vmem>>, vector<1x32xf32>
    tpu.vector_store %arg17[%c3_95, %c0_96], %171 {strides = array<i32>} : memref<8x32xf32, #tpu.memory_space<vmem>>, vector<1x32xf32>,
    %173 = vector.extract_strided_slice %164 {offsets = [0, 128], sizes = [1, 32], strides = [1, 1]} : vector<1x256xf32> to vector<1x32xf32>
    %c4 = arith.constant 4 : index
    %c0_97 = arith.constant 0 : index
    %174 = vector.load %arg17[%c4, %c0_97] : memref<8x32xf32, #tpu.memory_space<vmem>>, vector<1x32xf32>
    tpu.vector_store %arg17[%c4, %c0_97], %173 {strides = array<i32>} : memref<8x32xf32, #tpu.memory_space<vmem>>, vector<1x32xf32>,
    %175 = vector.extract_strided_slice %164 {offsets = [0, 160], sizes = [1, 32], strides = [1, 1]} : vector<1x256xf32> to vector<1x32xf32>
    %c5 = arith.constant 5 : index
    %c0_98 = arith.constant 0 : index
    %176 = vector.load %arg17[%c5, %c0_98] : memref<8x32xf32, #tpu.memory_space<vmem>>, vector<1x32xf32>
    tpu.vector_store %arg17[%c5, %c0_98], %175 {strides = array<i32>} : memref<8x32xf32, #tpu.memory_space<vmem>>, vector<1x32xf32>,
    %177 = vector.extract_strided_slice %164 {offsets = [0, 192], sizes = [1, 32], strides = [1, 1]} : vector<1x256xf32> to vector<1x32xf32>
    %c6 = arith.constant 6 : index
    %c0_99 = arith.constant 0 : index
    %178 = vector.load %arg17[%c6, %c0_99] : memref<8x32xf32, #tpu.memory_space<vmem>>, vector<1x32xf32>
    tpu.vector_store %arg17[%c6, %c0_99], %177 {strides = array<i32>} : memref<8x32xf32, #tpu.memory_space<vmem>>, vector<1x32xf32>,
    %179 = vector.extract_strided_slice %164 {offsets = [0, 224], sizes = [1, 32], strides = [1, 1]} : vector<1x256xf32> to vector<1x32xf32>
    %c7 = arith.constant 7 : index
    %c0_100 = arith.constant 0 : index
    %180 = vector.load %arg17[%c7, %c0_100] : memref<8x32xf32, #tpu.memory_space<vmem>>, vector<1x32xf32>
    tpu.vector_store %arg17[%c7, %c0_100], %179 {strides = array<i32>} : memref<8x32xf32, #tpu.memory_space<vmem>>, vector<1x32xf32>,
    %c0_101 = arith.constant 0 : index
    %c0_102 = arith.constant 0 : index
    %181 = vector.load %arg17[%c0_101, %c0_102] : memref<8x32xf32, #tpu.memory_space<vmem>>, vector<8x32xf32>
    %182 = arith.addf %135, %181 : vector<8x32xf32>
    %cst_103 = arith.constant dense<0.000000e+00> : vector<8xf32>
    %183 = vector.multi_reduction <add>, %182, %cst_103 [1] : vector<8x32xf32> to vector<8xf32>
    %184 = vector.shape_cast %183 : vector<8xf32> to vector<8x1xf32>
    %cst_104 = arith.constant 3.200000e+01 : f32
    %185 = vector.broadcast %cst_104 : f32 to vector<8x1xf32>
    %186 = arith.divf %184, %185 : vector<8x1xf32>
    %187 = vector.broadcast %186 : vector<8x1xf32> to vector<8x32xf32>
    %188 = arith.subf %182, %187 : vector<8x32xf32>
    %189 = arith.mulf %188, %188 : vector<8x32xf32>
    %cst_105 = arith.constant dense<0.000000e+00> : vector<8xf32>
    %190 = vector.multi_reduction <add>, %189, %cst_105 [1] : vector<8x32xf32> to vector<8xf32>
    %191 = vector.shape_cast %190 : vector<8xf32> to vector<8x1xf32>
    %cst_106 = arith.constant 3.200000e+01 : f32
    %192 = vector.broadcast %cst_106 : f32 to vector<8x1xf32>
    %193 = arith.divf %191, %192 : vector<8x1xf32>
    %194 = vector.broadcast %186 : vector<8x1xf32> to vector<8x32xf32>
    %195 = arith.subf %182, %194 : vector<8x32xf32>
    %cst_107 = arith.constant 9.99999974E-6 : f32
    %196 = vector.broadcast %cst_107 : f32 to vector<8x1xf32>
    %197 = arith.addf %193, %196 : vector<8x1xf32>
    %198 = math.rsqrt %197 : vector<8x1xf32>
    %199 = vector.broadcast %198 : vector<8x1xf32> to vector<8x32xf32>
    %200 = arith.mulf %195, %199 : vector<8x32xf32>
    %c0_108 = arith.constant 0 : index
    %c0_109 = arith.constant 0 : index
    %201 = vector.load %arg8[%c0_108, %c0_109] : memref<1x32xf32, #tpu.memory_space<vmem>>, vector<1x32xf32>
    %202 = vector.broadcast %201 : vector<1x32xf32> to vector<8x32xf32>
    %203 = arith.mulf %200, %202 : vector<8x32xf32>
    %c0_110 = arith.constant 0 : index
    %c0_111 = arith.constant 0 : index
    %204 = vector.load %arg9[%c0_110, %c0_111] : memref<1x32xf32, #tpu.memory_space<vmem>>, vector<1x32xf32>
    %205 = vector.broadcast %204 : vector<1x32xf32> to vector<8x32xf32>
    %206 = arith.addf %203, %205 : vector<8x32xf32>
    %c0_112 = arith.constant 0 : index
    %c0_113 = arith.constant 0 : index
    %c0_114 = arith.constant 0 : index
    %207 = vector.load %arg14[%c0_112, %c0_113, %c0_114] : memref<1x8x32xf32, #tpu.memory_space<vmem>>, vector<1x8x32xf32>
    %208 = vector.shape_cast %207 : vector<1x8x32xf32> to vector<8x32xf32>
    %209 = vector.shape_cast %206 : vector<8x32xf32> to vector<1x8x32xf32>
    tpu.vector_store %arg14[%c0_112, %c0_113, %c0_114], %209 {strides = array<i32>} : memref<1x8x32xf32, #tpu.memory_space<vmem>>, vector<1x8x32xf32>,
    return
  }
  func.func @transform_0(%arg0: i32) -> (i32, i32, i32) {
    %c0_i32 = arith.constant 0 : i32
    %c0_i32_0 = arith.constant 0 : i32
    %c0_i32_1 = arith.constant 0 : i32
    return %arg0, %c0_i32, %c0_i32_0 : i32, i32, i32
  }
  func.func @transform_1(%arg0: i32) -> (i32, i32) {
    %c0_i32 = arith.constant 0 : i32
    %c0_i32_0 = arith.constant 0 : i32
    %c0_i32_1 = arith.constant 0 : i32
    return %c0_i32, %c0_i32_0 : i32, i32
  }
  func.func @transform_2(%arg0: i32) -> (i32, i32) {
    %c0_i32 = arith.constant 0 : i32
    %c0_i32_0 = arith.constant 0 : i32
    %c0_i32_1 = arith.constant 0 : i32
    return %c0_i32, %c0_i32_0 : i32, i32
  }
  func.func @transform_3(%arg0: i32) -> (i32, i32, i32) {
    %c0_i32 = arith.constant 0 : i32
    %c0_i32_0 = arith.constant 0 : i32
    %c0_i32_1 = arith.constant 0 : i32
    %c0_i32_2 = arith.constant 0 : i32
    return %c0_i32, %c0_i32_0, %c0_i32_1 : i32, i32, i32
  }
  func.func @transform_4(%arg0: i32) -> (i32, i32) {
    %c0_i32 = arith.constant 0 : i32
    %c0_i32_0 = arith.constant 0 : i32
    %c0_i32_1 = arith.constant 0 : i32
    return %c0_i32, %c0_i32_0 : i32, i32
  }
  func.func @transform_5(%arg0: i32) -> (i32, i32) {
    %c0_i32 = arith.constant 0 : i32
    %c0_i32_0 = arith.constant 0 : i32
    %c0_i32_1 = arith.constant 0 : i32
    return %c0_i32, %c0_i32_0 : i32, i32
  }
  func.func @transform_6(%arg0: i32) -> (i32, i32) {
    %c0_i32 = arith.constant 0 : i32
    %c0_i32_0 = arith.constant 0 : i32
    %c0_i32_1 = arith.constant 0 : i32
    return %c0_i32, %c0_i32_0 : i32, i32
  }
  func.func @transform_7(%arg0: i32) -> (i32, i32) {
    %c0_i32 = arith.constant 0 : i32
    %c0_i32_0 = arith.constant 0 : i32
    %c0_i32_1 = arith.constant 0 : i32
    return %c0_i32, %c0_i32_0 : i32, i32
  }
  func.func @transform_8(%arg0: i32) -> (i32, i32) {
    %c0_i32 = arith.constant 0 : i32
    %c0_i32_0 = arith.constant 0 : i32
    %c0_i32_1 = arith.constant 0 : i32
    return %c0_i32, %c0_i32_0 : i32, i32
  }
  func.func @transform_9(%arg0: i32) -> (i32, i32) {
    %c0_i32 = arith.constant 0 : i32
    %c0_i32_0 = arith.constant 0 : i32
    %c0_i32_1 = arith.constant 0 : i32
    return %c0_i32, %c0_i32_0 : i32, i32
  }
  func.func @transform_10(%arg0: i32) -> (i32, i32) {
    %c0_i32 = arith.constant 0 : i32
    %c0_i32_0 = arith.constant 0 : i32
    %c0_i32_1 = arith.constant 0 : i32
    return %c0_i32, %c0_i32_0 : i32, i32
  }
  func.func @transform_11(%arg0: i32) -> (i32, i32) {
    %c0_i32 = arith.constant 0 : i32
    %c0_i32_0 = arith.constant 0 : i32
    %c0_i32_1 = arith.constant 0 : i32
    return %c0_i32, %c0_i32_0 : i32, i32
  }
  func.func @transform_12(%arg0: i32) -> (i32, i32) {
    %c0_i32 = arith.constant 0 : i32
    %c0_i32_0 = arith.constant 0 : i32
    %c0_i32_1 = arith.constant 0 : i32
    return %c0_i32, %c0_i32_0 : i32, i32
  }
  func.func @transform_13(%arg0: i32) -> (i32, i32, i32) {
    %c0_i32 = arith.constant 0 : i32
    %c0_i32_0 = arith.constant 0 : i32
    %c0_i32_1 = arith.constant 0 : i32
    return %arg0, %c0_i32, %c0_i32_0 : i32, i32, i32
  }
  func.func @transform_14(%arg0: i32) -> (i32, i32, i32, i32) {
    %c0_i32 = arith.constant 0 : i32
    %c0_i32_0 = arith.constant 0 : i32
    %c0_i32_1 = arith.constant 0 : i32
    %c0_i32_2 = arith.constant 0 : i32
    return %arg0, %c0_i32, %c0_i32_0, %c0_i32_1 : i32, i32, i32, i32
  }
}

</mosaic_0001>

<bundles_post_ra>
// kernel: encoder_layer_forward.1
= control target key start
LH: loop header
LB: loop body
LE: loop exit
PB: predicated region body
PF: predicated region fallthrough
CT: control target
= control target key end

     0   :  { %s6686_s0 = inlined_call_operand.vmem [shape: f32[2,8,32], index: 0, kind: input, shape index: {}]   ;;  %s6687_s1 = inlined_call_operand.vmem [shape: f32[32,96], index: 1, kind: input, shape index: {}]   ;;  %s6688_s2 = inlined_call_operand.vmem [shape: f32[1,96], index: 2, kind: input, shape index: {}]   ;;  %s6689_s3 = inlined_call_operand.vmem [shape: f32[4,8,32], index: 3, kind: input, shape index: {}]   ;;  %s6690_s4 = inlined_call_operand.vmem [shape: f32[1,32], index: 4, kind: input, shape index: {}]   ;;  %s6691_s5 = inlined_call_operand.vmem [shape: f32[1,32], index: 5, kind: input, shape index: {}]   ;;  %s6692_s6 = inlined_call_operand.vmem [shape: f32[1,32], index: 6, kind: input, shape index: {}]   ;;  %s6693_s7 = inlined_call_operand.vmem [shape: f32[1,32], index: 7, kind: input, shape index: {}]   ;;  %s6694_s8 = inlined_call_operand.vmem [shape: f32[1,32], index: 8, kind: input, shape index: {}]   ;;  %s6695_s9 = inlined_call_operand.vmem [shape: bf16[256,1024], index: 9, kind: input, shape index: {}]   ;;  %s6696_s10 = inlined_call_operand.vmem [shape: f32[1,1024], index: 10, kind: input, shape index: {}]   ;;  %s6697_s11 = inlined_call_operand.vmem [shape: bf16[1024,256], index: 11, kind: input, shape index: {}]   ;;  %s6698_s12 = inlined_call_operand.vmem [shape: f32[1,256], index: 12, kind: input, shape index: {}]   ;;  %s6699_s13 = inlined_call_operand.hbm [shape: f32[2,8,32], index: 13, kind: output, shape index: {0}]   ;;  %s6700_s14 = inlined_call_operand.hbm [shape: f32[2,4,8,8], index: 14, kind: output, shape index: {1}]  }
   0x1   :  { %6711 = sst [smem:[#allocation14_spill]] %s6686_s0 }
   0x2   :  { %6712 = sst [smem:[#allocation15_spill]] %s6687_s1 }
   0x3   :  { %6713 = sst [smem:[#allocation16_spill]] %s6688_s2 }
   0x4   :  { %6714 = sst [smem:[#allocation17_spill]] %s6689_s3 }
   0x5   :  { %6715 = sst [smem:[#allocation18_spill]] %s6690_s4 }
   0x6   :  { %20 = vsyncpa [#allocation5], 0 }
   0x7   :  { %22 = vsyncpa [#allocation5 + $0x1], 0 }
   0x8   :  { %23 = vsyncpa [#allocation7], 0 }
   0x9   :  { %25 = vsyncpa [#allocation7 + $0x1], 0  ;;  %s4772_s29 = smov 0   ;;  %s4774_s30 = smov 0  }
   0xa   :  { %s4776_s15 = smov 0   ;;  %s4778_s16 = smov 0  }
   0xb LB: > { %6716 = sst [smem:[#allocation10_spill]] %s4676_s15  ;;  %s4793_s17 = sadd.s32 4294967295, %s4680_s16   ;;  %s4680_s16 = sphi %s4778_s16, %s6743_s16   ;;  %s4676_s15 = sphi %s4776_s15, %s6745_s15   ;;  %s4672_s30 = sphi %s4774_s30, %s6747_s30   ;;  %s4668_s29 = sphi %s4772_s29, %s6746_s29  }
   0xc   : > { %s3180_s18 = sadd.s32 4294967294, %s4680_s16   ;;  %s4797_s19 = sadd.s32 1, %s4680_s16  }
   0xd   : > { %6717 = sst [smem:[#allocation11_spill]] %s4797_s19  ;;  %s316_s20 = sadd.s32 1, %s4676_s15 }
   0xe   : > { %s313_s21 = ssub.s32 %s4680_s16, %s4797_s19  ;;  %p326_p0 = scmp.ne.s32.totalorder %s4676_s15, %s4672_s30 }
   0xf   : > { %p314_p1 = scmp.eq.s32.totalorder %s313_s21, 0  ;;  %p327_p2 = scmp.eq.s32.totalorder %s4793_s17, 1 }
  0x10   : > { %p332_p3 = scmp.ne.s32.totalorder %s4672_s30, %s4668_s29  ;;  %p333_p4 = scmp.eq.s32.totalorder %s3180_s18, 1 }
  0x11   : > { %s4808_s22 = scalar_select %p314_p1, %s4676_s15, %s316_s20  }
  0x12   : > { %p4810_p5 = por %p327_p2, %p326_p0  ;;  %p4814_p6 = por %p333_p4, %p332_p3 }
  0x13   : > { %6718 = sst [smem:[#allocation12_spill]] %s4808_s22  ;;  %p3183_p7 = scmp.ge.s32.totalorder %s4680_s16, 1 }
  0x14   : > { %s6720_s24 = scalar_select %p4814_p6, 1, 0 }
  0x15   : > { %p420_p8 = scmp.lt.s32.totalorder %s4680_s16, 3 }
  0x16   : > { %6721 = sst [smem:[#allocation13_spill]] %s6720_s24 }
  0x17   : > { %p421_p9 = pnand %p3183_p7, %p420_p8 }
  0x18   : > { %s6722_s1 = sld [smem:[#allocation15_spill]] (!%p421_p9)  ;;  %p470_p10 = scmp.lt.s32.totalorder (!%p421_p9), %s4793_s17, 1 }
  0x19   : > { %424 = sbr.rel (%p421_p9) target bundleno = 2685 (0xa7d), region = 72  ;;  %s6723_s0 = sld [smem:[#allocation14_spill]] (!%p421_p9) }
  0x1a   : > { %s6724_s2 = sld [smem:[#allocation16_spill]] (!%p421_p9)  ;;  %s4682_s15 = smov (!%p421_p9), 88  }
  0x1b   : > { %s6709_s22 = smov (!%p421_p9), 96   ;;  %s4684_s19 = smov (!%p421_p9), 120  }
  0x1c   : > { %s4686_s18 = smov (!%p421_p9), 104   ;;  %s4687_s20 = smov (!%p421_p9), 80  }
  0x1d   : > { %s6725_s3 = sld [smem:[#allocation17_spill]] (!%p421_p9)  ;;  %s6707_s26 = smov (!%p421_p9), 64  }
  0x1e   : > { %v478_v0 = vld [vmem:[%s6722_s1 + $0x18] sm:$0xff]  ;;  %v477_v1 = vld [vmem:[%s6722_s1 + $0x10] sm:$0xff]  ;;  %v476_v2 = vld [vmem:[%s6722_s1 + $0x8] sm:$0xff]  ;;  %s471_s21 = scalar_select %p470_p10, %s4793_s17, 1  ;;  %vm483_vm0 = vcmask 261120   ;;  %vm510_vm1 = vcmask 64512  }
  0x1f   : > { %499 = vmatpush.msra.mxu0 %v478_v0  ;;  %v475_v3 = vld [vmem:[%s6722_s1] sm:$0xff]  ;;  %s4689_s27 = smov 112   ;;  %s4870_s28 = sand.u32 1, %s4672_s30  }
  0x20   : > { %s3186_s25 = sshll.u32 %s471_s21, 3  ;;  %v4557_v5 = vld [vmem:[%s6724_s2] ss:$0 sm:$0xff]  ;;  %s6726_s4 = sld [smem:[#allocation18_spill]] }
  0x21   : > { %500 = vmatpush.msra.mxu0 %v477_v1  ;;  %s473_s24 = scalar_lea.vmem %s6723_s0, %s3186_s25  ;;  %s6741_s21 = smov 96  }
  0x22   : > { %v4837_v4 = vld [vmem:[%s473_s24] sm:$0xff]  ;;  %s4685_s24 = smov 72   ;;  %s4497_s25 = sshll.u32 %s4793_s17, 5 }
  0x23   : > { %501 = vmatpush.msra.mxu0 %v476_v2  ;;  %v574_v8 = vld [vmem:[%s6725_s3] sm:$0xff]  ;;  %v3195_v2 = vld [vmem:[%s6725_s3 + $0x8] sm:$0xff]  ;;  %s3081_s2 = scalar_lea.hbm %s6700_s14, %s4497_s25  ;;  %s3056_s1 = scalar_lea.sflag [#allocation7], %s4870_s28 }
  0x25   : > { %502 = vmatpush.msra.mxu0 %v475_v3  ;;  %v3202_v3 = vld [vmem:[%s6725_s3 + $0x10] sm:$0xff] }
  0x26   : > { %3187 = vmatmul.msk.f32.vlgmr.msra.gmra.mxu0 %vm483_vm0, %v4837_v4 }
  0xa3   : > { %v504_v6 = vpop.f32.mrf.mxu0 }
  0xa4   : > { %v4844_v7 = vadd.f32 %v4557_v5, %v504_v6 }
  0xa6   : > { %577 = vrot.lane.b32.xlu2 %v4844_v7, %s4682_s15  ;;  %508 = vrot.lane.b32.xlu0 %v4844_v7, %s6709_s22  ;;  %s3185_s15 = sshll.u32 %s4870_s28, 5 }
  0xae   : > { %575 = vrot.lane.b32.xlu2 %v4844_v7, %s4684_s19  ;;  %s4873_s19 = scalar_lea.vmem [#allocation6], %s3185_s15 }
  0xaf   : > { %s3082_s0 = sshll.u32 %s4873_s19, 4  ;;  %s3083_s0 = int_to_ptr.vmem [resolvable:$true] %s3082_s0 }
  0xb6   : > { %787 = vrot.lane.b32.xlu2 %v4844_v7, %s4685_s24  ;;  %s4690_s24 = smov 48  }
  0xbe   : > { %785 = vrot.lane.b32.xlu2 %v4844_v7, %s4686_s18  ;;  %s4691_s18 = smov 56  }
  0xc6   : > { %693 = vrot.lane.b32.xlu2 %v4844_v7, %s4687_s20  ;;  %s4692_s20 = smov 40  }
 0x100   : > { %v578_v9 = vpop.permute.xlu2 %577 }
 0x101   : > { %3191 = vmatpush.xpose.msk.msra.mxu3 %vm510_vm1, %v578_v9 }
 0x105   : > { %686 = vmatpush.msrb.mxu3 %v574_v8 }
 0x108   : > { %v576_v10 = vpop.permute.xlu2 %575 }
 0x109   : > { %3192 = vmatmul.msk.f32.vlgmr.msra.gmra.mxu3 %vm510_vm1, %v576_v10 }
 0x110   : > { %v788_v11 = vpop.permute.xlu2 %787 }
 0x111   : > { %3204 = vmatpush.xpose.msk.msra.mxu3 %vm510_vm1, %v788_v11 }
 0x118   : > { %v786_v12 = vpop.permute.xlu2 %785  ;;  %v509_v13 = vpop.permute.xlu0 %508 }
 0x119   : > { %3188 = vmatpush.xpose.msk.msra.mxu1 %vm510_vm1, %v509_v13  ;;  %v4558_v13 = vld [vmem:[%s6726_s4] ss:$0 sm:$0xff] }
 0x11c   : > { %3189 = vmatmul.msk.f32.vlgmr.msra.gmra.mxu1 %vm510_vm1, %v4844_v7 }
 0x11d   : > { %663 = vmatpush.msrb.mxu1 %v3195_v2  ;;  %v4293_v2 = vld [vmem:[%s6695_s9 + $0x19c] sm:$0xf0] }
 0x11f   : > { %779 = vmatpush.msra.mxu1 %v3202_v3  ;;  %v3660_v3 = vld [vmem:[%s6695_s9 + $0x380] sm:$0xf] }
 0x120   : > { %v694_v14 = vpop.permute.xlu2 %693 }
 0x121   : > { %3198 = vmatpush.xpose.msk.msrb.mxu0 %vm510_vm1, %v694_v14 }
 0x18c   : > { %v600_v15 = vpop.f32.mrf.mxu3 }
 0x18d   : > { %v603_v16 = vmul.f32 0.35355338, %v600_v15 }
 0x18f   : > { %v604_v17 = vsel %vm510_vm1, %v603_v16, -inf }
 0x190   : > { %605 = vmax.xlane.f32.xlu2 %v604_v17 }
 0x199   : > { %v532_v18 = vpop.f32.mrf.mxu1 }
 0x19a   : > { %v535_v19 = vmul.f32 0.35355338, %v532_v18 }
 0x19c   : > { %v536_v20 = vsel %vm510_vm1, %v535_v19, -inf }
 0x19d   : > { %537 = vmax.xlane.f32.xlu0 %v536_v20 }
 0x203   : > { %v606_v35 = vpop.xlane.xlu2 %605 }
 0x204   : > { %v607_v37 = vsub.f32 %v603_v16, %v606_v35 }
 0x206   : > { %v608_v38 = vmul.f32 1.442695, %v607_v37 }
 0x210   : > { %v538_v21 = vpop.xlane.xlu0 %537 }
 0x211   : > { %v539_v22 = vsub.f32 %v535_v19, %v538_v21  ;;  %v4693_v19 = vmov 32.0  }
 0x213   : > { %v540_v23 = vmul.f32 1.442695, %v539_v22 }
 0x215   : > { %4563 = vpow2.f32 %v540_v23 }
 0x21b   : > { %v4564_v24 = vpop.eup %4563 }
 0x21c   : > { %v542_v25 = vsel %vm510_vm1, %v4564_v24, 0.0 }
 0x21d   : > { %543 = vadd.xlane.f32.xlu1 %v542_v25 }
 0x236   : > { %548 = vrot.lane.b32.xlu1 %v4844_v7, %s6707_s26 }
 0x23e   : > { %691 = vrot.lane.b32.xlu1 %v4844_v7, %s4689_s27 }
 0x290   : > { %v544_v26 = vpop.xlane.xlu1 %543 }
 0x291   : > { %4565 = vrcp.f32 %v544_v26 }
 0x292   : > { %4567 = vpow2.f32 %v608_v38 }
 0x297   : > { %v4566_v27 = vpop.eup %4565 }
 0x298   : > { %v546_v28 = vmul.f32 %v4566_v27, %v4564_v24  ;;  %v4568_v45 = vpop.eup %4567 }
 0x299   : > { %v610_v46 = vsel %vm510_vm1, %v4568_v45, 0.0 }
 0x29a   : > { %547 = vst.msk [vmem:[%s4873_s19] sm:$0xff] %vm510_vm1, %v546_v28 }
 0x2a8   : > { %v549_v29 = vpop.permute.xlu1 %548 }
 0x2a9   : > { %569 = vmatpush.msra.mxu2 %v549_v29 }
 0x2aa   : > { %3190 = vmatmul.msk.f32.vlgmr.msra.gmra.mxu2 %vm510_vm1, %v546_v28 }
 0x2b0   : > { %v692_v30 = vpop.permute.xlu1 %691 }
 0x2b1   : > { %3199 = vmatmul.msk.f32.vlgmr.msrb.gmra.mxu0 %vm510_vm1, %v692_v30 }
 0x32d   : > { %v571_v31 = vpop.f32.mrf.mxu2 }
 0x32e   : > { %3197 = vmatmul.msk.f32.vlgmr.msrb.gmra.mxu3 %vm510_vm1, %v571_v31  ;;  %v716_v32 = vpop.f32.mrf.mxu0 }
 0x32f   : > { %v719_v33 = vmul.f32 0.35355338, %v716_v32 }
 0x331   : > { %v720_v34 = vsel %vm510_vm1, %v719_v33, -inf }
 0x332   : > { %721 = vmax.xlane.f32.xlu1 %v720_v34 }
 0x336   : > { %3205 = vmatmul.msk.f32.vlgmr.msra.gmra.mxu3 %vm510_vm1, %v786_v12 }
 0x34b   : > { %733 = vrot.lane.b32.xlu1 %v4844_v7, %s4690_s24  ;;  %s6739_s24 = smov 32  }
 0x3a5   : > { %v722_v39 = vpop.xlane.xlu1 %721 }
 0x3a6   : > { %v723_v42 = vsub.f32 %v719_v33, %v722_v39  ;;  %v4559_v39 = vld [vmem:[%s6691_s5] ss:$0 sm:$0xff] }
 0x3a8   : > { %v724_v44 = vmul.f32 1.442695, %v723_v42 }
 0x3aa   : > { %4569 = vpow2.f32 %v724_v44 }
 0x3b0   : > { %v4570_v47 = vpop.eup %4569 }
 0x3b1   : > { %v4883_v36 = vpop.f32.mrf.mxu3  ;;  %v726_v48 = vsel %vm510_vm1, %v4570_v47, 0.0 }
 0x3b9   : > { %v810_v40 = vpop.f32.mrf.mxu3 }
 0x3ba   : > { %v813_v41 = vmul.f32 0.35355338, %v810_v40 }
 0x3bc   : > { %v814_v43 = vsel %vm510_vm1, %v813_v41, -inf }
 0x3bd   : > { %815 = vmax.xlane.f32.xlu0 %v814_v43  ;;  %v734_v61 = vpop.permute.xlu1 %733  ;;  %v924_v43 = vlaneseq }
 0x3bf   : > { %vm926_vm6 = vcmp.lt.s32.totalorder %v924_v43, 32  ;;  %vm5033_vm7 = vcmp.ge.s32.totalorder %v924_v43, 32  ;;  %vm5038_vm8 = vcmp.lt.s32.totalorder %v924_v43, 64  ;;  %vm5047_vm10 = vcmp.ge.s32.totalorder %v924_v43, 64 }
 0x3c0   : > { %vm938_vm9 = vmand %vm5033_vm7, %vm5038_vm8  ;;  %vm5052_vm11 = vcmp.lt.s32.totalorder %v924_v43, 96  ;;  %vm5263_vm13 = vcmp.ge.s32.totalorder %v924_v43, 96  ;;  %vm5268_vm14 = vcmp.lt.s32.totalorder %v924_v43, 128 }
 0x3c1   : > { %vm948_vm12 = vmand %vm5047_vm10, %vm5052_vm11 }
 0x3c2   : > { %vm958_vm15 = vmand %vm5263_vm13, %vm5268_vm14 }
 0x3c5   : > { %611 = vadd.xlane.f32.xlu0 %v610_v46 }
 0x3cd   : > { %727 = vadd.xlane.f32.xlu0 %v726_v48 }
 0x3e1   : > { %617 = vrot.lane.b32.xlu0 %v4844_v7, %s4691_s18  ;;  %s6705_s18 = smov 32  }
 0x430   : > { %v816_v49 = vpop.xlane.xlu0 %815 }
 0x431   : > { %v817_v50 = vsub.f32 %v813_v41, %v816_v49  ;;  %v4560_v41 = vld [vmem:[%s6692_s6] ss:$0 sm:$0xff] }
 0x433   : > { %v818_v51 = vmul.f32 1.442695, %v817_v50 }
 0x435   : > { %4571 = vpow2.f32 %v818_v51 }
 0x438   : > { %v612_v52 = vpop.xlane.xlu0 %611 }
 0x439   : > { %4573 = vrcp.f32 %v612_v52 }
 0x43b   : > { %v4572_v53 = vpop.eup %4571 }
 0x43c   : > { %v820_v54 = vsel %vm510_vm1, %v4572_v53, 0.0 }
 0x43d   : > { %821 = vadd.xlane.f32.xlu2 %v820_v54  ;;  %v4301_v54 = vld [vmem:[%s6695_s9 + $0x1dc] sm:$0xf0] }
 0x43f   : > { %v4574_v55 = vpop.eup %4573 }
 0x440   : > { %v728_v56 = vpop.xlane.xlu0 %727  ;;  %v614_v57 = vmul.f32 %v4574_v55, %v4568_v45  ;;  %v3692_v55 = vld [vmem:[%s6695_s9 + $0x3c0] sm:$0xf] }
 0x441   : > { %4575 = vrcp.f32 %v728_v56 }
 0x442   : > { %3193 = vst.msk [vmem:[%s4873_s19 + $0x8] sm:$0xff] %vm510_vm1, %v614_v57 }
 0x447   : > { %v4576_v58 = vpop.eup %4575 }
 0x448   : > { %v730_v59 = vmul.f32 %v4576_v58, %v4570_v47  ;;  %v4297_v58 = vld [vmem:[%s6695_s9 + $0x1c4] sm:$0xf] }
 0x44a   : > { %3200 = vst.msk [vmem:[%s4873_s19 + $0x10] sm:$0xff] %vm510_vm1, %v730_v59 }
 0x453   : > { %v618_v60 = vpop.permute.xlu0 %617 }
 0x454   : > { %638 = vmatpush.msrb.mxu2 %v618_v60 }
 0x455   : > { %827 = vrot.lane.b32.xlu2 %v4844_v7, %s4692_s20  ;;  %3194 = vmatmul.msk.f32.vlgmr.msrb.gmra.mxu2 %vm510_vm1, %v614_v57  ;;  %v3208_v7 = vld [vmem:[%s6725_s3 + $0x18] sm:$0xff]  ;;  %v4365_v57 = vld [vmem:[%s6695_s9 + $0x3dc] sm:$0xf0]  ;;  %s6740_s20 = smov 64  }
 0x456   : > { %754 = vmatpush.msra.mxu2 %v734_v61  ;;  %v3693_v60 = vor.u32 %v4365_v57, %v3692_v55  ;;  %v4261_v57 = vld [vmem:[%s6695_s9 + $0x9c] sm:$0xf0] }
 0x458   : > { %873 = vmatpush.msrb.mxu2 %v3208_v7  ;;  %1793 = vmatpush.bf16.msrb.mxu3 %v3693_v60  ;;  %v4325_v60 = vld [vmem:[%s6695_s9 + $0x29c] sm:$0xf0] }
 0x45d   : > { %3201 = vmatmul.msk.f32.vlgmr.msra.gmra.mxu2 %vm510_vm1, %v730_v59  ;;  %v3438_v59 = vld [vmem:[%s6695_s9 + $0x1e0] sm:$0xf0] }
 0x45e   : > { %v3441_v61 = vor.u32 %v4297_v58, %v3438_v59  ;;  %v3532_v58 = vld [vmem:[%s6695_s9 + $0x280] sm:$0xf] }
 0x4b0   : > { %v822_v62 = vpop.xlane.xlu2 %821 }
 0x4b1   : > { %4577 = vrcp.f32 %v822_v62  ;;  %v4361_v62 = vld [vmem:[%s6695_s9 + $0x3c4] sm:$0xf] }
 0x4b2   : > { %4579 = vrcp.f32 %v4693_v19 }
 0x4b7   : > { %v4578_v63 = vpop.eup %4577 }
 0x4b8   : > { %v824_v0 = vmul.f32 %v4578_v63, %v4572_v53  ;;  %v828_v1 = vpop.permute.xlu2 %827  ;;  %v4580_v20 = vpop.eup %4579  ;;  %v3436_v53 = vld [vmem:[%s6695_s9 + $0x1c0] sm:$0xf]  ;;  %v3694_v63 = vld [vmem:[%s6695_s9 + $0x3e0] sm:$0xf0] }
 0x4b9   : > { %848 = vmatpush.msra.mxu0 %v828_v1  ;;  %v889_v21 = vmul.f32 32.0, %v4580_v20  ;;  %vm893_vm2 = vweird.f32 %v4580_v20  ;;  %v3437_v56 = vor.u32 %v4301_v54, %v3436_v53  ;;  %v3697_v1 = vor.u32 %v4361_v62, %v3694_v63  ;;  %v3566_v53 = vld [vmem:[%s6695_s9 + $0x2e0] sm:$0xf0] }
 0x4ba   : > { %3207 = vmatmul.msk.f32.vlgmr.msra.gmra.mxu0 %vm510_vm1, %v824_v0  ;;  %3206 = vst.msk [vmem:[%s4873_s19 + $0x18] sm:$0xff] %vm510_vm1, %v824_v0  ;;  %v3404_v0 = vld [vmem:[%s6695_s9 + $0x180] sm:$0xf]  ;;  %v3278_v62 = vld [vmem:[%s6695_s9 + $0xa0] sm:$0xf0]  ;;  %v3533_v63 = vor.u32 %v4325_v60, %v3532_v58 }
 0x4bb   : > { %v890_v22 = vsub.f32 1.0, %v889_v21  ;;  %1806 = vmatpush.bf16.msrb.mxu0 %v3441_v61  ;;  %1819 = vmatpush.bf16.msra.mxu2 %v3697_v1  ;;  %v4345_v21 = vld [vmem:[%s6695_s9 + $0x344] sm:$0xf]  ;;  %v3380_v58 = vld [vmem:[%s6695_s9 + $0x148] sm:$0xf] }
 0x4bc   : > { %v4257_v61 = vld [vmem:[%s6695_s9 + $0x84] sm:$0xf] }
 0x4bd   : > { %v891_v23 = vmul.f32 %v4580_v20, %v890_v22  ;;  %v3630_v22 = vld [vmem:[%s6695_s9 + $0x360] sm:$0xf0] }
 0x4be   : > { %v4321_v1 = vld [vmem:[%s6695_s9 + $0x284] sm:$0xf] }
 0x4bf   : > { %v892_v24 = vadd.f32 %v4580_v20, %v891_v23 }
 0x4c1   : > { %v4918_v25 = vsel %vm893_vm2, %v4580_v20, %v892_v24  ;;  %v3374_v20 = vld [vmem:[%s6695_s9 + $0x160] sm:$0xf0] }
 0x4d8   : > { %v640_v5 = vpop.f32.mrf.mxu2 }
 0x4d9   : > { %3196 = vmatmul.msk.f32.vlgmr.msrb.gmra.mxu1 %vm510_vm1, %v640_v5  ;;  %v4357_v5 = vld [vmem:[%s6695_s9 + $0x39c] sm:$0xf0] }
 0x4da   : > { %1780 = vmatpush.bf16.msrb.mxu1 %v3437_v56  ;;  %v3661_v7 = vor.u32 %v4357_v5, %v3660_v3  ;;  %v3276_v56 = vld [vmem:[%s6695_s9 + $0x80] sm:$0xf] }
 0x4db   : > { %v3277_v59 = vor.u32 %v4261_v57, %v3276_v56  ;;  %v3670_v57 = vld [vmem:[%s6695_s9 + $0x3a8] sm:$0xf0] }
 0x4dc   : > { %1794 = vmatpush.bf16.msrb.mxu3 %v3661_v7  ;;  %v4253_v7 = vld [vmem:[%s6695_s9 + $0x5c] sm:$0xf0] }
 0x4e0   : > { %v756_v6 = vpop.f32.mrf.mxu2 }
 0x4e1   : > { %3203 = vmatmul.msk.f32.vlgmr.msra.gmra.mxu1 %vm510_vm1, %v756_v6  ;;  %v3405_v6 = vor.u32 %v4293_v2, %v3404_v0  ;;  %v3281_v0 = vor.u32 %v4257_v61, %v3278_v62  ;;  %v3534_v2 = vld [vmem:[%s6695_s9 + $0x2a0] sm:$0xf0]  ;;  %v3636_v61 = vld [vmem:[%s6695_s9 + $0x348] sm:$0xf] }
 0x4e2   : > { %v3537_v3 = vor.u32 %v4321_v1, %v3534_v2  ;;  %v4350_v62 = vld [vmem:[%s6695_s9 + $0x364] sm:$0xf0]  ;;  %v4346_v1 = vld [vmem:[%s6695_s9 + $0x34c] sm:$0xf] }
 0x4e3   : > { %1781 = vmatpush.bf16.msrb.mxu1 %v3405_v6  ;;  %v3244_v6 = vld [vmem:[%s6695_s9 + $0x40] sm:$0xf]  ;;  %v3638_v2 = vld [vmem:[%s6695_s9 + $0x368] sm:$0xf0] }
 0x537   : > { %v850_v8 = vpop.f32.mrf.mxu0 }
 0x538   : > { %3209 = vmatmul.msk.f32.vlgmr.msrb.gmra.mxu2 %vm510_vm1, %v850_v8  ;;  %v4289_v8 = vld [vmem:[%s6695_s9 + $0x184] sm:$0xf]  ;;  %vm2986_vm1 = vcmask 253952  }
 0x556   : > { %v665_v9 = vpop.f32.mrf.mxu1 }
 0x557   : > { %v689_v11 = vadd.f32 %v4883_v36, %v665_v9  ;;  %v3406_v9 = vld [vmem:[%s6695_s9 + $0x1a0] sm:$0xf0] }
 0x55e   : > { %v781_v10 = vpop.f32.mrf.mxu1 }
 0x55f   : > { %v784_v12 = vadd.f32 %v781_v10, %v689_v11  ;;  %v4353_v10 = vld [vmem:[%s6695_s9 + $0x384] sm:$0xf]  ;;  %v3409_v11 = vor.u32 %v4289_v8, %v3406_v9  ;;  %v3245_v8 = vor.u32 %v4253_v7, %v3244_v6  ;;  %v3500_v9 = vld [vmem:[%s6695_s9 + $0x240] sm:$0xf]  ;;  %v3348_v6 = vld [vmem:[%s6695_s9 + $0x108] sm:$0xf] }
 0x560   : > { %v4278_v7 = vld [vmem:[%s6695_s9 + $0x124] sm:$0xf0] }
 0x561   : > { %1807 = vmatpush.bf16.msrb.mxu0 %v3409_v11  ;;  %v4249_v11 = vld [vmem:[%s6695_s9 + $0x44] sm:$0xf] }
 0x5bb   : > { %v875_v14 = vpop.f32.mrf.mxu2 }
 0x5bc   : > { %v878_v15 = vadd.f32 %v875_v14, %v784_v12  ;;  %v3662_v12 = vld [vmem:[%s6695_s9 + $0x3a0] sm:$0xf0]  ;;  %v4285_v14 = vld [vmem:[%s6695_s9 + $0x15c] sm:$0xf0] }
 0x5be   : > { %v883_v16 = vadd.f32 %v4558_v13, %v878_v15  ;;  %v3372_v13 = vld [vmem:[%s6695_s9 + $0x140] sm:$0xf]  ;;  %v3665_v15 = vor.u32 %v4353_v10, %v3662_v12 }
 0x5bf   : > { %v3373_v19 = vor.u32 %v4285_v14, %v3372_v13  ;;  %v4317_v10 = vld [vmem:[%s6695_s9 + $0x25c] sm:$0xf0]  ;;  %v3246_v13 = vld [vmem:[%s6695_s9 + $0x60] sm:$0xf0] }
 0x5c0   : > { %v884_v17 = vadd.f32 %v883_v16, %v4837_v4  ;;  %v3628_v16 = vld [vmem:[%s6695_s9 + $0x340] sm:$0xf]  ;;  %1820 = vmatpush.bf16.msra.mxu2 %v3665_v15  ;;  %v3501_v12 = vor.u32 %v4317_v10, %v3500_v9  ;;  %v4313_v14 = vld [vmem:[%s6695_s9 + $0x244] sm:$0xf]  ;;  %v3641_v9 = vor.u32 %v4346_v1, %v3638_v2  ;;  %v3604_v10 = vld [vmem:[%s6695_s9 + $0x308] sm:$0xf] }
 0x5c1   : > { %1782 = vmatpush.bf16.msrb.mxu1 %v3373_v19  ;;  %v3502_v15 = vld [vmem:[%s6695_s9 + $0x260] sm:$0xf0]  ;;  %v4245_v19 = vld [vmem:[%s6695_s9 + $0x1c] sm:$0xf0]  ;;  %v4310_v1 = vld [vmem:[%s6695_s9 + $0x224] sm:$0xf0] }
 0x5c2   : > { %v885_v18 = vsel %vm483_vm0, %v884_v17, 0.0  ;;  %v4242_v2 = vld [vmem:[%s6695_s9 + $0xc] sm:$0xf] }
 0x5c3   : > { %886 = vadd.xlane.f32.xlu0 %v885_v18  ;;  %v4281_v18 = vld [vmem:[%s6695_s9 + $0x144] sm:$0xf] }
 0x5c4   : > { %v3377_v24 = vor.u32 %v4281_v18, %v3374_v20  ;;  %v3212_v18 = vld [vmem:[%s6695_s9] sm:$0xf] }
 0x5c5   : > { %v3468_v20 = vld [vmem:[%s6695_s9 + $0x200] sm:$0xf] }
 0x5c6   : > { %1808 = vmatpush.bf16.msrb.mxu0 %v3377_v24  ;;  %v3214_v24 = vld [vmem:[%s6695_s9 + $0x20] sm:$0xf0] }
 0x636   : > { %v887_v26 = vpop.xlane.xlu0 %886 }
 0x637   : > { %v895_v27 = vmul.f32 %v4918_v25, %v887_v26  ;;  %v3340_v26 = vld [vmem:[%s6695_s9 + $0x100] sm:$0xf] }
 0x639   : > { %v896_v28 = vsub.f32 %v884_v17, %v895_v27  ;;  %v4349_v17 = vld [vmem:[%s6695_s9 + $0x35c] sm:$0xf0] }
 0x63a   : > { %v3629_v23 = vor.u32 %v4349_v17, %v3628_v16  ;;  %v4277_v27 = vld [vmem:[%s6695_s9 + $0x11c] sm:$0xf0]  ;;  %v3249_v16 = vor.u32 %v4249_v11, %v3246_v13  ;;  %v3505_v17 = vor.u32 %v4313_v14, %v3502_v15  ;;  %v4342_v11 = vld [vmem:[%s6695_s9 + $0x324] sm:$0xf0]  ;;  %v3350_v13 = vld [vmem:[%s6695_s9 + $0x128] sm:$0xf0] }
 0x63b   : > { %v897_v29 = vmul.f32 %v896_v28, %v896_v28  ;;  %v4338_v14 = vld [vmem:[%s6695_s9 + $0x30c] sm:$0xf] }
 0x63c   : > { %1795 = vmatpush.bf16.msrb.mxu3 %v3629_v23  ;;  %v4241_v23 = vld [vmem:[%s6695_s9 + $0x4] sm:$0xf]  ;;  %v3606_v15 = vld [vmem:[%s6695_s9 + $0x328] sm:$0xf0] }
 0x63d   : > { %v898_v4 = vsel %vm483_vm0, %v897_v29, 0.0  ;;  %v3633_v29 = vor.u32 %v4345_v21, %v3630_v22  ;;  %v3213_v21 = vor.u32 %v4245_v19, %v3212_v18  ;;  %v4309_v22 = vld [vmem:[%s6695_s9 + $0x21c] sm:$0xf0]  ;;  %v3609_v19 = vor.u32 %v4338_v14, %v3606_v15  ;;  %v4303_v14 = vld [vmem:[%s6695_s9 + $0x1ec] sm:$0xf0] }
 0x63e   : > { %899 = vadd.xlane.f32.xlu1 %v898_v4  ;;  %v4341_v4 = vld [vmem:[%s6695_s9 + $0x31c] sm:$0xf0] }
 0x63f   : > { %1821 = vmatpush.bf16.msra.mxu2 %v3633_v29  ;;  %v3470_v29 = vld [vmem:[%s6695_s9 + $0x220] sm:$0xf0] }
 0x6b1   : > { %v900_v30 = vpop.xlane.xlu1 %899 }
 0x6b2   : > { %v901_v31 = vmul.f32 %v900_v30, %v4918_v25  ;;  %v4273_v30 = vld [vmem:[%s6695_s9 + $0x104] sm:$0xf] }
 0x6b4   : > { %v902_v32 = vadd.f32 1e-05, %v901_v31  ;;  %v3342_v31 = vld [vmem:[%s6695_s9 + $0x120] sm:$0xf0] }
 0x6b6   : > { %4581 = vrsqrt.f32 %v902_v32  ;;  %vm909_vm4 = vweird.f32 %v902_v32 }
 0x6bc   : > { %v4582_v33 = vpop.eup %4581 }
 0x6bd   : > { %v904_v34 = vmul.f32 %v4582_v33, %v902_v32  ;;  %vm910_vm3 = vweird.f32 %v4582_v33  ;;  %v4337_v32 = vld [vmem:[%s6695_s9 + $0x304] sm:$0xf] }
 0x6be   : > { %vm911_vm5 = vmor %vm909_vm4, %vm910_vm3 }
 0x6bf   : > { %v905_v35 = vmul.f32 %v4582_v33, %v904_v34  ;;  %v3341_v34 = vor.u32 %v4277_v27, %v3340_v26  ;;  %v3469_v26 = vor.u32 %v4309_v22, %v3468_v20  ;;  %v3217_v27 = vor.u32 %v4241_v23, %v3214_v24  ;;  %v3316_v22 = vld [vmem:[%s6695_s9 + $0xc8] sm:$0xf]  ;;  %v4363_v20 = vld [vmem:[%s6695_s9 + $0x3d4] sm:$0xf] }
 0x6c0   : > { %v4270_v23 = vld [vmem:[%s6695_s9 + $0xe4] sm:$0xf0] }
 0x6c1   : > { %v906_v36 = vmul.f32 0.5, %v905_v35  ;;  %1783 = vmatpush.bf16.msrb.mxu1 %v3341_v34  ;;  %v4366_v34 = vld [vmem:[%s6695_s9 + $0x3e4] sm:$0xf0]  ;;  %v3317_v43 = vor.u32 %v4270_v23, %v3316_v22 }
 0x6c2   : > { %v3572_v24 = vld [vmem:[%s6695_s9 + $0x2c8] sm:$0xf] }
 0x6c3   : > { %v907_v37 = vsub.f32 1.5, %v906_v36  ;;  %v3345_v36 = vor.u32 %v4273_v30, %v3342_v31  ;;  %v3444_v30 = vld [vmem:[%s6695_s9 + $0x1c8] sm:$0xf] }
 0x6c4   : > { %v4302_v31 = vld [vmem:[%s6695_s9 + $0x1e4] sm:$0xf0] }
 0x6c5   : > { %v908_v38 = vmul.f32 %v4582_v33, %v907_v37  ;;  %1809 = vmatpush.bf16.msrb.mxu0 %v3345_v36  ;;  %v3446_v36 = vld [vmem:[%s6695_s9 + $0x1e8] sm:$0xf0] }
 0x6c7   : > { %v912_v40 = vsel %vm911_vm5, %v4582_v33, %v908_v38  ;;  %v3598_v33 = vld [vmem:[%s6695_s9 + $0x320] sm:$0xf0] }
 0x6c8   : > { %v913_v42 = vmul.f32 %v912_v40, %v896_v28  ;;  %v3596_v28 = vld [vmem:[%s6695_s9 + $0x300] sm:$0xf]  ;;  %v3601_v37 = vor.u32 %v4337_v32, %v3598_v33  ;;  %v3700_v32 = vld [vmem:[%s6695_s9 + $0x3c8] sm:$0xf]  ;;  %v3445_v33 = vor.u32 %v4302_v31, %v3444_v30  ;;  %v4330_v31 = vld [vmem:[%s6695_s9 + $0x2cc] sm:$0xf] }
 0x6c9   : > { %v3597_v35 = vor.u32 %v4341_v4, %v3596_v28  ;;  %v4305_v28 = vld [vmem:[%s6695_s9 + $0x204] sm:$0xf] }
 0x6ca   : > { %v918_v44 = vmul.f32 %v4559_v39, %v913_v42  ;;  %1822 = vmatpush.bf16.msra.mxu2 %v3601_v37  ;;  %v3473_v4 = vor.u32 %v4305_v28, %v3470_v29  ;;  %v3701_v37 = vor.u32 %v4366_v34, %v3700_v32  ;;  %v4266_v28 = vld [vmem:[%s6695_s9 + $0xcc] sm:$0xf]  ;;  %v3284_v39 = vld [vmem:[%s6695_s9 + $0x88] sm:$0xf]  ;;  %v4367_v42 = vld [vmem:[%s6695_s9 + $0x3ec] sm:$0xf0] }
 0x6cb   : > { %1796 = vmatpush.bf16.msrb.mxu3 %v3597_v35  ;;  %v4298_v35 = vld [vmem:[%s6695_s9 + $0x1cc] sm:$0xf]  ;;  %v3540_v34 = vld [vmem:[%s6695_s9 + $0x288] sm:$0xf] }
 0x6cc   : > { %v923_v45 = vadd.f32 %v4560_v41, %v918_v44  ;;  %v3308_v44 = vld [vmem:[%s6695_s9 + $0xc0] sm:$0xf]  ;;  %v3318_v29 = vld [vmem:[%s6695_s9 + $0xe8] sm:$0xf0]  ;;  %v3708_v41 = vld [vmem:[%s6695_s9 + $0x3d0] sm:$0xf] }
 0x6cd   : > { %v3321_v30 = vor.u32 %v4266_v28, %v3318_v29  ;;  %v3574_v32 = vld [vmem:[%s6695_s9 + $0x2e8] sm:$0xf0] }
 0x6ce   : > { %930 = vst [vmem:[#allocation1] sm:$0xff] %v923_v45  ;;  %v3577_v38 = vor.u32 %v4330_v31, %v3574_v32  ;;  %v4291_v31 = vld [vmem:[%s6695_s9 + $0x194] sm:$0xf] }
 0x6cf   : > { %928 = vst.msk [vmem:[#allocation2] sm:$0x1] %vm926_vm6, %v923_v45  ;;  %v3422_v32 = vld [vmem:[%s6695_s9 + $0x1b0] sm:$0xf0] }
 0x6d5   : > { %v932_v46 = vld [vmem:[#allocation1 + $0x1] ss:$9 sm:$0xff] }
 0x6d6   : > { %933 = vrot.lane.b32.xlu2 %v932_v46, %s6705_s18  ;;  %940 = vst [vmem:[#allocation1] sm:$0xff] %v923_v45 }
 0x6dd   : > { %v942_v47 = vld [vmem:[#allocation1 + $0x2] ss:$9 sm:$0xff] }
 0x6de   : > { %943 = vrot.lane.b32.xlu2 %v942_v47, %s6707_s26  ;;  %950 = vst [vmem:[#allocation1] sm:$0xff] %v923_v45  ;;  %v3564_v47 = vld [vmem:[%s6695_s9 + $0x2c0] sm:$0xf] }
 0x6e5   : > { %v952_v48 = vld [vmem:[#allocation1 + $0x3] ss:$9 sm:$0xff] }
 0x6e6   : > { %960 = vst [vmem:[#allocation1] sm:$0xff] %v923_v45 }
 0x6ed   : > { %v962_v49 = vld [vmem:[#allocation1 + $0x4] ss:$9 sm:$0xff] }
 0x6ee   : > { %965 = vst [vmem:[#allocation1] sm:$0xff] %v923_v45 }
 0x6ef   : > { %964 = vst.msk [vmem:[#allocation2 + $0x1] sm:$0x1] %vm926_vm6, %v962_v49  ;;  %v4265_v49 = vld [vmem:[%s6695_s9 + $0xc4] sm:$0xf] }
 0x6f5   : > { %v967_v50 = vld [vmem:[#allocation1 + $0x5] ss:$9 sm:$0xff] }
 0x6f6   : > { %968 = vrot.lane.b32.xlu2 %v967_v50, %s6705_s18  ;;  %972 = vst [vmem:[#allocation1] sm:$0xff] %v923_v45  ;;  %s3084_s18 = sshll.u32 %s3081_s2, 4  ;;  %s3085_s18 = int_to_ptr.hbm [resolvable:$true] %s3084_s18 }
 0x6fd   : > { %v974_v51 = vld [vmem:[#allocation1 + $0x6] ss:$9 sm:$0xff] }
 0x6fe   : > { %953 = vrot.lane.b32.xlu2 %v952_v48, %s6709_s22  ;;  %975 = vrot.lane.b32.xlu0 %v974_v51, %s6707_s26  ;;  %979 = vst [vmem:[#allocation1] sm:$0xff] %v923_v45  ;;  %v4269_v45 = vld [vmem:[%s6695_s9 + $0xdc] sm:$0xf0]  ;;  %v3310_v51 = vld [vmem:[%s6695_s9 + $0xe0] sm:$0xf0]  ;;  %s4600_s26 = sshra.s32 %s3085_s18, 4  ;;  %s4601_s26 = int_to_ptr.hbm [resolvable:$true] %s4600_s26 }
 0x6ff   : > { %v3309_v46 = vor.u32 %v4269_v45, %v3308_v44  ;;  %v4333_v48 = vld [vmem:[%s6695_s9 + $0x2dc] sm:$0xf0]  ;;  %v3313_v54 = vor.u32 %v4265_v49, %v3310_v51  ;;  %v4362_v44 = vld [vmem:[%s6695_s9 + $0x3cc] sm:$0xf]  ;;  %v3668_v49 = vld [vmem:[%s6695_s9 + $0x388] sm:$0xf]  ;;  %p4607_p0 = scmp.lt.s32.totalorder %s4601_s26, %s6700_s14 }
 0x700   : > { %v3565_v50 = vor.u32 %v4333_v48, %v3564_v47  ;;  %v3702_v45 = vld [vmem:[%s6695_s9 + $0x3e8] sm:$0xf0]  ;;  %v4294_v48 = vld [vmem:[%s6695_s9 + $0x1a4] sm:$0xf0] }
 0x701   : > { %1784 = vmatpush.bf16.msrb.mxu1 %v3309_v46  ;;  %1810 = vmatpush.bf16.msrb.mxu0 %v3313_v54  ;;  %v3412_v46 = vld [vmem:[%s6695_s9 + $0x188] sm:$0xf]  ;;  %v3705_v47 = vor.u32 %v4362_v44, %v3702_v45  ;;  %v3414_v54 = vld [vmem:[%s6695_s9 + $0x1a8] sm:$0xf0] }
 0x702   : > { %1797 = vmatpush.bf16.msrb.mxu3 %v3565_v50  ;;  %v4358_v50 = vld [vmem:[%s6695_s9 + $0x3a4] sm:$0xf0]  ;;  %v3413_v51 = vor.u32 %v4294_v48, %v3412_v46  ;;  %v4322_v46 = vld [vmem:[%s6695_s9 + $0x28c] sm:$0xf] }
 0x703   : > { %v3252_v48 = vld [vmem:[%s6695_s9 + $0x48] sm:$0xf] }
 0x705   : > { %v981_v52 = vld [vmem:[#allocation1 + $0x7] ss:$9 sm:$0xff]  ;;  %1785 = vmatpush.bf16.msrb.mxu1 %v3277_v59  ;;  %1811 = vmatpush.bf16.msrb.mxu0 %v3281_v0  ;;  %v3382_v0 = vld [vmem:[%s6695_s9 + $0x168] sm:$0xf0] }
 0x706   : > { %982 = vrot.lane.b32.xlu2 %v981_v52, %s6709_s22  ;;  %v4329_v52 = vld [vmem:[%s6695_s9 + $0x2c4] sm:$0xf]  ;;  %1798 = vmatpush.bf16.msrb.mxu3 %v3533_v63  ;;  %v4286_v59 = vld [vmem:[%s6695_s9 + $0x164] sm:$0xf0]  ;;  %v4282_v63 = vld [vmem:[%s6695_s9 + $0x14c] sm:$0xf] }
 0x707   : > { %v3569_v55 = vor.u32 %v4329_v52, %v3566_v53  ;;  %v3669_v52 = vor.u32 %v4358_v50, %v3668_v49  ;;  %v4290_v53 = vld [vmem:[%s6695_s9 + $0x18c] sm:$0xf]  ;;  %v4254_v50 = vld [vmem:[%s6695_s9 + $0x64] sm:$0xf0]  ;;  %s4602_s22 = scalar_lea.hbm %s4601_s26, 32 }
 0x708   : > { %v3417_v56 = vor.u32 %v4290_v53, %v3414_v54  ;;  %v4250_v53 = vld [vmem:[%s6695_s9 + $0x4c] sm:$0xf]  ;;  %p4603_p11 = scmp.ne.s32.totalorder %s4601_s26, %s4602_s22 }
 0x709   : > { %1823 = vmatpush.bf16.msra.mxu2 %v3569_v55  ;;  %1786 = vmatpush.bf16.msrb.mxu1 %v3245_v8  ;;  %v4354_v55 = vld [vmem:[%s6695_s9 + $0x38c] sm:$0xf]  ;;  %v3385_v8 = vor.u32 %v4282_v63, %v3382_v0  ;;  %v3476_v0 = vld [vmem:[%s6695_s9 + $0x208] sm:$0xf] }
 0x70a   : > { %1799 = vmatpush.bf16.msrb.mxu3 %v3501_v12  ;;  %1812 = vmatpush.bf16.msrb.mxu0 %v3249_v16  ;;  %v3673_v60 = vor.u32 %v4354_v55, %v3670_v57  ;;  %v4274_v12 = vld [vmem:[%s6695_s9 + $0x10c] sm:$0xf]  ;;  %v3349_v16 = vor.u32 %v4278_v7, %v3348_v6  ;;  %p4604_p12 = pnand %p4603_p11, %p4810_p5 }
 0x70b   : > { %v3353_v18 = vor.u32 %v4274_v12, %v3350_v13  ;;  %v3254_v54 = vld [vmem:[%s6695_s9 + $0x68] sm:$0xf0]  ;;  %v3452_v13 = vld [vmem:[%s6695_s9 + $0x1d0] sm:$0xf] }
 0x70c   : > { %v4314_v55 = vld [vmem:[%s6695_s9 + $0x24c] sm:$0xf]  ;;  %p4605_p13 = pneg %p4604_p12 }
 0x70d   : > { %1824 = vmatpush.bf16.msra.mxu2 %v3537_v3  ;;  %1787 = vmatpush.bf16.msrb.mxu1 %v3213_v21  ;;  %v3381_v3 = vor.u32 %v4286_v59, %v3380_v58  ;;  %v3510_v58 = vld [vmem:[%s6695_s9 + $0x268] sm:$0xf0]  ;;  %v3220_v59 = vld [vmem:[%s6695_s9 + $0x8] sm:$0xf]  ;;  %v3710_v21 = vld [vmem:[%s6695_s9 + $0x3f0] sm:$0xf0] }
 0x70e   : > { %1800 = vmatpush.bf16.msrb.mxu3 %v3469_v26  ;;  %1813 = vmatpush.bf16.msrb.mxu0 %v3217_v27  ;;  %v4334_v27 = vld [vmem:[%s6695_s9 + $0x2e4] sm:$0xf0]  ;;  %v3513_v63 = vor.u32 %v4314_v55, %v3510_v58  ;;  %v3478_v6 = vld [vmem:[%s6695_s9 + $0x228] sm:$0xf0]  ;;  %v3713_v29 = vor.u32 %v4363_v20, %v3710_v21  ;;  %v4275_v58 = vld [vmem:[%s6695_s9 + $0x114] sm:$0xf] }
 0x70f   : > { %v3550_v20 = vld [vmem:[%s6695_s9 + $0x2b0] sm:$0xf0] }
 0x711   : > { %1825 = vmatpush.bf16.msra.mxu2 %v3505_v17  ;;  %1832 = vmatpush.bf16.msra.mxu1 %v3445_v33  ;;  %v3605_v17 = vor.u32 %v4342_v11, %v3604_v10  ;;  %v4262_v33 = vld [vmem:[%s6695_s9 + $0xa4] sm:$0xf0] }
 0x712   : > { %1845 = vmatpush.bf16.msra.mxu3 %v3701_v37  ;;  %v4258_v37 = vld [vmem:[%s6695_s9 + $0x8c] sm:$0xf] }
 0x715   : > { %1826 = vmatpush.bf16.msra.mxu2 %v3473_v4  ;;  %1833 = vmatpush.bf16.msra.mxu1 %v3413_v51  ;;  %v3573_v4 = vor.u32 %v4334_v27, %v3572_v24  ;;  %v3508_v51 = vld [vmem:[%s6695_s9 + $0x248] sm:$0xf]  ;;  %v3453_v24 = vor.u32 %v4303_v14, %v3452_v13  ;;  %v4295_v27 = vld [vmem:[%s6695_s9 + $0x1ac] sm:$0xf0] }
 0x716   : > { %1846 = vmatpush.bf16.msra.mxu3 %v3669_v52  ;;  %v4318_v52 = vld [vmem:[%s6695_s9 + $0x264] sm:$0xf0]  ;;  %v3292_v13 = vld [vmem:[%s6695_s9 + $0x90] sm:$0xf] }
 0x717   : > { %v3509_v57 = vor.u32 %v4318_v52, %v3508_v51  ;;  %v3356_v52 = vld [vmem:[%s6695_s9 + $0x110] sm:$0xf] }
 0x718   : > { %v4263_v14 = vld [vmem:[%s6695_s9 + $0xac] sm:$0xf0] }
 0x719   : > { %1871 = vmatpush.bf16.msrb.mxu2 %v3705_v47  ;;  %1834 = vmatpush.bf16.msra.mxu1 %v3381_v3  ;;  %v3542_v47 = vld [vmem:[%s6695_s9 + $0x2a8] sm:$0xf0]  ;;  %v3293_v21 = vor.u32 %v4263_v14, %v3292_v13  ;;  %v4288_v13 = vld [vmem:[%s6695_s9 + $0x174] sm:$0xf0] }
 0x71a   : > { %v3545_v49 = vor.u32 %v4322_v46, %v3542_v47  ;;  %v3222_v3 = vld [vmem:[%s6695_s9 + $0x28] sm:$0xf0]  ;;  %v4283_v46 = vld [vmem:[%s6695_s9 + $0x154] sm:$0xf] }
 0x71b   : > { %v3390_v47 = vld [vmem:[%s6695_s9 + $0x170] sm:$0xf0] }
 0x71d   : > { %1872 = vmatpush.bf16.msrb.mxu2 %v3673_v60  ;;  %1835 = vmatpush.bf16.msra.mxu1 %v3349_v16  ;;  %v4246_v60 = vld [vmem:[%s6695_s9 + $0x24] sm:$0xf0]  ;;  %v4299_v16 = vld [vmem:[%s6695_s9 + $0x1d4] sm:$0xf] }
 0x71e   : > { %v3221_v7 = vor.u32 %v4246_v60, %v3220_v59  ;;  %v3358_v59 = vld [vmem:[%s6695_s9 + $0x130] sm:$0xf0] }
 0x71f   : > { %v4339_v60 = vld [vmem:[%s6695_s9 + $0x314] sm:$0xf] }
 0x721   : > { %1873 = vmatpush.bf16.msrb.mxu2 %v3641_v9  ;;  %1836 = vmatpush.bf16.msra.mxu1 %v3317_v43  ;;  %v3225_v9 = vor.u32 %v4242_v2, %v3222_v3  ;;  %v3420_v43 = vld [vmem:[%s6695_s9 + $0x190] sm:$0xf]  ;;  %v3361_v2 = vor.u32 %v4275_v58, %v3358_v59  ;;  %v3718_v58 = vld [vmem:[%s6695_s9 + $0x3f8] sm:$0xf0] }
 0x725   : > { %1874 = vmatpush.bf16.msrb.mxu2 %v3609_v19 }
 0x729   : > { %1875 = vmatpush.bf16.msrb.mxu2 %v3577_v38  ;;  %v4355_v38 = vld [vmem:[%s6695_s9 + $0x394] sm:$0xf] }
 0x72d   : > { %1876 = vmatpush.bf16.msrb.mxu2 %v3545_v49  ;;  %v3646_v49 = vld [vmem:[%s6695_s9 + $0x370] sm:$0xf0] }
 0x730   : > { %v934_v40 = vpop.permute.xlu2 %933 }
 0x731   : > { %939 = vst.msk [vmem:[#allocation2] sm:$0x1] %vm938_vm9, %v934_v40  ;;  %v3449_v40 = vor.u32 %v4298_v35, %v3446_v36  ;;  %v3285_v35 = vor.u32 %v4262_v33, %v3284_v39  ;;  %v4326_v36 = vld [vmem:[%s6695_s9 + $0x2a4] sm:$0xf0]  ;;  %1877 = vmatpush.bf16.msrb.mxu2 %v3513_v63  ;;  %v3678_v39 = vld [vmem:[%s6695_s9 + $0x3b0] sm:$0xf0]  ;;  %v3421_v33 = vor.u32 %v4295_v27, %v3420_v43 }
 0x732   : > { %v3541_v44 = vor.u32 %v4326_v36, %v3540_v34  ;;  %v4287_v36 = vld [vmem:[%s6695_s9 + $0x16c] sm:$0xf0] }
 0x733   : > { %1858 = vmatpush.bf16.msra.mxu0 %v3449_v40  ;;  %v3286_v40 = vld [vmem:[%s6695_s9 + $0xa8] sm:$0xf0]  ;;  %1837 = vmatpush.bf16.msra.mxu1 %v3285_v35  ;;  %v3388_v35 = vld [vmem:[%s6695_s9 + $0x150] sm:$0xf] }
 0x734   : > { %v3289_v45 = vor.u32 %v4258_v37, %v3286_v40  ;;  %v3425_v37 = vor.u32 %v4291_v31, %v3422_v32  ;;  %v3681_v40 = vor.u32 %v4355_v38, %v3678_v39  ;;  %v4255_v43 = vld [vmem:[%s6695_s9 + $0x6c] sm:$0xf0]  ;;  %v3262_v31 = vld [vmem:[%s6695_s9 + $0x70] sm:$0xf0] }
 0x735   : > { %v4315_v32 = vld [vmem:[%s6695_s9 + $0x254] sm:$0xf]  ;;  %v3228_v39 = vld [vmem:[%s6695_s9 + $0x10] sm:$0xf] }
 0x736   : > { %v3518_v38 = vld [vmem:[%s6695_s9 + $0x270] sm:$0xf0] }
 0x737   : > { %1859 = vmatpush.bf16.msra.mxu0 %v3417_v56  ;;  %v3253_v56 = vor.u32 %v4254_v50, %v3252_v48  ;;  %v4347_v48 = vld [vmem:[%s6695_s9 + $0x354] sm:$0xf]  ;;  %v3389_v50 = vor.u32 %v4287_v36, %v3388_v35  ;;  %v4247_v35 = vld [vmem:[%s6695_s9 + $0x2c] sm:$0xf0] }
 0x738   : > { %v944_v5 = vpop.permute.xlu2 %943  ;;  %v3649_v55 = vor.u32 %v4347_v48, %v3646_v49  ;;  %v3484_v36 = vld [vmem:[%s6695_s9 + $0x210] sm:$0xf]  ;;  %v3486_v48 = vld [vmem:[%s6695_s9 + $0x230] sm:$0xf0]  ;;  %v3460_v49 = vld [vmem:[%s6695_s9 + $0x1d8] sm:$0xf] }
 0x739   : > { %949 = vst.msk [vmem:[#allocation2] sm:$0x1] %vm948_vm12, %v944_v5  ;;  %v3637_v5 = vor.u32 %v4350_v62, %v3636_v61  ;;  %v3257_v62 = vor.u32 %v4250_v53, %v3254_v54  ;;  %1838 = vmatpush.bf16.msra.mxu1 %v3253_v56  ;;  %v4279_v53 = vld [vmem:[%s6695_s9 + $0x12c] sm:$0xf0]  ;;  %v3393_v54 = vor.u32 %v4283_v46, %v3390_v47  ;;  %v3230_v46 = vld [vmem:[%s6695_s9 + $0x30] sm:$0xf0] }
 0x73a   : > { %v3612_v56 = vld [vmem:[%s6695_s9 + $0x310] sm:$0xf]  ;;  %v4307_v47 = vld [vmem:[%s6695_s9 + $0x214] sm:$0xf] }
 0x73b   : > { %1847 = vmatpush.bf16.msra.mxu3 %v3637_v5  ;;  %1860 = vmatpush.bf16.msra.mxu0 %v3385_v8  ;;  %v4306_v5 = vld [vmem:[%s6695_s9 + $0x20c] sm:$0xf]  ;;  %v3477_v8 = vor.u32 %v4310_v1, %v3476_v0  ;;  %v3324_v0 = vld [vmem:[%s6695_s9 + $0xd0] sm:$0xf] }
 0x73c   : > { %v3481_v10 = vor.u32 %v4306_v5, %v3478_v6  ;;  %v4271_v1 = vld [vmem:[%s6695_s9 + $0xec] sm:$0xf0] }
 0x73d   : > { %1839 = vmatpush.bf16.msra.mxu1 %v3221_v7  ;;  %v3580_v5 = vld [vmem:[%s6695_s9 + $0x2d0] sm:$0xf]  ;;  %v4267_v7 = vld [vmem:[%s6695_s9 + $0xd4] sm:$0xf] }
 0x73e   : > { %1878 = vmatpush.bf16.msrb.mxu2 %v3481_v10  ;;  %v4335_v6 = vld [vmem:[%s6695_s9 + $0x2ec] sm:$0xf0]  ;;  %v3582_v10 = vld [vmem:[%s6695_s9 + $0x2f0] sm:$0xf0] }
 0x73f   : > { %1848 = vmatpush.bf16.msra.mxu3 %v3605_v17  ;;  %1861 = vmatpush.bf16.msra.mxu0 %v3353_v18  ;;  %v3454_v17 = vld [vmem:[%s6695_s9 + $0x1f0] sm:$0xf0] }
 0x740   : > { %v3457_v28 = vor.u32 %v4299_v16, %v3454_v17  ;;  %v4327_v16 = vld [vmem:[%s6695_s9 + $0x2ac] sm:$0xf0]  ;;  %v4259_v17 = vld [vmem:[%s6695_s9 + $0x94] sm:$0xf] }
 0x743   : > { %1849 = vmatpush.bf16.msra.mxu3 %v3573_v4  ;;  %1862 = vmatpush.bf16.msra.mxu0 %v3321_v30  ;;  %v3676_v4 = vld [vmem:[%s6695_s9 + $0x390] sm:$0xf] }
 0x744   : > { %v4359_v30 = vld [vmem:[%s6695_s9 + $0x3ac] sm:$0xf0] }
 0x745   : > { %v3677_v34 = vor.u32 %v4359_v30, %v3676_v4  ;;  %v4319_v4 = vld [vmem:[%s6695_s9 + $0x26c] sm:$0xf0]  ;;  %v4251_v30 = vld [vmem:[%s6695_s9 + $0x54] sm:$0xf] }
 0x747   : > { %1850 = vmatpush.bf16.msra.mxu3 %v3541_v44  ;;  %1863 = vmatpush.bf16.msra.mxu0 %v3289_v45  ;;  %v3644_v44 = vld [vmem:[%s6695_s9 + $0x350] sm:$0xf] }
 0x748   : > { %v4351_v45 = vld [vmem:[%s6695_s9 + $0x36c] sm:$0xf0] }
 0x749   : > { %v3645_v51 = vor.u32 %v4351_v45, %v3644_v44  ;;  %v3521_v44 = vor.u32 %v4315_v32, %v3518_v38  ;;  %v4243_v45 = vld [vmem:[%s6695_s9 + $0x14] sm:$0xf]  ;;  %v3622_v32 = vld [vmem:[%s6695_s9 + $0x338] sm:$0xf0] }
 0x74a   : > { %v3233_v59 = vor.u32 %v4243_v45, %v3230_v46  ;;  %v3334_v45 = vld [vmem:[%s6695_s9 + $0xf8] sm:$0xf0] }
 0x74b   : > { %1851 = vmatpush.bf16.msra.mxu3 %v3509_v57  ;;  %1864 = vmatpush.bf16.msra.mxu0 %v3257_v62  ;;  %v4343_v57 = vld [vmem:[%s6695_s9 + $0x32c] sm:$0xf0]  ;;  %v3357_v62 = vor.u32 %v4279_v53, %v3356_v52  ;;  %v4368_v52 = vld [vmem:[%s6695_s9 + $0x3f4] sm:$0xf0]  ;;  %v4300_v53 = vld [vmem:[%s6695_s9 + $0x1dc] sm:$0xf] }
 0x74c   : > { %v3613_v63 = vor.u32 %v4343_v57, %v3612_v56  ;;  %v3462_v56 = vld [vmem:[%s6695_s9 + $0x1f8] sm:$0xf0] }
 0x74d   : > { %v4364_v57 = vld [vmem:[%s6695_s9 + $0x3dc] sm:$0xf] }
 0x74e   : > { %v4332_v46 = vld [vmem:[%s6695_s9 + $0x2dc] sm:$0xf] }
 0x74f   : > { %1852 = vmatpush.bf16.msra.mxu3 %v3477_v8  ;;  %1865 = vmatpush.bf16.msra.mxu0 %v3225_v9  ;;  %v3326_v8 = vld [vmem:[%s6695_s9 + $0xf0] sm:$0xf0] }
 0x750   : > { %v969_v26 = vpop.permute.xlu2 %968  ;;  %v4331_v9 = vld [vmem:[%s6695_s9 + $0x2d4] sm:$0xf] }
 0x751   : > { %971 = vst.msk [vmem:[#allocation2 + $0x1] sm:$0x1] %vm938_vm9, %v969_v26  ;;  %v3709_v26 = vor.u32 %v4367_v42, %v3708_v41  ;;  %v3329_v41 = vor.u32 %v4267_v7, %v3326_v8  ;;  %v3585_v42 = vor.u32 %v4331_v9, %v3582_v10  ;;  %v3430_v7 = vld [vmem:[%s6695_s9 + $0x1b8] sm:$0xf0] }
 0x752   : > { %v4356_v8 = vld [vmem:[%s6695_s9 + $0x39c] sm:$0xf] }
 0x753   : > { %v3686_v9 = vld [vmem:[%s6695_s9 + $0x3b8] sm:$0xf0] }
 0x758   : > { %v954_v61 = vpop.permute.xlu2 %953 }
 0x759   : > { %959 = vst.msk [vmem:[#allocation2] sm:$0x1] %vm958_vm15, %v954_v61  ;;  %v3614_v61 = vld [vmem:[%s6695_s9 + $0x330] sm:$0xf0] }
 0x75a   : > { %v3617_v3 = vor.u32 %v4339_v60, %v3614_v61  ;;  %v3489_v60 = vor.u32 %v4307_v47, %v3486_v48  ;;  %v3590_v47 = vld [vmem:[%s6695_s9 + $0x2f8] sm:$0xf0] }
 0x760   : > { %v983_v12 = vpop.permute.xlu2 %982 }
 0x770   : > { %v976_v11 = vpop.permute.xlu0 %975 }
 0x771   : > { %978 = vst.msk [vmem:[#allocation2 + $0x1] sm:$0x1] %vm948_vm12, %v976_v11  ;;  %v3325_v11 = vor.u32 %v4271_v1, %v3324_v0  ;;  %v4296_v0 = vld [vmem:[%s6695_s9 + $0x1b4] sm:$0xf0]  ;;  %v3465_v1 = vor.u32 %v4300_v53, %v3462_v56  ;;  %v3593_v53 = vor.u32 %v4332_v46, %v3590_v47  ;;  %v4260_v56 = vld [vmem:[%s6695_s9 + $0x9c] sm:$0xf] }
 0x772   : > { %985 = vst.msk [vmem:[#allocation2 + $0x1] sm:$0x1] %vm958_vm15, %v983_v12  ;;  %v3581_v12 = vor.u32 %v4335_v6, %v3580_v5  ;;  %v4360_v5 = vld [vmem:[%s6695_s9 + $0x3b4] sm:$0xf0]  ;;  %v4292_v6 = vld [vmem:[%s6695_s9 + $0x19c] sm:$0xf] }
 0x773   : > { %v3433_v14 = vor.u32 %v4292_v6, %v3430_v7  ;;  %v3270_v6 = vld [vmem:[%s6695_s9 + $0x78] sm:$0xf0]  ;;  %v4414_v47 = vld [vmem:[%s6697_s11 + $0x164] sm:$0xf0] }
 0x774   : > { %v4316_v7 = vld [vmem:[%s6695_s9 + $0x25c] sm:$0xf] }
 0x779   : > { %v986_v15 = vld [vmem:[#allocation2] sm:$0x3] }
 0x77a   : > { %v988_v18 = vperm.slane %v986_v15, 0  ;;  %v989_v19 = vperm.slane %v986_v15, 1  ;;  %v3548_v15 = vld [vmem:[%s6695_s9 + $0x290] sm:$0xf] }
 0x77c   : > { %v5416_v22 = vpack.c.bf16 %v988_v18, %v988_v18  ;;  %v5418_v23 = vpack.c.bf16 %v989_v19, %v989_v19  ;;  %v3294_v18 = vld [vmem:[%s6695_s9 + $0xb0] sm:$0xf0] }
 0x77d   : > { %v4323_v19 = vld [vmem:[%s6695_s9 + $0x294] sm:$0xf]  ;;  %v3297_v27 = vor.u32 %v4259_v17, %v3294_v18  ;;  %v3398_v17 = vld [vmem:[%s6695_s9 + $0x178] sm:$0xf0] }
 0x77e   : > { %1788 = vmatmul.bf16.vlgmr.msrb.gmra.mxu1 %v5416_v22  ;;  %1801 = vmatmul.bf16.vlgmr.msrb.gmra.mxu3 %v5418_v23  ;;  %v4348_v18 = vld [vmem:[%s6695_s9 + $0x35c] sm:$0xf] }
 0x77f   : > { %1814 = vmatmul.bf16.vlgmr.msrb.gmra.mxu0 %v5416_v22  ;;  %1827 = vmatmul.bf16.vlgmr.msra.gmra.mxu2 %v5418_v23 }
 0x780   : > { %1884 = vmatpush.bf16.msrb.mxu1 %v3453_v24  ;;  %1897 = vmatpush.bf16.msrb.mxu3 %v3709_v26  ;;  %v3549_v24 = vor.u32 %v4327_v16, %v3548_v15  ;;  %v3260_v26 = vld [vmem:[%s6695_s9 + $0x50] sm:$0xf]  ;;  %v4352_v15 = vld [vmem:[%s6695_s9 + $0x374] sm:$0xf0]  ;;  %v4284_v16 = vld [vmem:[%s6695_s9 + $0x15c] sm:$0xf] }
 0x781   : > { %1910 = vmatpush.bf16.msrb.mxu0 %v3457_v28  ;;  %1923 = vmatpush.bf16.msra.mxu2 %v3713_v29  ;;  %v3553_v28 = vor.u32 %v4323_v19, %v3550_v20  ;;  %v3516_v29 = vld [vmem:[%s6695_s9 + $0x250] sm:$0xf]  ;;  %v3654_v19 = vld [vmem:[%s6695_s9 + $0x378] sm:$0xf0] }
 0x784   : > { %1885 = vmatpush.bf16.msrb.mxu1 %v3421_v33  ;;  %1898 = vmatpush.bf16.msrb.mxu3 %v3677_v34  ;;  %v3261_v33 = vor.u32 %v4255_v43, %v3260_v26  ;;  %v3517_v34 = vor.u32 %v4319_v4, %v3516_v29  ;;  %v4280_v26 = vld [vmem:[%s6695_s9 + $0x134] sm:$0xf0]  ;;  %v3401_v43 = vor.u32 %v4284_v16, %v3398_v17  ;;  %v4276_v4 = vld [vmem:[%s6695_s9 + $0x11c] sm:$0xf] }
 0x785   : > { %1911 = vmatpush.bf16.msrb.mxu0 %v3425_v37  ;;  %1924 = vmatpush.bf16.msra.mxu2 %v3681_v40  ;;  %v4311_v37 = vld [vmem:[%s6695_s9 + $0x22c] sm:$0xf0]  ;;  %v3265_v40 = vor.u32 %v4251_v30, %v3262_v31  ;;  %v4344_v29 = vld [vmem:[%s6695_s9 + $0x334] sm:$0xf0]  ;;  %v3366_v30 = vld [vmem:[%s6695_s9 + $0x138] sm:$0xf0] }
 0x786   : > { %v4340_v31 = vld [vmem:[%s6695_s9 + $0x31c] sm:$0xf] }
 0x787   : > { %v3238_v16 = vld [vmem:[%s6695_s9 + $0x38] sm:$0xf0] }
 0x788   : > { %1886 = vmatpush.bf16.msrb.mxu1 %v3389_v50  ;;  %1899 = vmatpush.bf16.msrb.mxu3 %v3645_v51  ;;  %v4304_v50 = vld [vmem:[%s6695_s9 + $0x1f4] sm:$0xf0]  ;;  %v4308_v17 = vld [vmem:[%s6695_s9 + $0x21c] sm:$0xf] }
 0x789   : > { %1912 = vmatpush.bf16.msrb.mxu0 %v3393_v54  ;;  %1925 = vmatpush.bf16.msra.mxu2 %v3649_v55  ;;  %v3716_v51 = vld [vmem:[%s6695_s9 + $0x3d8] sm:$0xf]  ;;  %v3229_v54 = vor.u32 %v4247_v35, %v3228_v39  ;;  %v3485_v55 = vor.u32 %v4311_v37, %v3484_v36  ;;  %v3461_v61 = vor.u32 %v4304_v50, %v3460_v49 }
 0x78a   : > { %v3369_v35 = vor.u32 %v4276_v4, %v3366_v30  ;;  %v3625_v36 = vor.u32 %v4340_v31, %v3622_v32  ;;  %v3588_v37 = vld [vmem:[%s6695_s9 + $0x2d8] sm:$0xf]  ;;  %v4382_v4 = vld [vmem:[%s6697_s11 + $0x64] sm:$0xf0]  ;;  %v3836_v32 = vld [vmem:[%s6697_s11 + $0xe0] sm:$0xf] }
 0x78b   : > { %v3300_v50 = vld [vmem:[%s6695_s9 + $0x98] sm:$0xf] }
 0x78c   : > { %1887 = vmatpush.bf16.msrb.mxu1 %v3357_v62  ;;  %1900 = vmatpush.bf16.msrb.mxu3 %v3613_v63  ;;  %v3717_v62 = vor.u32 %v4368_v52, %v3716_v51  ;;  %v3428_v63 = vld [vmem:[%s6695_s9 + $0x198] sm:$0xf] }
 0x78d   : > { %1913 = vmatpush.bf16.msrb.mxu0 %v3361_v2  ;;  %1926 = vmatpush.bf16.msra.mxu2 %v3617_v3  ;;  %v3721_v2 = vor.u32 %v4364_v57, %v3718_v58  ;;  %v3684_v3 = vld [vmem:[%s6695_s9 + $0x398] sm:$0xf]  ;;  %v3429_v10 = vor.u32 %v4296_v0, %v3428_v63  ;;  %v3302_v57 = vld [vmem:[%s6695_s9 + $0xb8] sm:$0xf0] }
 0x78e   : > { %1840 = vmatmul.bf16.vlgmr.msra.gmra.mxu1 %v5416_v22  ;;  %1853 = vmatmul.bf16.vlgmr.msra.gmra.mxu3 %v5418_v23  ;;  %v4264_v51 = vld [vmem:[%s6695_s9 + $0xb4] sm:$0xf0]  ;;  %v4324_v58 = vld [vmem:[%s6695_s9 + $0x29c] sm:$0xf]  ;;  %v3305_v0 = vor.u32 %v4260_v56, %v3302_v57  ;;  %v3892_v56 = vld [vmem:[%s6697_s11 + $0x150] sm:$0xf] }
 0x78f   : > { %1866 = vmatmul.bf16.vlgmr.msra.gmra.mxu0 %v5416_v22  ;;  %1879 = vmatmul.bf16.vlgmr.msrb.gmra.mxu2 %v5418_v23  ;;  %v4256_v63 = vld [vmem:[%s6695_s9 + $0x74] sm:$0xf0] }
 0x790   : > { %1888 = vmatpush.bf16.msrb.mxu1 %v3325_v11  ;;  %1901 = vmatpush.bf16.msrb.mxu3 %v3581_v12  ;;  %v3685_v11 = vor.u32 %v4360_v5, %v3684_v3  ;;  %v3396_v12 = vld [vmem:[%s6695_s9 + $0x158] sm:$0xf]  ;;  %v4252_v5 = vld [vmem:[%s6695_s9 + $0x5c] sm:$0xf] }
 0x791   : > { %1914 = vmatpush.bf16.msrb.mxu0 %v3329_v41  ;;  %1927 = vmatpush.bf16.msra.mxu2 %v3585_v42  ;;  %v3689_v41 = vor.u32 %v4356_v8, %v3686_v9  ;;  %v3652_v42 = vld [vmem:[%s6695_s9 + $0x358] sm:$0xf]  ;;  %v3397_v20 = vor.u32 %v4288_v13, %v3396_v12  ;;  %v3526_v8 = vld [vmem:[%s6695_s9 + $0x278] sm:$0xf0] }
 0x792   : > { %v4320_v3 = vld [vmem:[%s6695_s9 + $0x274] sm:$0xf0] }
 0x793   : > { %v4248_v12 = vld [vmem:[%s6695_s9 + $0x34] sm:$0xf0] }
 0x794   : > { %1889 = vmatpush.bf16.msrb.mxu1 %v3293_v21  ;;  %1902 = vmatpush.bf16.msrb.mxu3 %v3549_v24  ;;  %v3653_v21 = vor.u32 %v4352_v15, %v3652_v42  ;;  %v3364_v24 = vld [vmem:[%s6695_s9 + $0x118] sm:$0xf]  ;;  %v4244_v15 = vld [vmem:[%s6695_s9 + $0x1c] sm:$0xf] }
 0x795   : > { %1915 = vmatpush.bf16.msrb.mxu0 %v3297_v27  ;;  %1928 = vmatpush.bf16.msra.mxu2 %v3553_v28  ;;  %v3657_v27 = vor.u32 %v4348_v18, %v3654_v19  ;;  %v3620_v28 = vld [vmem:[%s6695_s9 + $0x318] sm:$0xf]  ;;  %v3365_v38 = vor.u32 %v4280_v26, %v3364_v24  ;;  %v3494_v18 = vld [vmem:[%s6695_s9 + $0x238] sm:$0xf0]  ;;  %v3780_v19 = vld [vmem:[%s6697_s11 + $0x70] sm:$0xf] }
 0x796   : > { %v3621_v39 = vor.u32 %v4344_v29, %v3620_v28  ;;  %v3492_v13 = vld [vmem:[%s6695_s9 + $0x218] sm:$0xf]  ;;  %v3497_v28 = vor.u32 %v4308_v17, %v3494_v18  ;;  %v3772_v29 = vld [vmem:[%s6697_s11 + $0x60] sm:$0xf]  ;;  %v4390_v17 = vld [vmem:[%s6697_s11 + $0xa4] sm:$0xf0] }
 0x797   : > { %v4312_v42 = vld [vmem:[%s6695_s9 + $0x234] sm:$0xf0] }
 0x798   : > { %1890 = vmatpush.bf16.msrb.mxu1 %v3261_v33  ;;  %1903 = vmatpush.bf16.msrb.mxu3 %v3517_v34  ;;  %v3332_v33 = vld [vmem:[%s6695_s9 + $0xd8] sm:$0xf] }
 0x799   : > { %1916 = vmatpush.bf16.msrb.mxu0 %v3265_v40  ;;  %1929 = vmatpush.bf16.msra.mxu2 %v3521_v44  ;;  %v4272_v34 = vld [vmem:[%s6695_s9 + $0xf4] sm:$0xf0]  ;;  %v4268_v44 = vld [vmem:[%s6695_s9 + $0xdc] sm:$0xf] }
 0x79a   : > { %v4336_v40 = vld [vmem:[%s6695_s9 + $0x2f4] sm:$0xf0]  ;;  %v3333_v48 = vor.u32 %v4272_v34, %v3332_v33  ;;  %v3337_v52 = vor.u32 %v4268_v44, %v3334_v45  ;;  %v3972_v34 = vld [vmem:[%s6697_s11 + $0x1f0] sm:$0xf]  ;;  %v3900_v44 = vld [vmem:[%s6697_s11 + $0x160] sm:$0xf]  ;;  %v3773_v45 = vor.u32 %v4382_v4, %v3772_v29 }
 0x79b   : > { %v3589_v49 = vor.u32 %v4336_v40, %v3588_v37  ;;  %v4400_v24 = vld [vmem:[%s6697_s11 + $0xf4] sm:$0xf0]  ;;  %v4370_v29 = vld [vmem:[%s6697_s11 + $0x4] sm:$0xf0]  ;;  %v3788_v4 = vld [vmem:[%s6697_s11 + $0x80] sm:$0xf] }
 0x79c   : > { %1891 = vmatpush.bf16.msrb.mxu1 %v3229_v54  ;;  %1904 = vmatpush.bf16.msrb.mxu3 %v3485_v55  ;;  %v3556_v54 = vld [vmem:[%s6695_s9 + $0x298] sm:$0xf] }
 0x79d   : > { %1917 = vmatpush.bf16.msrb.mxu0 %v3233_v59  ;;  %1930 = vmatpush.bf16.msra.mxu2 %v3489_v60  ;;  %v4328_v55 = vld [vmem:[%s6695_s9 + $0x2b4] sm:$0xf0]  ;;  %v3558_v59 = vld [vmem:[%s6695_s9 + $0x2b8] sm:$0xf0]  ;;  %v3301_v60 = vor.u32 %v4264_v51, %v3300_v50  ;;  %v3828_v51 = vld [vmem:[%s6697_s11 + $0xd0] sm:$0xf] }
 0x79e   : > { %v4416_v33 = vld [vmem:[%s6697_s11 + $0x174] sm:$0xf0] }
 0x79f   : > { %1892 = vmatmul.bf16.vlgmr.msrb.gmra.mxu1 %v5416_v22  ;;  %1905 = vmatmul.bf16.vlgmr.msrb.gmra.mxu3 %v5418_v23  ;;  %v4380_v50 = vld [vmem:[%s6697_s11 + $0x54] sm:$0xf0] }
 0x7a0   : > { %1936 = vmatpush.bf16.msra.mxu1 %v3461_v61  ;;  %1949 = vmatpush.bf16.msra.mxu3 %v3717_v62  ;;  %v3557_v61 = vor.u32 %v4328_v55, %v3556_v54  ;;  %v3268_v62 = vld [vmem:[%s6695_s9 + $0x58] sm:$0xf]  ;;  %v3901_v54 = vor.u32 %v4414_v47, %v3900_v44  ;;  %v4092_v44 = vld [vmem:[%s6697_s11 + $0x2e0] sm:$0xf] }
 0x7a1   : > { %1962 = vmatpush.bf16.msra.mxu0 %v3465_v1  ;;  %1975 = vmatpush.bf16.msrb.mxu2 %v3721_v2  ;;  %v3561_v1 = vor.u32 %v4324_v58, %v3558_v59  ;;  %v3524_v2 = vld [vmem:[%s6695_s9 + $0x258] sm:$0xf]  ;;  %v3269_v9 = vor.u32 %v4256_v63, %v3268_v62  ;;  %v4394_v62 = vld [vmem:[%s6697_s11 + $0xc4] sm:$0xf0]  ;;  %v3748_v63 = vld [vmem:[%s6697_s11 + $0x30] sm:$0xf] }
 0x7a2   : > { %1918 = vmatmul.bf16.vlgmr.msrb.gmra.mxu0 %v5416_v22  ;;  %1931 = vmatmul.bf16.vlgmr.msra.gmra.mxu2 %v5418_v23  ;;  %v4428_v59 = vld [vmem:[%s6697_s11 + $0x1d4] sm:$0xf0] }
 0x7a4   : > { %1937 = vmatpush.bf16.msra.mxu1 %v3429_v10  ;;  %1950 = vmatpush.bf16.msra.mxu3 %v3685_v11  ;;  %v3525_v10 = vor.u32 %v4320_v3, %v3524_v2  ;;  %v3236_v11 = vld [vmem:[%s6695_s9 + $0x18] sm:$0xf]  ;;  %v3884_v2 = vld [vmem:[%s6697_s11 + $0x140] sm:$0xf] }
 0x7a5   : > { %1963 = vmatpush.bf16.msra.mxu0 %v3433_v14  ;;  %1976 = vmatpush.bf16.msrb.mxu2 %v3689_v41  ;;  %v3273_v14 = vor.u32 %v4252_v5, %v3270_v6  ;;  %v3529_v41 = vor.u32 %v4316_v7, %v3526_v8  ;;  %v3237_v26 = vor.u32 %v4248_v12, %v3236_v11  ;;  %v4410_v6 = vld [vmem:[%s6697_s11 + $0x144] sm:$0xf0]  ;;  %v3948_v7 = vld [vmem:[%s6697_s11 + $0x1c0] sm:$0xf]  ;;  %v4392_v11 = vld [vmem:[%s6697_s11 + $0xb4] sm:$0xf0] }
 0x7a6   : > { %v4426_v8 = vld [vmem:[%s6697_s11 + $0x1c4] sm:$0xf0]  ;;  %v3885_v12 = vor.u32 %v4410_v6, %v3884_v2  ;;  %v4068_v2 = vld [vmem:[%s6697_s11 + $0x2b0] sm:$0xf] }
 0x7a7   : > { %v4406_v6 = vld [vmem:[%s6697_s11 + $0x124] sm:$0xf0] }
 0x7a8   : > { %1938 = vmatpush.bf16.msra.mxu1 %v3397_v20  ;;  %1951 = vmatpush.bf16.msra.mxu3 %v3653_v21  ;;  %v4384_v20 = vld [vmem:[%s6697_s11 + $0x74] sm:$0xf0]  ;;  %v3844_v21 = vld [vmem:[%s6697_s11 + $0xf0] sm:$0xf] }
 0x7a9   : > { %1964 = vmatpush.bf16.msra.mxu0 %v3401_v43  ;;  %1977 = vmatpush.bf16.msrb.mxu2 %v3657_v27  ;;  %v3493_v43 = vor.u32 %v4312_v42, %v3492_v13  ;;  %v3241_v27 = vor.u32 %v4244_v15, %v3238_v16  ;;  %v3781_v30 = vor.u32 %v4384_v20, %v3780_v19  ;;  %v3740_v42 = vld [vmem:[%s6697_s11 + $0x20] sm:$0xf]  ;;  %v4374_v15 = vld [vmem:[%s6697_s11 + $0x24] sm:$0xf0]  ;;  %v3732_v20 = vld [vmem:[%s6697_s11 + $0x10] sm:$0xf] }
 0x7aa   : > { %v3845_v31 = vor.u32 %v4400_v24, %v3844_v21  ;;  %v3949_v13 = vor.u32 %v4426_v8, %v3948_v7  ;;  %v3804_v16 = vld [vmem:[%s6697_s11 + $0xa0] sm:$0xf]  ;;  %v3741_v18 = vor.u32 %v4374_v15, %v3740_v42  ;;  %v4372_v21 = vld [vmem:[%s6697_s11 + $0x14] sm:$0xf0]  ;;  %v3796_v24 = vld [vmem:[%s6697_s11 + $0x90] sm:$0xf] }
 0x7ab   : > { %v3805_v19 = vor.u32 %v4390_v17, %v3804_v16  ;;  %v3932_v7 = vld [vmem:[%s6697_s11 + $0x1a0] sm:$0xf]  ;;  %v4454_v42 = vld [vmem:[%s6697_s11 + $0x2a4] sm:$0xf0]  ;;  %v3860_v15 = vld [vmem:[%s6697_s11 + $0x110] sm:$0xf] }
 0x7ac   : > { %1939 = vmatpush.bf16.msra.mxu1 %v3365_v38  ;;  %1952 = vmatpush.bf16.msra.mxu3 %v3621_v39  ;;  %v4398_v38 = vld [vmem:[%s6697_s11 + $0xe4] sm:$0xf0]  ;;  %v3908_v39 = vld [vmem:[%s6697_s11 + $0x170] sm:$0xf]  ;;  %v4404_v16 = vld [vmem:[%s6697_s11 + $0x114] sm:$0xf0] }
 0x7ad   : > { %1965 = vmatpush.bf16.msra.mxu0 %v3369_v35  ;;  %1978 = vmatpush.bf16.msrb.mxu2 %v3625_v36  ;;  %v4432_v35 = vld [vmem:[%s6697_s11 + $0x1f4] sm:$0xf0]  ;;  %v3764_v36 = vld [vmem:[%s6697_s11 + $0x50] sm:$0xf]  ;;  %v3909_v37 = vor.u32 %v4416_v33, %v3908_v39  ;;  %v3837_v46 = vor.u32 %v4398_v38, %v3836_v32 }
 0x7ae   : > { %v3973_v40 = vor.u32 %v4432_v35, %v3972_v34  ;;  %v3765_v57 = vor.u32 %v4380_v50, %v3764_v36  ;;  %v4448_v32 = vld [vmem:[%s6697_s11 + $0x274] sm:$0xf0]  ;;  %v4100_v38 = vld [vmem:[%s6697_s11 + $0x2f0] sm:$0xf] }
 0x7af   : > { %v4464_v39 = vld [vmem:[%s6697_s11 + $0x2f4] sm:$0xf0]  ;;  %v4084_v50 = vld [vmem:[%s6697_s11 + $0x2d0] sm:$0xf] }
 0x7b0   : > { %1940 = vmatpush.bf16.msra.mxu1 %v3333_v48  ;;  %1953 = vmatpush.bf16.msra.mxu3 %v3589_v49  ;;  %v3964_v48 = vld [vmem:[%s6697_s11 + $0x1e0] sm:$0xf]  ;;  %v4430_v49 = vld [vmem:[%s6697_s11 + $0x1e4] sm:$0xf0]  ;;  %v4101_v36 = vor.u32 %v4464_v39, %v4100_v38  ;;  %v3924_v17 = vld [vmem:[%s6697_s11 + $0x190] sm:$0xf] }
 0x7b1   : > { %1966 = vmatpush.bf16.msra.mxu0 %v3337_v52  ;;  %1979 = vmatpush.bf16.msrb.mxu2 %v3593_v53  ;;  %v4396_v52 = vld [vmem:[%s6697_s11 + $0xd4] sm:$0xf0]  ;;  %v3756_v53 = vld [vmem:[%s6697_s11 + $0x40] sm:$0xf]  ;;  %v3965_v55 = vor.u32 %v4430_v49, %v3964_v48  ;;  %v4020_v48 = vld [vmem:[%s6697_s11 + $0x250] sm:$0xf] }
 0x7b2   : > { %v3829_v58 = vor.u32 %v4396_v52, %v3828_v51  ;;  %v4444_v49 = vld [vmem:[%s6697_s11 + $0x254] sm:$0xf0]  ;;  %v4012_v52 = vld [vmem:[%s6697_s11 + $0x240] sm:$0xf] }
 0x7b3   : > { %v4460_v51 = vld [vmem:[%s6697_s11 + $0x2d4] sm:$0xf0]  ;;  %v3980_v39 = vld [vmem:[%s6697_s11 + $0x200] sm:$0xf] }
 0x7b4   : > { %1941 = vmatpush.bf16.msra.mxu1 %v3301_v60  ;;  %1954 = vmatpush.bf16.msra.mxu3 %v3557_v61  ;;  %v4378_v60 = vld [vmem:[%s6697_s11 + $0x44] sm:$0xf0]  ;;  %v3820_v61 = vld [vmem:[%s6697_s11 + $0xc0] sm:$0xf] }
 0x7b5   : > { %1967 = vmatpush.bf16.msra.mxu0 %v3305_v0  ;;  %1980 = vmatpush.bf16.msrb.mxu2 %v3561_v1  ;;  %v3757_v3 = vor.u32 %v4378_v60, %v3756_v53  ;;  %v3821_v5 = vor.u32 %v4394_v62, %v3820_v61  ;;  %v4442_v53 = vld [vmem:[%s6697_s11 + $0x244] sm:$0xf0] }
 0x7b6   : > { %v4013_v62 = vor.u32 %v4442_v53, %v4012_v52  ;;  %v4220_v53 = vld [vmem:[%s6697_s11 + $0x3e0] sm:$0xf] }
 0x7b8   : > { %1942 = vmatpush.bf16.msra.mxu1 %v3269_v9  ;;  %1955 = vmatpush.bf16.msra.mxu3 %v3525_v10  ;;  %v4376_v9 = vld [vmem:[%s6697_s11 + $0x34] sm:$0xf0]  ;;  %v3812_v10 = vld [vmem:[%s6697_s11 + $0xb0] sm:$0xf] }
 0x7b9   : > { %1968 = vmatpush.bf16.msra.mxu0 %v3273_v14  ;;  %1981 = vmatpush.bf16.msrb.mxu2 %v3529_v41  ;;  %v3749_v14 = vor.u32 %v4376_v9, %v3748_v63  ;;  %v3813_v41 = vor.u32 %v4392_v11, %v3812_v10  ;;  %v4422_v9 = vld [vmem:[%s6697_s11 + $0x1a4] sm:$0xf0] }
 0x7bc   : > { %1943 = vmatpush.bf16.msra.mxu1 %v3237_v26  ;;  %1956 = vmatpush.bf16.msra.mxu3 %v3493_v43  ;;  %v4388_v26 = vld [vmem:[%s6697_s11 + $0x94] sm:$0xf0]  ;;  %v3733_v43 = vor.u32 %v4372_v21, %v3732_v20  ;;  %v3988_v20 = vld [vmem:[%s6697_s11 + $0x210] sm:$0xf] }
 0x7bd   : > { %1969 = vmatpush.bf16.msra.mxu0 %v3241_v27  ;;  %1982 = vmatpush.bf16.msrb.mxu2 %v3497_v28  ;;  %v3797_v27 = vor.u32 %v4388_v26, %v3796_v24  ;;  %v3724_v28 = vld [vmem:[%s6697_s11] sm:$0xf] }
 0x7be   : > { %v3725_v33 = vor.u32 %v4370_v29, %v3724_v28  ;;  %v4452_v28 = vld [vmem:[%s6697_s11 + $0x294] sm:$0xf0]  ;;  %v3852_v29 = vld [vmem:[%s6697_s11 + $0x100] sm:$0xf] }
 0x7bf   : > { %1944 = vmatmul.bf16.vlgmr.msra.gmra.mxu1 %v5416_v22  ;;  %1957 = vmatmul.bf16.vlgmr.msra.gmra.mxu3 %v5418_v23 }
 0x7c0   : > { %2778 = vmatpush.bf16.msrb.mxu1 %v3781_v30  ;;  %2791 = vmatpush.bf16.msrb.mxu3 %v3845_v31  ;;  %v4386_v30 = vld [vmem:[%s6697_s11 + $0x84] sm:$0xf0]  ;;  %v4036_v31 = vld [vmem:[%s6697_s11 + $0x270] sm:$0xf] }
 0x7c1   : > { %1970 = vmatmul.bf16.vlgmr.msra.gmra.mxu0 %v5416_v22  ;;  %1983 = vmatmul.bf16.vlgmr.msrb.gmra.mxu2 %v5418_v23  ;;  %v4412_v22 = vld [vmem:[%s6697_s11 + $0x154] sm:$0xf0]  ;;  %v3956_v23 = vld [vmem:[%s6697_s11 + $0x1d0] sm:$0xf]  ;;  %v3789_v34 = vor.u32 %v4386_v30, %v3788_v4  ;;  %v4037_v35 = vor.u32 %v4448_v32, %v4036_v31  ;;  %v4402_v4 = vld [vmem:[%s6697_s11 + $0x104] sm:$0xf0] }
 0x7c2   : > { %2804 = vmatpush.bf16.msrb.mxu0 %v3909_v37  ;;  %2817 = vmatpush.bf16.msra.mxu2 %v3973_v40  ;;  %v3893_v0 = vor.u32 %v4412_v22, %v3892_v56  ;;  %v3957_v1 = vor.u32 %v4428_v59, %v3956_v23  ;;  %v4028_v37 = vld [vmem:[%s6697_s11 + $0x260] sm:$0xf]  ;;  %v4446_v40 = vld [vmem:[%s6697_s11 + $0x264] sm:$0xf0]  ;;  %v4408_v22 = vld [vmem:[%s6697_s11 + $0x134] sm:$0xf0]  ;;  %v3853_v31 = vor.u32 %v4402_v4, %v3852_v29 }
 0x7c3   : > { %v4076_v56 = vld [vmem:[%s6697_s11 + $0x2c0] sm:$0xf]  ;;  %v3940_v23 = vld [vmem:[%s6697_s11 + $0x1b0] sm:$0xf]  ;;  %v4424_v59 = vld [vmem:[%s6697_s11 + $0x1b4] sm:$0xf0] }
 0x7c4   : > { %2779 = vmatpush.bf16.msrb.mxu1 %v3773_v45  ;;  %2792 = vmatpush.bf16.msrb.mxu3 %v3837_v46  ;;  %v4462_v45 = vld [vmem:[%s6697_s11 + $0x2e4] sm:$0xf0]  ;;  %v4029_v46 = vor.u32 %v4446_v40, %v4028_v37  ;;  %v3941_v61 = vor.u32 %v4424_v59, %v3940_v23  ;;  %v3916_v30 = vld [vmem:[%s6697_s11 + $0x180] sm:$0xf]  ;;  %v4164_v40 = vld [vmem:[%s6697_s11 + $0x370] sm:$0xf] }
 0x7c5   : > { %v4093_v47 = vor.u32 %v4462_v45, %v4092_v44  ;;  %v4418_v32 = vld [vmem:[%s6697_s11 + $0x184] sm:$0xf0]  ;;  %v4480_v44 = vld [vmem:[%s6697_s11 + $0x374] sm:$0xf0]  ;;  %v4228_v45 = vld [vmem:[%s6697_s11 + $0x3f0] sm:$0xf] }
 0x7c6   : > { %2805 = vmatpush.bf16.msrb.mxu0 %v3901_v54  ;;  %2818 = vmatpush.bf16.msra.mxu2 %v3965_v55  ;;  %v4021_v54 = vor.u32 %v4444_v49, %v4020_v48  ;;  %v4085_v55 = vor.u32 %v4460_v51, %v4084_v50  ;;  %v3917_v38 = vor.u32 %v4418_v32, %v3916_v30  ;;  %v4450_v37 = vld [vmem:[%s6697_s11 + $0x284] sm:$0xf0]  ;;  %v4156_v49 = vld [vmem:[%s6697_s11 + $0x360] sm:$0xf]  ;;  %v4492_v23 = vld [vmem:[%s6697_s11 + $0x3d4] sm:$0xf0] }
 0x7c7   : > { %v4478_v50 = vld [vmem:[%s6697_s11 + $0x364] sm:$0xf0]  ;;  %v4399_v4 = vld [vmem:[%s6697_s11 + $0xf4] sm:$0xf]  ;;  %v3846_v30 = vld [vmem:[%s6697_s11 + $0xf8] sm:$0xf0] }
 0x7c8   : > { %2780 = vmatpush.bf16.msrb.mxu1 %v3765_v57  ;;  %2793 = vmatpush.bf16.msrb.mxu3 %v3829_v58  ;;  %v4458_v57 = vld [vmem:[%s6697_s11 + $0x2c4] sm:$0xf0]  ;;  %v3876_v58 = vld [vmem:[%s6697_s11 + $0x130] sm:$0xf] }
 0x7c9   : > { %v3877_v60 = vor.u32 %v4408_v22, %v3876_v58  ;;  %v4077_v63 = vor.u32 %v4458_v57, %v4076_v56  ;;  %v4148_v57 = vld [vmem:[%s6697_s11 + $0x350] sm:$0xf]  ;;  %v4476_v58 = vld [vmem:[%s6697_s11 + $0x354] sm:$0xf0] }
 0x7ca   : > { %2806 = vmatpush.bf16.msrb.mxu0 %v3893_v0  ;;  %2819 = vmatpush.bf16.msra.mxu2 %v3957_v1  ;;  %v4004_v0 = vld [vmem:[%s6697_s11 + $0x230] sm:$0xf]  ;;  %v4440_v1 = vld [vmem:[%s6697_s11 + $0x234] sm:$0xf0]  ;;  %v4149_v59 = vor.u32 %v4476_v58, %v4148_v57 }
 0x7cb   : > { %v4005_v10 = vor.u32 %v4440_v1, %v4004_v0  ;;  %v4212_v22 = vld [vmem:[%s6697_s11 + $0x3d0] sm:$0xf]  ;;  %v6132_v0 = vld [vmem:[%s6696_s10] sm:$0xff]  ;;  %v4490_v1 = vld [vmem:[%s6697_s11 + $0x3c4] sm:$0xf0] }
 0x7cc   : > { %2781 = vmatpush.bf16.msrb.mxu1 %v3757_v3  ;;  %2794 = vmatpush.bf16.msrb.mxu3 %v3821_v5  ;;  %v4456_v3 = vld [vmem:[%s6697_s11 + $0x2b4] sm:$0xf0]  ;;  %v3868_v5 = vld [vmem:[%s6697_s11 + $0x120] sm:$0xf] }
 0x7cd   : > { %v3869_v8 = vor.u32 %v4406_v6, %v3868_v5  ;;  %v4069_v11 = vor.u32 %v4456_v3, %v4068_v2  ;;  %v1764_v5 = vperm.slane %v6132_v0, 0 }
 0x7ce   : > { %2807 = vmatpush.bf16.msrb.mxu0 %v3885_v12  ;;  %2820 = vmatpush.bf16.msra.mxu2 %v3949_v13  ;;  %v3933_v12 = vor.u32 %v4422_v9, %v3932_v7  ;;  %v3996_v13 = vld [vmem:[%s6697_s11 + $0x220] sm:$0xf]  ;;  %v4472_v9 = vld [vmem:[%s6697_s11 + $0x334] sm:$0xf0] }
 0x7d0   : > { %2782 = vmatpush.bf16.msrb.mxu1 %v3749_v14  ;;  %2795 = vmatpush.bf16.msrb.mxu3 %v3813_v41  ;;  %v4438_v14 = vld [vmem:[%s6697_s11 + $0x224] sm:$0xf0]  ;;  %v4060_v41 = vld [vmem:[%s6697_s11 + $0x2a0] sm:$0xf] }
 0x7d1   : > { %v3997_v21 = vor.u32 %v4438_v14, %v3996_v13  ;;  %v4061_v24 = vor.u32 %v4454_v42, %v4060_v41  ;;  %v4124_v41 = vld [vmem:[%s6697_s11 + $0x320] sm:$0xf]  ;;  %v4470_v42 = vld [vmem:[%s6697_s11 + $0x324] sm:$0xf0] }
 0x7d2   : > { %2808 = vmatpush.bf16.msrb.mxu0 %v3877_v60  ;;  %2821 = vmatpush.bf16.msra.mxu2 %v3941_v61  ;;  %v4213_v60 = vor.u32 %v4492_v23, %v4212_v22  ;;  %v4140_v61 = vld [vmem:[%s6697_s11 + $0x340] sm:$0xf]  ;;  %v4379_v22 = vld [vmem:[%s6697_s11 + $0x54] sm:$0xf]  ;;  %v3766_v23 = vld [vmem:[%s6697_s11 + $0x58] sm:$0xf0] }
 0x7d4   : > { %2783 = vmatpush.bf16.msrb.mxu1 %v3741_v18  ;;  %2796 = vmatpush.bf16.msrb.mxu3 %v3805_v19  ;;  %v3861_v18 = vor.u32 %v4404_v16, %v3860_v15  ;;  %v4420_v19 = vld [vmem:[%s6697_s11 + $0x194] sm:$0xf0]  ;;  %v4188_v15 = vld [vmem:[%s6697_s11 + $0x3a0] sm:$0xf] }
 0x7d5   : > { %v3925_v26 = vor.u32 %v4420_v19, %v3924_v17  ;;  %v4486_v17 = vld [vmem:[%s6697_s11 + $0x3a4] sm:$0xf0] }
 0x7d6   : > { %2809 = vmatpush.bf16.msrb.mxu0 %v3869_v8  ;;  %2822 = vmatpush.bf16.msra.mxu2 %v3933_v12  ;;  %v4132_v8 = vld [vmem:[%s6697_s11 + $0x330] sm:$0xf]  ;;  %v4488_v12 = vld [vmem:[%s6697_s11 + $0x3b4] sm:$0xf0] }
 0x7d7   : > { %v4133_v13 = vor.u32 %v4472_v9, %v4132_v8  ;;  %v3758_v8 = vld [vmem:[%s6697_s11 + $0x48] sm:$0xf0]  ;;  %v4393_v9 = vld [vmem:[%s6697_s11 + $0xc4] sm:$0xf] }
 0x7d8   : > { %2784 = vmatpush.bf16.msrb.mxu1 %v3733_v43  ;;  %2797 = vmatpush.bf16.msrb.mxu3 %v3797_v27  ;;  %v4436_v43 = vld [vmem:[%s6697_s11 + $0x214] sm:$0xf0]  ;;  %v4052_v27 = vld [vmem:[%s6697_s11 + $0x290] sm:$0xf] }
 0x7da   : > { %2810 = vmatpush.bf16.msrb.mxu0 %v3861_v18  ;;  %2823 = vmatpush.bf16.msra.mxu2 %v3925_v26  ;;  %v3782_v26 = vld [vmem:[%s6697_s11 + $0x78] sm:$0xf0] }
 0x7dc   : > { %2785 = vmatpush.bf16.msrb.mxu1 %v3725_v33  ;;  %2798 = vmatpush.bf16.msrb.mxu3 %v3789_v34  ;;  %v4434_v33 = vld [vmem:[%s6697_s11 + $0x204] sm:$0xf0]  ;;  %v3989_v34 = vor.u32 %v4436_v43, %v3988_v20  ;;  %v4125_v43 = vor.u32 %v4470_v42, %v4124_v41 }
 0x7dd   : > { %v3981_v51 = vor.u32 %v4434_v33, %v3980_v39  ;;  %v4468_v39 = vld [vmem:[%s6697_s11 + $0x314] sm:$0xf0] }
 0x7de   : > { %2811 = vmatpush.bf16.msrb.mxu0 %v3853_v31  ;;  %2824 = vmatpush.bf16.msra.mxu2 %v3917_v38  ;;  %v4116_v38 = vld [vmem:[%s6697_s11 + $0x310] sm:$0xf] }
 0x7e0   : > { %2830 = vmatpush.bf16.msra.mxu1 %v4037_v35  ;;  %2843 = vmatpush.bf16.msra.mxu3 %v4101_v36  ;;  %v4053_v35 = vor.u32 %v4452_v28, %v4052_v27  ;;  %v4044_v36 = vld [vmem:[%s6697_s11 + $0x280] sm:$0xf]  ;;  %v4189_v27 = vor.u32 %v4486_v17, %v4188_v15  ;;  %v3750_v17 = vld [vmem:[%s6697_s11 + $0x38] sm:$0xf0] }
 0x7e1   : > { %v4045_v52 = vor.u32 %v4450_v37, %v4044_v36  ;;  %v4484_v36 = vld [vmem:[%s6697_s11 + $0x394] sm:$0xf0] }
 0x7e4   : > { %2831 = vmatpush.bf16.msra.mxu1 %v4029_v46  ;;  %2844 = vmatpush.bf16.msra.mxu3 %v4093_v47  ;;  %v4496_v46 = vld [vmem:[%s6697_s11 + $0x3f4] sm:$0xf0]  ;;  %v4165_v47 = vor.u32 %v4480_v44, %v4164_v40  ;;  %v3849_v40 = vor.u32 %v4399_v4, %v3846_v30  ;;  %v4381_v44 = vld [vmem:[%s6697_s11 + $0x64] sm:$0xf] }
 0x7e5   : > { %v4229_v48 = vor.u32 %v4496_v46, %v4228_v45  ;;  %v3774_v45 = vld [vmem:[%s6697_s11 + $0x68] sm:$0xf0]  ;;  %v4117_v46 = vor.u32 %v4468_v39, %v4116_v38  ;;  %v4373_v38 = vld [vmem:[%s6697_s11 + $0x24] sm:$0xf] }
 0x7e6   : > { %2856 = vmatpush.bf16.msra.mxu0 %v4165_v47  ;;  %v3742_v39 = vld [vmem:[%s6697_s11 + $0x28] sm:$0xf0] }
 0x7e7   : > { %2869 = vmatpush.bf16.msrb.mxu2 %v4229_v48  ;;  %v4397_v48 = vld [vmem:[%s6697_s11 + $0xe4] sm:$0xf] }
 0x7e8   : > { %2832 = vmatpush.bf16.msra.mxu1 %v4021_v54  ;;  %2845 = vmatpush.bf16.msra.mxu3 %v4085_v55  ;;  %v4494_v54 = vld [vmem:[%s6697_s11 + $0x3e4] sm:$0xf0]  ;;  %v4157_v55 = vor.u32 %v4478_v50, %v4156_v49  ;;  %v3838_v49 = vld [vmem:[%s6697_s11 + $0xe8] sm:$0xf0] }
 0x7e9   : > { %v4221_v56 = vor.u32 %v4494_v54, %v4220_v53  ;;  %v4172_v53 = vld [vmem:[%s6697_s11 + $0x380] sm:$0xf]  ;;  %v3841_v58 = vor.u32 %v4397_v48, %v3838_v49  ;;  %v3966_v48 = vld [vmem:[%s6697_s11 + $0x1e8] sm:$0xf0] }
 0x7ea   : > { %2857 = vmatpush.bf16.msra.mxu0 %v4157_v55  ;;  %v3777_v55 = vor.u32 %v4381_v44, %v3774_v45  ;;  %v4413_v44 = vld [vmem:[%s6697_s11 + $0x164] sm:$0xf]  ;;  %v3902_v45 = vld [vmem:[%s6697_s11 + $0x168] sm:$0xf0] }
 0x7eb   : > { %2870 = vmatpush.bf16.msrb.mxu2 %v4221_v56  ;;  %v4482_v56 = vld [vmem:[%s6697_s11 + $0x384] sm:$0xf0] }
 0x7ec   : > { %2833 = vmatpush.bf16.msra.mxu1 %v4013_v62  ;;  %2846 = vmatpush.bf16.msra.mxu3 %v4077_v63  ;;  %v4474_v62 = vld [vmem:[%s6697_s11 + $0x344] sm:$0xf0]  ;;  %v4204_v63 = vld [vmem:[%s6697_s11 + $0x3c0] sm:$0xf] }
 0x7ed   : > { %v4141_v2 = vor.u32 %v4474_v62, %v4140_v61  ;;  %v4205_v3 = vor.u32 %v4490_v1, %v4204_v63  ;;  %v4395_v61 = vld [vmem:[%s6697_s11 + $0xd4] sm:$0xf]  ;;  %v3830_v62 = vld [vmem:[%s6697_s11 + $0xd8] sm:$0xf0]  ;;  %v4173_v63 = vor.u32 %v4482_v56, %v4172_v53  ;;  %v1766_v1 = vperm.slane %v6132_v0, 2 }
 0x7ee   : > { %2858 = vmatpush.bf16.msra.mxu0 %v4149_v59  ;;  %v4371_v53 = vld [vmem:[%s6697_s11 + $0x14] sm:$0xf]  ;;  %v3905_v56 = vor.u32 %v4413_v44, %v3902_v45  ;;  %v4405_v44 = vld [vmem:[%s6697_s11 + $0x124] sm:$0xf]  ;;  %v3870_v45 = vld [vmem:[%s6697_s11 + $0x128] sm:$0xf0] }
 0x7ef   : > { %2871 = vmatpush.bf16.msrb.mxu2 %v4213_v60 }
 0x7f0   : > { %2834 = vmatpush.bf16.msra.mxu1 %v4005_v10  ;;  %2847 = vmatpush.bf16.msra.mxu3 %v4069_v11  ;;  %v4196_v10 = vld [vmem:[%s6697_s11 + $0x3b0] sm:$0xf]  ;;  %v1765_v11 = vperm.slane %v6132_v0, 1 }
 0x7f1   : > { %v4197_v14 = vor.u32 %v4488_v12, %v4196_v10  ;;  %v3822_v10 = vld [vmem:[%s6697_s11 + $0xc8] sm:$0xf0] }
 0x7f2   : > { %2859 = vmatpush.bf16.msra.mxu0 %v4141_v2  ;;  %v3825_v15 = vor.u32 %v4393_v9, %v3822_v10  ;;  %v3790_v9 = vld [vmem:[%s6697_s11 + $0x88] sm:$0xf0] }
 0x7f3   : > { %2872 = vmatpush.bf16.msrb.mxu2 %v4205_v3  ;;  %v1767_v3 = vperm.slane %v6132_v0, 3 }
 0x7f4   : > { %2835 = vmatpush.bf16.msra.mxu1 %v3997_v21  ;;  %2848 = vmatpush.bf16.msra.mxu3 %v4061_v24  ;;  %v4383_v24 = vld [vmem:[%s6697_s11 + $0x74] sm:$0xf] }
 0x7f6   : > { %2860 = vmatpush.bf16.msra.mxu0 %v4133_v13 }
 0x7f7   : > { %2873 = vmatpush.bf16.msrb.mxu2 %v4197_v14 }
 0x7f8   : > { %2836 = vmatpush.bf16.msra.mxu1 %v3989_v34  ;;  %2849 = vmatpush.bf16.msra.mxu3 %v4053_v35  ;;  %v3785_v34 = vor.u32 %v4383_v24, %v3782_v26  ;;  %v4180_v35 = vld [vmem:[%s6697_s11 + $0x390] sm:$0xf]  ;;  %v4415_v24 = vld [vmem:[%s6697_s11 + $0x174] sm:$0xf]  ;;  %v3910_v26 = vld [vmem:[%s6697_s11 + $0x178] sm:$0xf0] }
 0x7f9   : > { %v4181_v50 = vor.u32 %v4484_v36, %v4180_v35  ;;  %v3806_v36 = vld [vmem:[%s6697_s11 + $0xa8] sm:$0xf0] }
 0x7fa   : > { %2861 = vmatpush.bf16.msra.mxu0 %v4125_v43 }
 0x7fb   : > { %v1789_v6 = vpop.f32.mrf.mxu1  ;;  %2874 = vmatpush.bf16.msrb.mxu2 %v4189_v27 }
 0x7fc   : > { %2837 = vmatpush.bf16.msra.mxu1 %v3981_v51  ;;  %2850 = vmatpush.bf16.msra.mxu3 %v4045_v52  ;;  %v1815_v7 = vpop.f32.mrf.mxu0  ;;  %v1790_v16 = vadd.f32 %v1789_v6, %v1764_v5  ;;  %v4108_v51 = vld [vmem:[%s6697_s11 + $0x300] sm:$0xf]  ;;  %v4466_v52 = vld [vmem:[%s6697_s11 + $0x304] sm:$0xf0]  ;;  %v3769_v5 = vor.u32 %v4379_v22, %v3766_v23  ;;  %v3833_v6 = vor.u32 %v4395_v61, %v3830_v62  ;;  %v4411_v22 = vld [vmem:[%s6697_s11 + $0x154] sm:$0xf] }
 0x7fd   : > { %v1816_v18 = vadd.f32 %v1815_v7, %v1765_v11  ;;  %v4109_v59 = vor.u32 %v4466_v52, %v4108_v51  ;;  %v4377_v7 = vld [vmem:[%s6697_s11 + $0x44] sm:$0xf]  ;;  %v3894_v23 = vld [vmem:[%s6697_s11 + $0x158] sm:$0xf0]  ;;  %v1768_v61 = vperm.slane %v6132_v0, 4 }
 0x7fe   : > { %2862 = vmatpush.bf16.msra.mxu0 %v4117_v46  ;;  %v3761_v14 = vor.u32 %v4377_v7, %v3758_v8  ;;  %v4429_v46 = vld [vmem:[%s6697_s11 + $0x1e4] sm:$0xf]  ;;  %v3897_v8 = vor.u32 %v4411_v22, %v3894_v23  ;;  %v4403_v23 = vld [vmem:[%s6697_s11 + $0x114] sm:$0xf] }
 0x7ff   : > { %2875 = vmatpush.bf16.msrb.mxu2 %v4181_v50  ;;  %v3745_v50 = vor.u32 %v4373_v38, %v3742_v39  ;;  %v4385_v7 = vld [vmem:[%s6697_s11 + $0x84] sm:$0xf]  ;;  %v3942_v38 = vld [vmem:[%s6697_s11 + $0x1b8] sm:$0xf0] }
 0x801   : > { %v1802_v19 = vpop.f32.mrf.mxu3 }
 0x802   : > { %v1803_v20 = vadd.f32 %v1802_v19, %v1790_v16  ;;  %v1828_v21 = vpop.f32.mrf.mxu2  ;;  %2863 = vmatpush.bf16.msra.mxu0 %v4109_v59  ;;  %v4375_v16 = vld [vmem:[%s6697_s11 + $0x34] sm:$0xf] }
 0x803   : > { %v1829_v28 = vadd.f32 %v1828_v21, %v1816_v18  ;;  %v1791_v29 = vpop.f32.mrf.mxu1  ;;  %2876 = vmatpush.bf16.msrb.mxu2 %v4173_v63  ;;  %v4391_v18 = vld [vmem:[%s6697_s11 + $0xb4] sm:$0xf]  ;;  %v3814_v21 = vld [vmem:[%s6697_s11 + $0xb8] sm:$0xf0]  ;;  %v3753_v30 = vor.u32 %v4375_v16, %v3750_v17  ;;  %v1769_v63 = vperm.slane %v6132_v0, 5 }
 0x804   : > { %v1988_v31 = vmax.f32 %v1803_v20, 0.0  ;;  %v1817_v32 = vpop.f32.mrf.mxu0  ;;  %v3974_v29 = vld [vmem:[%s6697_s11 + $0x1f8] sm:$0xf0]  ;;  %v4427_v59 = vld [vmem:[%s6697_s11 + $0x1d4] sm:$0xf] }
 0x805   : > { %v1989_v33 = vmax.f32 %v1829_v28, 0.0  ;;  %v4431_v28 = vld [vmem:[%s6697_s11 + $0x1f4] sm:$0xf]  ;;  %v3817_v32 = vor.u32 %v4391_v18, %v3814_v21  ;;  %v3878_v21 = vld [vmem:[%s6697_s11 + $0x138] sm:$0xf0] }
 0x806   : > { %v6187_v37 = vpack.c.bf16 %v1988_v31, %v1988_v31 }
 0x807   : > { %v6195_v47 = vpack.c.bf16 %v1989_v33, %v1989_v33  ;;  %v4389_v33 = vld [vmem:[%s6697_s11 + $0xa4] sm:$0xf] }
 0x808   : > { %2786 = vmatmul.bf16.vlgmr.msrb.gmra.mxu1 %v6187_v37  ;;  %v3809_v52 = vor.u32 %v4389_v33, %v3806_v36 }
 0x809   : > { %2799 = vmatmul.bf16.vlgmr.msrb.gmra.mxu3 %v6195_v47  ;;  %v1804_v54 = vpop.f32.mrf.mxu3  ;;  %2882 = vmatpush.bf16.msrb.mxu1 %v3785_v34  ;;  %v3913_v34 = vor.u32 %v4415_v24, %v3910_v26 }
 0x80a   : > { %v1830_v57 = vpop.f32.mrf.mxu2  ;;  %2895 = vmatpush.bf16.msrb.mxu3 %v3849_v40  ;;  %v3977_v40 = vor.u32 %v4431_v28, %v3974_v29  ;;  %v3734_v54 = vld [vmem:[%s6697_s11 + $0x18] sm:$0xf0]  ;;  %v4463_v28 = vld [vmem:[%s6697_s11 + $0x2f4] sm:$0xf] }
 0x80b   : > { %v1841_v60 = vpop.f32.mrf.mxu1  ;;  %v3798_v57 = vld [vmem:[%s6697_s11 + $0x98] sm:$0xf0] }
 0x80c   : > { %v1867_v2 = vpop.f32.mrf.mxu0  ;;  %v1842_v11 = vadd.f32 %v1841_v60, %v1766_v1  ;;  %v3958_v60 = vld [vmem:[%s6697_s11 + $0x1d8] sm:$0xf0]  ;;  %v3737_v1 = vor.u32 %v4371_v53, %v3734_v54  ;;  %v4094_v54 = vld [vmem:[%s6697_s11 + $0x2e8] sm:$0xf0] }
 0x80d   : > { %2883 = vmatpush.bf16.msrb.mxu1 %v3777_v55  ;;  %v1868_v12 = vadd.f32 %v1867_v2, %v1767_v3  ;;  %v4387_v55 = vld [vmem:[%s6697_s11 + $0x94] sm:$0xf]  ;;  %v3961_v10 = vor.u32 %v4427_v59, %v3958_v60  ;;  %v3862_v59 = vld [vmem:[%s6697_s11 + $0x118] sm:$0xf0] }
 0x80e   : > { %2896 = vmatpush.bf16.msrb.mxu3 %v3841_v58  ;;  %v3969_v58 = vor.u32 %v4429_v46, %v3966_v48  ;;  %v3801_v3 = vor.u32 %v4387_v55, %v3798_v57  ;;  %v4421_v55 = vld [vmem:[%s6697_s11 + $0x1a4] sm:$0xf]  ;;  %v3873_v57 = vor.u32 %v4405_v44, %v3870_v45  ;;  %v4435_v44 = vld [vmem:[%s6697_s11 + $0x214] sm:$0xf]  ;;  %v3990_v45 = vld [vmem:[%s6697_s11 + $0x218] sm:$0xf0] }
 0x811   : > { %v1854_v13 = vpop.f32.mrf.mxu3  ;;  %2884 = vmatpush.bf16.msrb.mxu1 %v3769_v5  ;;  %v4369_v5 = vld [vmem:[%s6697_s11 + $0x4] sm:$0xf] }
 0x812   : > { %v1855_v41 = vadd.f32 %v1854_v13, %v1842_v11  ;;  %v1880_v42 = vpop.f32.mrf.mxu2  ;;  %2897 = vmatpush.bf16.msrb.mxu3 %v3833_v6  ;;  %v3726_v6 = vld [vmem:[%s6697_s11 + $0x8] sm:$0xf0]  ;;  %v4409_v11 = vld [vmem:[%s6697_s11 + $0x144] sm:$0xf] }
 0x813   : > { %v1881_v19 = vadd.f32 %v1880_v42, %v1868_v12  ;;  %v1843_v20 = vpop.f32.mrf.mxu1  ;;  %v3886_v12 = vld [vmem:[%s6697_s11 + $0x148] sm:$0xf0]  ;;  %v4425_v13 = vld [vmem:[%s6697_s11 + $0x1c4] sm:$0xf] }
 0x814   : > { %v1990_v43 = vmax.f32 %v1855_v41, 0.0  ;;  %v1869_v27 = vpop.f32.mrf.mxu0  ;;  %v3729_v41 = vor.u32 %v4369_v5, %v3726_v6  ;;  %v3889_v16 = vor.u32 %v4409_v11, %v3886_v12  ;;  %v4407_v20 = vld [vmem:[%s6697_s11 + $0x134] sm:$0xf]  ;;  %v3926_v6 = vld [vmem:[%s6697_s11 + $0x198] sm:$0xf0] }
 0x815   : > { %v1991_v4 = vmax.f32 %v1881_v19, 0.0  ;;  %2885 = vmatpush.bf16.msrb.mxu1 %v3761_v14  ;;  %v3950_v14 = vld [vmem:[%s6697_s11 + $0x1c8] sm:$0xf0]  ;;  %v4038_v27 = vld [vmem:[%s6697_s11 + $0x278] sm:$0xf0] }
 0x816   : > { %v6267_v31 = vpack.c.bf16 %v1990_v43, %v1990_v43  ;;  %2898 = vmatpush.bf16.msrb.mxu3 %v3825_v15  ;;  %v3793_v15 = vor.u32 %v4385_v7, %v3790_v9  ;;  %v3953_v19 = vor.u32 %v4425_v13, %v3950_v14  ;;  %v4447_v43 = vld [vmem:[%s6697_s11 + $0x274] sm:$0xf]  ;;  %v3865_v7 = vor.u32 %v4403_v23, %v3862_v59  ;;  %v4401_v9 = vld [vmem:[%s6697_s11 + $0x104] sm:$0xf]  ;;  %v4014_v13 = vld [vmem:[%s6697_s11 + $0x248] sm:$0xf0] }
 0x817   : > { %v6278_v35 = vpack.c.bf16 %v1991_v4, %v1991_v4  ;;  %v4419_v5 = vld [vmem:[%s6697_s11 + $0x194] sm:$0xf]  ;;  %v4441_v12 = vld [vmem:[%s6697_s11 + $0x244] sm:$0xf] }
 0x818   : > { %2812 = vmatmul.bf16.vlgmr.msrb.gmra.mxu0 %v6267_v31  ;;  %v4457_v14 = vld [vmem:[%s6697_s11 + $0x2c4] sm:$0xf] }
 0x819   : > { %2825 = vmatmul.bf16.vlgmr.msra.gmra.mxu2 %v6278_v35  ;;  %v1856_v49 = vpop.f32.mrf.mxu3  ;;  %2886 = vmatpush.bf16.msrb.mxu1 %v3753_v30  ;;  %v4102_v30 = vld [vmem:[%s6697_s11 + $0x2f8] sm:$0xf0] }
 0x81a   : > { %v1882_v51 = vpop.f32.mrf.mxu2  ;;  %2899 = vmatpush.bf16.msrb.mxu3 %v3817_v32  ;;  %2908 = vmatpush.bf16.msrb.mxu0 %v3913_v34  ;;  %v4423_v32 = vld [vmem:[%s6697_s11 + $0x1b4] sm:$0xf]  ;;  %v3881_v34 = vor.u32 %v4407_v20, %v3878_v21  ;;  %v4105_v48 = vor.u32 %v4463_v28, %v4102_v30  ;;  %v4445_v49 = vld [vmem:[%s6697_s11 + $0x264] sm:$0xf]  ;;  %v4006_v21 = vld [vmem:[%s6697_s11 + $0x238] sm:$0xf0] }
 0x81b   : > { %2921 = vmatpush.bf16.msra.mxu2 %v3977_v40  ;;  %v4041_v40 = vor.u32 %v4447_v43, %v4038_v27  ;;  %v4461_v51 = vld [vmem:[%s6697_s11 + $0x2e4] sm:$0xf]  ;;  %v4439_v20 = vld [vmem:[%s6697_s11 + $0x234] sm:$0xf]  ;;  %v4070_v43 = vld [vmem:[%s6697_s11 + $0x2b8] sm:$0xf0] }
 0x81c   : > { %v1893_v62 = vpop.f32.mrf.mxu1  ;;  %v4009_v27 = vor.u32 %v4439_v20, %v4006_v21  ;;  %v4453_v30 = vld [vmem:[%s6697_s11 + $0x2a4] sm:$0xf] }
 0x81d   : > { %2887 = vmatpush.bf16.msrb.mxu1 %v3745_v50  ;;  %v1894_v42 = vadd.f32 %v1893_v62, %v1768_v61  ;;  %v4030_v50 = vld [vmem:[%s6697_s11 + $0x268] sm:$0xf0]  ;;  %v4097_v61 = vor.u32 %v4461_v51, %v4094_v54  ;;  %v4443_v62 = vld [vmem:[%s6697_s11 + $0x254] sm:$0xf] }
 0x81e   : > { %2900 = vmatpush.bf16.msrb.mxu3 %v3809_v52  ;;  %2909 = vmatpush.bf16.msrb.mxu0 %v3905_v56  ;;  %v3945_v52 = vor.u32 %v4423_v32, %v3942_v38  ;;  %v3934_v56 = vld [vmem:[%s6697_s11 + $0x1a8] sm:$0xf0]  ;;  %v4033_v22 = vor.u32 %v4445_v49, %v4030_v50 }
 0x81f   : > { %v1919_v2 = vpop.f32.mrf.mxu0  ;;  %2922 = vmatpush.bf16.msra.mxu2 %v3969_v58  ;;  %v4062_v32 = vld [vmem:[%s6697_s11 + $0x2a8] sm:$0xf0] }
 0x820   : > { %v1920_v17 = vadd.f32 %v1919_v2, %v1769_v63  ;;  %v4022_v63 = vld [vmem:[%s6697_s11 + $0x258] sm:$0xf0]  ;;  %v3937_v2 = vor.u32 %v4421_v55, %v3934_v56  ;;  %v3982_v54 = vld [vmem:[%s6697_s11 + $0x208] sm:$0xf0] }
 0x821   : > { %2888 = vmatpush.bf16.msrb.mxu1 %v3737_v1  ;;  %v4459_v1 = vld [vmem:[%s6697_s11 + $0x2d4] sm:$0xf] }
 0x822   : > { %2901 = vmatpush.bf16.msrb.mxu3 %v3801_v3  ;;  %2910 = vmatpush.bf16.msrb.mxu0 %v3897_v8  ;;  %v1906_v18 = vpop.f32.mrf.mxu3  ;;  %v4086_v3 = vld [vmem:[%s6697_s11 + $0x2d8] sm:$0xf0]  ;;  %v4025_v8 = vor.u32 %v4443_v62, %v4022_v63 }
 0x823   : > { %2923 = vmatpush.bf16.msra.mxu2 %v3961_v10  ;;  %v1907_v24 = vadd.f32 %v1906_v18, %v1894_v42  ;;  %v3854_v10 = vld [vmem:[%s6697_s11 + $0x108] sm:$0xf0]  ;;  %v4089_v11 = vor.u32 %v4459_v1, %v4086_v3  ;;  %v4017_v18 = vor.u32 %v4441_v12, %v4014_v13  ;;  %v4230_v62 = vld [vmem:[%s6697_s11 + $0x3f8] sm:$0xf0]  ;;  %v4493_v12 = vld [vmem:[%s6697_s11 + $0x3e4] sm:$0xf] }
 0x824   : > { %v1895_v4 = vpop.f32.mrf.mxu1  ;;  %v4078_v42 = vld [vmem:[%s6697_s11 + $0x2c8] sm:$0xf0] }
 0x825   : > { %v1932_v26 = vpop.f32.mrf.mxu2  ;;  %2889 = vmatpush.bf16.msrb.mxu1 %v3729_v41  ;;  %v1992_v39 = vmax.f32 %v1907_v24, 0.0  ;;  %v3929_v41 = vor.u32 %v4419_v5, %v3926_v6  ;;  %v3998_v4 = vld [vmem:[%s6697_s11 + $0x228] sm:$0xf0] }
 0x826   : > { %v1933_v29 = vadd.f32 %v1932_v26, %v1920_v17  ;;  %2902 = vmatpush.bf16.msrb.mxu3 %v3793_v15  ;;  %2911 = vmatpush.bf16.msrb.mxu0 %v3889_v16  ;;  %v4417_v15 = vld [vmem:[%s6697_s11 + $0x184] sm:$0xf]  ;;  %v3918_v16 = vld [vmem:[%s6697_s11 + $0x188] sm:$0xf0]  ;;  %v3857_v17 = vor.u32 %v4401_v9, %v3854_v10  ;;  %v4455_v26 = vld [vmem:[%s6697_s11 + $0x2b4] sm:$0xf] }
 0x827   : > { %v1921_v33 = vpop.f32.mrf.mxu0  ;;  %2924 = vmatpush.bf16.msra.mxu2 %v3953_v19  ;;  %v6377_v46 = vpack.c.bf16 %v1992_v39, %v1992_v39  ;;  %v4081_v19 = vor.u32 %v4457_v14, %v4078_v42  ;;  %v3921_v24 = vor.u32 %v4417_v15, %v3918_v16  ;;  %v4073_v28 = vor.u32 %v4455_v26, %v4070_v43  ;;  %v4477_v9 = vld [vmem:[%s6697_s11 + $0x364] sm:$0xf]  ;;  %v4222_v13 = vld [vmem:[%s6697_s11 + $0x3e8] sm:$0xf0]  ;;  %v4475_v16 = vld [vmem:[%s6697_s11 + $0x354] sm:$0xf] }
 0x828   : > { %v1993_v36 = vmax.f32 %v1933_v29, 0.0  ;;  %v4437_v29 = vld [vmem:[%s6697_s11 + $0x224] sm:$0xf]  ;;  %v1770_v39 = vperm.slane %v6132_v0, 6  ;;  %v4225_v15 = vor.u32 %v4493_v12, %v4222_v13 }
 0x829   : > { %2838 = vmatmul.bf16.vlgmr.msra.gmra.mxu1 %v6377_v46  ;;  %v4489_v26 = vld [vmem:[%s6697_s11 + $0x3c4] sm:$0xf] }
 0x82a   : > { %v6388_v53 = vpack.c.bf16 %v1993_v36, %v1993_v36  ;;  %2912 = vmatpush.bf16.msrb.mxu0 %v3881_v34  ;;  %v1908_v58 = vpop.f32.mrf.mxu3  ;;  %2934 = vmatpush.bf16.msra.mxu1 %v4041_v40  ;;  %v4001_v34 = vor.u32 %v4437_v29, %v3998_v4  ;;  %v1771_v36 = vperm.slane %v6132_v0, 7  ;;  %v4065_v40 = vor.u32 %v4453_v30, %v4062_v32  ;;  %v4134_v29 = vld [vmem:[%s6697_s11 + $0x338] sm:$0xf0]  ;;  %v4487_v4 = vld [vmem:[%s6697_s11 + $0x3b4] sm:$0xf] }
 0x82b   : > { %2925 = vmatpush.bf16.msra.mxu2 %v3945_v52  ;;  %v3993_v0 = vor.u32 %v4435_v44, %v3990_v45  ;;  %v4433_v52 = vld [vmem:[%s6697_s11 + $0x204] sm:$0xf]  ;;  %v4046_v58 = vld [vmem:[%s6697_s11 + $0x288] sm:$0xf0]  ;;  %v4198_v30 = vld [vmem:[%s6697_s11 + $0x3b8] sm:$0xf0] }
 0x82c   : > { %2851 = vmatmul.bf16.vlgmr.msra.gmra.mxu3 %v6388_v53  ;;  %v4467_v45 = vld [vmem:[%s6697_s11 + $0x314] sm:$0xf] }
 0x82d   : > { %v1934_v60 = vpop.f32.mrf.mxu2  ;;  %2947 = vmatpush.bf16.msra.mxu3 %v4105_v48 }
 0x82e   : > { %2913 = vmatpush.bf16.msrb.mxu0 %v3873_v57  ;;  %2935 = vmatpush.bf16.msra.mxu1 %v4033_v22  ;;  %v4449_v57 = vld [vmem:[%s6697_s11 + $0x284] sm:$0xf]  ;;  %v4479_v22 = vld [vmem:[%s6697_s11 + $0x374] sm:$0xf]  ;;  %v4166_v60 = vld [vmem:[%s6697_s11 + $0x378] sm:$0xf0] }
 0x82f   : > { %2926 = vmatpush.bf16.msra.mxu2 %v3937_v2  ;;  %v3985_v2 = vor.u32 %v4433_v52, %v3982_v54  ;;  %v4049_v5 = vor.u32 %v4449_v57, %v4046_v58 }
 0x831   : > { %2948 = vmatpush.bf16.msra.mxu3 %v4097_v61  ;;  %v4495_v61 = vld [vmem:[%s6697_s11 + $0x3f4] sm:$0xf] }
 0x832   : > { %2914 = vmatpush.bf16.msrb.mxu0 %v3865_v7  ;;  %2936 = vmatpush.bf16.msra.mxu1 %v4025_v8  ;;  %v4169_v7 = vor.u32 %v4479_v22, %v4166_v60  ;;  %v4233_v8 = vor.u32 %v4495_v61, %v4230_v62 }
 0x833   : > { %2927 = vmatpush.bf16.msra.mxu2 %v3929_v41 }
 0x835   : > { %2949 = vmatpush.bf16.msra.mxu3 %v4089_v11  ;;  %v4158_v11 = vld [vmem:[%s6697_s11 + $0x368] sm:$0xf0] }
 0x836   : > { %2915 = vmatpush.bf16.msrb.mxu0 %v3857_v17  ;;  %2937 = vmatpush.bf16.msra.mxu1 %v4017_v18  ;;  %v4161_v42 = vor.u32 %v4477_v9, %v4158_v11  ;;  %v4150_v17 = vld [vmem:[%s6697_s11 + $0x358] sm:$0xf0]  ;;  %v4491_v18 = vld [vmem:[%s6697_s11 + $0x3d4] sm:$0xf] }
 0x837   : > { %2928 = vmatpush.bf16.msra.mxu2 %v3921_v24  ;;  %v4153_v20 = vor.u32 %v4475_v16, %v4150_v17  ;;  %v4142_v24 = vld [vmem:[%s6697_s11 + $0x348] sm:$0xf0] }
 0x839   : > { %2950 = vmatpush.bf16.msra.mxu3 %v4081_v19  ;;  %2890 = vmatmul.bf16.vlgmr.msrb.gmra.mxu1 %v6187_v37  ;;  %v4451_v37 = vld [vmem:[%s6697_s11 + $0x294] sm:$0xf]  ;;  %v4214_v19 = vld [vmem:[%s6697_s11 + $0x3d8] sm:$0xf0] }
 0x83a   : > { %2938 = vmatpush.bf16.msra.mxu1 %v4009_v27  ;;  %v4217_v21 = vor.u32 %v4491_v18, %v4214_v19 }
 0x83c   : > { %v1945_v38 = vpop.f32.mrf.mxu1  ;;  %2903 = vmatmul.bf16.vlgmr.msrb.gmra.mxu3 %v6195_v47  ;;  %v4054_v47 = vld [vmem:[%s6697_s11 + $0x298] sm:$0xf0] }
 0x83d   : > { %2951 = vmatpush.bf16.msra.mxu3 %v4073_v28  ;;  %v1946_v48 = vadd.f32 %v1945_v38, %v1770_v39  ;;  %v4057_v51 = vor.u32 %v4451_v37, %v4054_v47  ;;  %v4471_v28 = vld [vmem:[%s6697_s11 + $0x334] sm:$0xf]  ;;  %v4201_v38 = vor.u32 %v4487_v4, %v4198_v30  ;;  %v4469_v39 = vld [vmem:[%s6697_s11 + $0x324] sm:$0xf]  ;;  %v4118_v37 = vld [vmem:[%s6697_s11 + $0x318] sm:$0xf0] }
 0x83e   : > { %v1971_v33 = vpop.f32.mrf.mxu0  ;;  %2939 = vmatpush.bf16.msra.mxu1 %v4001_v34  ;;  %v4137_v32 = vor.u32 %v4471_v28, %v4134_v29  ;;  %v4485_v34 = vld [vmem:[%s6697_s11 + $0x3a4] sm:$0xf]  ;;  %v4483_v47 = vld [vmem:[%s6697_s11 + $0x394] sm:$0xf] }
 0x83f   : > { %v1972_v49 = vadd.f32 %v1971_v33, %v1771_v36  ;;  %v4126_v33 = vld [vmem:[%s6697_s11 + $0x328] sm:$0xf0] }
 0x840   : > { %v4190_v36 = vld [vmem:[%s6697_s11 + $0x3a8] sm:$0xf0] }
 0x841   : > { %2952 = vmatpush.bf16.msra.mxu3 %v4065_v40  ;;  %v4129_v40 = vor.u32 %v4469_v39, %v4126_v33  ;;  %v4193_v44 = vor.u32 %v4485_v34, %v4190_v36 }
 0x842   : > { %v1958_v50 = vpop.f32.mrf.mxu3  ;;  %2940 = vmatpush.bf16.msra.mxu1 %v3993_v0  ;;  %v4465_v0 = vld [vmem:[%s6697_s11 + $0x304] sm:$0xf] }
 0x843   : > { %v1959_v55 = vadd.f32 %v1958_v50, %v1946_v48  ;;  %v4481_v50 = vld [vmem:[%s6697_s11 + $0x384] sm:$0xf] }
 0x844   : > { %v1984_v56 = vpop.f32.mrf.mxu2  ;;  %v1947_v59 = vpop.f32.mrf.mxu1 }
 0x845   : > { %v1985_v23 = vadd.f32 %v1984_v56, %v1972_v49  ;;  %v1994_v63 = vmax.f32 %v1959_v55, 0.0  ;;  %2953 = vmatpush.bf16.msra.mxu3 %v4057_v51  ;;  %v4110_v49 = vld [vmem:[%s6697_s11 + $0x308] sm:$0xf0] }
 0x846   : > { %v1973_v1 = vpop.f32.mrf.mxu0  ;;  %2941 = vmatpush.bf16.msra.mxu1 %v3985_v2  ;;  %v4174_v51 = vld [vmem:[%s6697_s11 + $0x388] sm:$0xf0]  ;;  %v4113_v52 = vor.u32 %v4465_v0, %v4110_v49  ;;  %v2132_v2 = vld [vmem:[%s6698_s12] sm:$0x3] }
 0x847   : > { %v1995_v3 = vmax.f32 %v1985_v23, 0.0  ;;  %v6513_v6 = vpack.c.bf16 %v1994_v63, %v1994_v63  ;;  %v4177_v54 = vor.u32 %v4481_v50, %v4174_v51  ;;  %v4585_v49 = vld [vmem:[#allocation1] sm:$0xff] }
 0x849   : > { %v6518_v10 = vpack.c.bf16 %v1995_v3, %v1995_v3  ;;  %2864 = vmatmul.bf16.vlgmr.msra.gmra.mxu0 %v6513_v6  ;;  %2954 = vmatpush.bf16.msra.mxu3 %v4049_v5  ;;  %v2774_v5 = vperm.slane %v2132_v2, 0 }
 0x84a   : > { %v1960_v14 = vpop.f32.mrf.mxu3  ;;  %2960 = vmatpush.bf16.msra.mxu0 %v4169_v7  ;;  %2942 = vmatmul.bf16.vlgmr.msra.gmra.mxu1 %v6377_v46  ;;  %v4473_v46 = vld [vmem:[%s6697_s11 + $0x344] sm:$0xf] }
 0x84b   : > { %2877 = vmatmul.bf16.vlgmr.msrb.gmra.mxu2 %v6518_v10  ;;  %v4145_v43 = vor.u32 %v4473_v46, %v4142_v24  ;;  %v2775_v24 = vperm.slane %v2132_v2, 1 }
 0x84c   : > { %v1986_v41 = vpop.f32.mrf.mxu2  ;;  %2973 = vmatpush.bf16.msrb.mxu2 %v4233_v8  ;;  %2955 = vmatmul.bf16.vlgmr.msra.gmra.mxu3 %v6388_v53  ;;  %v4206_v53 = vld [vmem:[%s6697_s11 + $0x3c8] sm:$0xf0] }
 0x84d   : > { %v4209_v27 = vor.u32 %v4489_v26, %v4206_v53 }
 0x84e   : > { %2961 = vmatpush.bf16.msra.mxu0 %v4161_v42 }
 0x850   : > { %2974 = vmatpush.bf16.msrb.mxu2 %v4225_v15 }
 0x852   : > { %2962 = vmatpush.bf16.msra.mxu0 %v4153_v20 }
 0x854   : > { %2975 = vmatpush.bf16.msrb.mxu2 %v4217_v21 }
 0x856   : > { %2963 = vmatpush.bf16.msra.mxu0 %v4145_v43 }
 0x858   : > { %2976 = vmatpush.bf16.msrb.mxu2 %v4209_v27 }
 0x859   : > { %2916 = vmatmul.bf16.vlgmr.msrb.gmra.mxu0 %v6267_v31  ;;  %v4182_v31 = vld [vmem:[%s6697_s11 + $0x398] sm:$0xf0] }
 0x85a   : > { %2964 = vmatpush.bf16.msra.mxu0 %v4137_v32  ;;  %v4185_v48 = vor.u32 %v4483_v47, %v4182_v31 }
 0x85b   : > { %2929 = vmatmul.bf16.vlgmr.msra.gmra.mxu2 %v6278_v35  ;;  %v4121_v35 = vor.u32 %v4467_v45, %v4118_v37 }
 0x85c   : > { %2977 = vmatpush.bf16.msrb.mxu2 %v4201_v38 }
 0x85e   : > { %2965 = vmatpush.bf16.msra.mxu0 %v4129_v40 }
 0x860   : > { %2978 = vmatpush.bf16.msrb.mxu2 %v4193_v44 }
 0x862   : > { %2966 = vmatpush.bf16.msra.mxu0 %v4121_v35 }
 0x864   : > { %2979 = vmatpush.bf16.msrb.mxu2 %v4185_v48 }
 0x866   : > { %2967 = vmatpush.bf16.msra.mxu0 %v4113_v52 }
 0x868   : > { %2980 = vmatpush.bf16.msrb.mxu2 %v4177_v54 }
 0x869   : > { %2968 = vmatmul.bf16.vlgmr.msra.gmra.mxu0 %v6513_v6 }
 0x86b   : > { %2981 = vmatmul.bf16.vlgmr.msrb.gmra.mxu2 %v6518_v10 }
 0x885   : > { %v2787_v55 = vpop.f32.mrf.mxu1 }
 0x886   : > { %v2788_v6 = vadd.f32 %v2787_v55, %v2774_v5 }
 0x88c   : > { %v2800_v56 = vpop.f32.mrf.mxu3 }
 0x88d   : > { %v2789_v57 = vpop.f32.mrf.mxu1  ;;  %v2801_v9 = vadd.f32 %v2800_v56, %v2788_v6 }
 0x894   : > { %v2802_v58 = vpop.f32.mrf.mxu3 }
 0x895   : > { %v2813_v22 = vpop.f32.mrf.mxu0 }
 0x896   : > { %v2814_v10 = vadd.f32 %v2813_v22, %v2801_v9 }
 0x89c   : > { %v2826_v23 = vpop.f32.mrf.mxu2 }
 0x89d   : > { %v2815_v59 = vpop.f32.mrf.mxu0  ;;  %v2827_v11 = vadd.f32 %v2826_v23, %v2814_v10 }
 0x8a4   : > { %v2828_v60 = vpop.f32.mrf.mxu2 }
 0x8a6   : > { %v2839_v61 = vpop.f32.mrf.mxu1 }
 0x8a7   : > { %v2840_v13 = vadd.f32 %v2839_v61, %v2827_v11 }
 0x8ae   : > { %v2841_v63 = vpop.f32.mrf.mxu1 }
 0x8af   : > { %v2852_v62 = vpop.f32.mrf.mxu3 }
 0x8b0   : > { %v2853_v42 = vadd.f32 %v2852_v62, %v2840_v13 }
 0x8b6   : > { %v2891_v3 = vpop.f32.mrf.mxu1 }
 0x8b7   : > { %v2854_v1 = vpop.f32.mrf.mxu3  ;;  %v2892_v53 = vadd.f32 %v2891_v3, %v2775_v24 }
 0x8be   : > { %v2893_v8 = vpop.f32.mrf.mxu1 }
 0x8bf   : > { %v2904_v7 = vpop.f32.mrf.mxu3 }
 0x8c0   : > { %v2905_v27 = vadd.f32 %v2904_v7, %v2892_v53 }
 0x8c6   : > { %v2865_v12 = vpop.f32.mrf.mxu0 }
 0x8c7   : > { %v2906_v14 = vpop.f32.mrf.mxu3  ;;  %v2943_v41 = vpop.f32.mrf.mxu1  ;;  %v2866_v15 = vadd.f32 %v2865_v12, %v2853_v42 }
 0x8ce   : > { %v2878_v16 = vpop.f32.mrf.mxu2  ;;  %v2867_v18 = vpop.f32.mrf.mxu0 }
 0x8cf   : > { %v2879_v17 = vadd.f32 %v2878_v16, %v2866_v15  ;;  %v2956_v19 = vpop.f32.mrf.mxu3  ;;  %v2945_v20 = vpop.f32.mrf.mxu1 }
 0x8d1   : > { %2987 = vst.msk [vmem:[#allocation3] sm:$0x1] %vm2986_vm1, %v2879_v17  ;;  %2997 = vrot.lane.b32.xlu0 %v2879_v17, %s6739_s24  ;;  %2993 = vrot.lane.b32.xlu2 %v2879_v17, %s6740_s20 }
 0x8d2   : > { %2989 = vrot.lane.b32.xlu1 %v2879_v17, %s6741_s21 }
 0x8d6   : > { %v2880_v21 = vpop.f32.mrf.mxu2  ;;  %v2917_v46 = vpop.f32.mrf.mxu0 }
 0x8d7   : > { %v2958_v26 = vpop.f32.mrf.mxu3  ;;  %v2918_v29 = vadd.f32 %v2917_v46, %v2905_v27 }
 0x8de   : > { %v2930_v43 = vpop.f32.mrf.mxu2  ;;  %v2919_v28 = vpop.f32.mrf.mxu0 }
 0x8df   : > { %v2931_v4 = vadd.f32 %v2930_v43, %v2918_v29 }
 0x8e1   : > { %v2944_v32 = vadd.f32 %v2943_v41, %v2931_v4 }
 0x8e3   : > { %v2957_v39 = vadd.f32 %v2956_v19, %v2944_v32 }
 0x8e6   : > { %v2932_v30 = vpop.f32.mrf.mxu2  ;;  %v2969_v38 = vpop.f32.mrf.mxu0 }
 0x8e7   : > { %v2970_v33 = vadd.f32 %v2969_v38, %v2957_v39 }
 0x8ee   : > { %v2982_v34 = vpop.f32.mrf.mxu2  ;;  %v2971_v40 = vpop.f32.mrf.mxu0 }
 0x8ef   : > { %v2983_v36 = vadd.f32 %v2982_v34, %v2970_v33 }
 0x8f1   : > { %3001 = vst.msk [vmem:[#allocation3 + $0x4] sm:$0x1] %vm2986_vm1, %v2983_v36  ;;  %3007 = vrot.lane.b32.xlu0 %v2983_v36, %s6740_s20  ;;  %3003 = vrot.lane.b32.xlu2 %v2983_v36, %s6741_s21  ;;  %s4606_s21 = scalar_lea.hbm %s6700_s14, 64 }
 0x8f2   : > { %p4608_p1 = scmp.lt.s32.totalorder %s4606_s21, %s4602_s22 }
 0x8f4   : > { %p4609_p2 = por %p4608_p1, %p4607_p0 }
 0x8f6   : > { %v2984_v44 = vpop.f32.mrf.mxu2  ;;  %p4610_p3 = pnand %p4609_p2, %p4605_p13 }
 0x8f9   : > { %3011 = vrot.lane.b32.xlu2 %v2983_v36, %s6739_s24 }
 0x92b   : > { %v2994_v45 = vpop.permute.xlu2 %2993 }
 0x92c   : > { %2996 = vst.msk [vmem:[#allocation3 + $0x2] sm:$0x1] %vm2986_vm1, %v2994_v45 }
 0x943   : > { %v2998_v37 = vpop.permute.xlu0 %2997 }
 0x944   : > { %3000 = vst.msk [vmem:[#allocation3 + $0x3] sm:$0x1] %vm2986_vm1, %v2998_v37  ;;  %v2990_v47 = vpop.permute.xlu1 %2989 }
 0x945   : > { %2992 = vst.msk [vmem:[#allocation3 + $0x1] sm:$0x1] %vm2986_vm1, %v2990_v47 }
 0x94b   : > { %v3004_v31 = vpop.permute.xlu2 %3003 }
 0x94c   : > { %3006 = vst.msk [vmem:[#allocation3 + $0x5] sm:$0x1] %vm2986_vm1, %v3004_v31 }
 0x953   : > { %v3012_v35 = vpop.permute.xlu2 %3011 }
 0x954   : > { %3014 = vst.msk [vmem:[#allocation3 + $0x7] sm:$0x1] %vm2986_vm1, %v3012_v35 }
 0x963   : > { %v3008_v48 = vpop.permute.xlu0 %3007 }
 0x964   : > { %3010 = vst.msk [vmem:[#allocation3 + $0x6] sm:$0x1] %vm2986_vm1, %v3008_v48 }
 0x96b   : > { %v3015_v0 = vld [vmem:[#allocation3] sm:$0xff] }
 0x96c   : > { %v3016_v50 = vadd.f32 %v4585_v49, %v3015_v0 }
 0x96e   : > { %v3017_v51 = vsel %vm483_vm0, %v3016_v50, 0.0 }
 0x96f   : > { %3018 = vadd.xlane.f32.xlu0 %v3017_v51 }
 0x9e2   : > { %v3019_v52 = vpop.xlane.xlu0 %3018 }
 0x9e3   : > { %v3020_v54 = vmul.f32 %v3019_v52, %v4918_v25 }
 0x9e5   : > { %v3021_v55 = vsub.f32 %v3016_v50, %v3020_v54 }
 0x9e7   : > { %v3022_v56 = vmul.f32 %v3021_v55, %v3021_v55 }
 0x9e9   : > { %v3023_v57 = vsel %vm483_vm0, %v3022_v56, 0.0 }
 0x9ea   : > { %3024 = vadd.xlane.f32.xlu1 %v3023_v57 }
 0x9eb   : > { %4613 = shalt.err (!%p4610_p3)
}
 0x9ec   : > { %s4695_s19 = smov 128   ;;  %s4696_s25 = smov 8   ;;  %v4561_v2 = vld [vmem:[%s6693_s7] ss:$0 sm:$0xff] }
 0x9ed   : > { %4499 = dma.vmem_to_hbm [thread:$0]  (%p4810_p5), %s3083_s0, 512, %s3085_s18, %s3056_s1, %s4695_s19, %s4695_s19, %s4696_s25  }
 0x9ee   : > { %s3184_s3 = sshll.u32 %s4870_s28, 3  ;;  %s4236_s4 = sshll.u32 %s4793_s17, 3  ;;  %v4562_v5 = vld [vmem:[%s6694_s8] ss:$0 sm:$0xff] }
 0x9ef   : > { %s3066_s18 = scalar_lea.hbm %s6699_s13, %s4236_s4  ;;  %s462_s17 = scalar_lea.vmem [#allocation4], %s3184_s3 }
 0x9f0   : > { %s3068_s22 = sshll.u32 %s462_s17, 4  ;;  %s3070_s24 = sshll.u32 %s3066_s18, 4  ;;  %s3069_s22 = int_to_ptr.vmem [resolvable:$true] %s3068_s22  ;;  %s3071_s24 = int_to_ptr.hbm [resolvable:$true] %s3070_s24 }
 0x9f1   : > { %s3051_s20 = scalar_lea.sflag [#allocation5], %s4870_s28  ;;  %s4628_s21 = sshra.s32 %s3071_s24, 4  ;;  %s4629_s21 = int_to_ptr.hbm [resolvable:$true] %s4628_s21 }
 0x9f2   : > { %s4630_s19 = scalar_lea.hbm %s4629_s21, 8  ;;  %s4634_s3 = scalar_lea.hbm %s6699_s13, 16 }
 0x9f3   : > { %p4631_p4 = scmp.ne.s32.totalorder %s4629_s21, %s4630_s19  ;;  %p4635_p9 = scmp.lt.s32.totalorder %s4629_s21, %s6699_s13 }
 0x9f4   : > { %p4636_p10 = scmp.lt.s32.totalorder %s4634_s3, %s4630_s19 }
 0x9f5   : > { %p4632_p7 = pnand %p4631_p4, %p4810_p5 }
 0x9f6   : > { %p4637_p11 = por %p4636_p10, %p4635_p9 }
 0x9f7   : > { %p4633_p8 = pneg %p4632_p7 }
 0x9f9   : > { %p4638_p12 = pnand %p4637_p11, %p4633_p8 }
 0xa5d   : > { %v3025_v58 = vpop.xlane.xlu1 %3024 }
 0xa5e   : > { %v3026_v22 = vmul.f32 %v3025_v58, %v4918_v25 }
 0xa60   : > { %v3027_v23 = vadd.f32 1e-05, %v3026_v22 }
 0xa62   : > { %4583 = vrsqrt.f32 %v3027_v23  ;;  %vm3034_vm3 = vweird.f32 %v3027_v23 }
 0xa68   : > { %v4584_v59 = vpop.eup %4583 }
 0xa69   : > { %v3029_v60 = vmul.f32 %v4584_v59, %v3027_v23  ;;  %vm3035_vm2 = vweird.f32 %v4584_v59 }
 0xa6a   : > { %vm3036_vm4 = vmor %vm3034_vm3, %vm3035_vm2 }
 0xa6b   : > { %v3030_v61 = vmul.f32 %v4584_v59, %v3029_v60 }
 0xa6d   : > { %v3031_v62 = vmul.f32 0.5, %v3030_v61 }
 0xa6f   : > { %v3032_v63 = vsub.f32 1.5, %v3031_v62 }
 0xa71   : > { %v3033_v1 = vmul.f32 %v4584_v59, %v3032_v63 }
 0xa73   : > { %v3037_v25 = vsel %vm3036_vm4, %v4584_v59, %v3033_v1 }
 0xa74   : > { %v3038_v3 = vmul.f32 %v3037_v25, %v3021_v55 }
 0xa76   : > { %v3043_v6 = vmul.f32 %v4561_v2, %v3038_v3 }
 0xa78   : > { %v3048_v7 = vadd.f32 %v4562_v5, %v3043_v6 }
 0xa7a   : > { %3049 = vst.msk [vmem:[%s462_s17] sm:$0xff] %vm483_vm0, %v3048_v7 }
 0xa7b   : > { %4641 = shalt.err (!%p4638_p12)
}
 0xa7c   : > { %4498 = dma.vmem_to_hbm [thread:$0]  (%p4810_p5), %s3069_s22, 128, %s3071_s24, %s3051_s20  }
 0xa7d PF: > { %p4509_p13 = scmp.ge.s32.totalorder %s4680_s16, 2  ;;  %s3099_s2 = sand.u32 1, %s4668_s29  }
 0xa7e   : > { %s3100_s0 = scalar_lea.sflag [#allocation5], %s3099_s2 }
 0xa7f   : > { %p4503_p0 = pnand %p4509_p13, %p4814_p6 }
 0xa81   : > { %p4504_p1 = pneg %p4503_p0 }
 0xa83   : > { %4659 = dma.done.wait (%p4504_p1), %s3100_s0, 128  }
 0xa84   : > { %4661 = vsyncadd (%p4504_p1), %s3100_s0, 4294967168  ;;  %s3110_s18 = scalar_lea.sflag [#allocation7], %s3099_s2 }
 0xa85   : > { %4663 = dma.done.wait (%p4504_p1), %s3110_s18, 512  }
 0xa86   : > { %4665 = vsyncadd (%p4504_p1), %s3110_s18, 4294966784  ;;  %s6743_s16 = sld [smem:[#allocation11_spill]]  ;;  %s6746_s29 = smov %s4672_s30 }
 0xa87   : > { %s6744_s1 = sld [smem:[#allocation10_spill]] }
 0xa88   : > { %s6745_s15 = sld [smem:[#allocation12_spill]] }
 0xa8c   : > { %p28_p5 = scmp.ge.s32.totalorder %s6743_s16, 4  }
 0xa8d   : > { %s6747_s30 = smov %s6744_s1 }
 0xa8e   :  { %30 = sbr.rel (!%p28_p5) target bundleno = 11 (0xb), region = 137 }
 0xa93   :  { %3116 = vsyncpa [#allocation5], 1 }
 0xa94   :  { %3118 = vsyncpa [#allocation5 + $0x1], 1 }
 0xa95   :  { %3119 = vsyncpa [#allocation7], 1 }
 0xa96   :  { %3121 = vsyncpa [#allocation7 + $0x1], 1 }

</bundles_post_ra>
